<compile_context>
chip_gen: v7x
topology: tpu7x:2x2x1
jax: 0.10.0
libtpu: 0.0.40
codegen_flags: <defaults>
</compile_context>

<pallas_src>
import math

import jax
import jax.numpy as jnp
from jax.experimental import pallas as pl
from jax.experimental.pallas import tpu as pltpu

LN_EPS = 1e-5
NEG_INF = -1e9


def _layer_norm(t, g, b):
    # One-pass statistics: var = E[x^2] - mu^2 (independent reductions instead
    # of a serial mean -> centered-square -> mean chain; halves XLU pressure).
    mu = jnp.mean(t, axis=-1, keepdims=True)
    ms = jnp.mean(t * t, axis=-1, keepdims=True)
    var = ms - mu * mu
    return (t - mu) * jax.lax.rsqrt(var + LN_EPS) * g + b


# ---------------------------------------------------------------------------
# Fused kernel: whole layer stack, grid = (batch_block, layer)
# ---------------------------------------------------------------------------
def _make_stack_kernel(bb: int, Sq: int, Skc: int, Ske: int, D: int, H: int):
    dk = D // H
    R = bb * Sq

    def split_heads(t2, rows):
        # (bb*rows, D) f32 -> (bb*H, rows, dk) bf16.
        # Lane-slice + leading-axis stack is the Mosaic-safe relayout here
        # (reshape that splits the lane dim / a 3-D axis swap would need the
        # same data movement but with riskier lowering at these tiny dims).
        t16 = t2.astype(jnp.bfloat16)
        return jnp.stack(
            [t16[b * rows:(b + 1) * rows, h * dk:(h + 1) * dk]
             for b in range(bb) for h in range(H)], axis=0)

    def attend(q2, k2, v2, bias, Skv):
        # q2: (bb*Sq, D) f32 (scale already folded into wq); k2/v2: (bb*Skv, D)
        # f32; bias: (bb, Sq, Skv) additive mask (0 / -1e9) in bf16.
        q3 = split_heads(q2, Sq)                      # (bb*H, Sq,  dk)
        k3 = split_heads(k2, Skv)                     # (bb*H, Skv, dk)
        v3 = split_heads(v2, Skv)                     # (bb*H, Skv, dk)

        s = jnp.einsum("bqd,bkd->bqk", q3, k3,
                       preferred_element_type=jnp.float32)   # (bb*H, Sq, Skv)
        s = s.reshape(bb, H, Sq, Skv) + bias[:, None, :, :]  # additive mask
        s = s - jnp.max(s, axis=-1, keepdims=True)
        p = jnp.exp(s)
        # approx reciprocal -> EUP slot (idle here); swap to an exact divide if
        # bit-closeness to an f32 torch reference is required.
        p = p * pl.reciprocal(jnp.sum(p, axis=-1, keepdims=True), approx=True)
        p3 = p.reshape(bb * H, Sq, Skv).astype(jnp.bfloat16)

        o = jnp.einsum("bqk,bkd->bqd", p3, v3,
                       preferred_element_type=jnp.float32)   # (bb*H, Sq, dk)
        # Head merge: one lane-dim concat -> single wide output projection
        # (full-K MXU pass) done by the caller.
        att = jnp.concatenate(
            [jnp.concatenate([o[b * H + h] for h in range(H)], axis=-1)
             for b in range(bb)], axis=0)                    # (bb*Sq, D)
        return att

    def cross_block(x, mem16, bias, ln_g, ln_b, wq, bq, wkv, bkv, wo, bo, Skv):
        xn16 = _layer_norm(x, ln_g, ln_b).astype(jnp.bfloat16)
        q2 = jnp.dot(xn16, wq, preferred_element_type=jnp.float32) + bq
        kv = jnp.dot(mem16, wkv, preferred_element_type=jnp.float32) + bkv
        att = attend(q2, kv[:, :D], kv[:, D:], bias, Skv)
        return x + jnp.dot(att.astype(jnp.bfloat16), wo,
                           preferred_element_type=jnp.float32) + bo

    def kernel(*refs):
        (x_ref, ctx_ref, enc_ref, mb_ref, cmb_ref, emb_ref) = refs[:6]
        w = refs[6:34]
        out_ref = refs[34]
        x_scr = refs[35]

        (s_g, s_b, s_wqkv, s_bqkv, s_wo, s_bo) = w[0:6]
        (c_g, c_b, c_wq, c_bq, c_wkv, c_bkv, c_wo, c_bo) = w[6:14]
        (e_g, e_b, e_wq, e_bq, e_wkv, e_bkv, e_wo, e_bo) = w[14:22]
        (f_g, f_b, f_w1, f_b1, f_w2, f_b2) = w[22:28]

        n = pl.program_id(1)

        # Layer 0 of this batch-block: seed the resident f32 activation.
        @pl.when(n == 0)
        def _():
            x_scr[...] = x_ref[...].astype(jnp.float32).reshape(R, D)

        x = x_scr[...]                                       # (bb*Sq, D) f32

        # --- self-attention: fused QKV projection ---------------------------
        xn16 = _layer_norm(x, s_g[...], s_b[...]).astype(jnp.bfloat16)
        qkv = jnp.dot(xn16, s_wqkv[...],
                      preferred_element_type=jnp.float32) + s_bqkv[...]
        att = attend(qkv[:, :D], qkv[:, D:2 * D], qkv[:, 2 * D:],
                     mb_ref[...], Sq)
        x = x + jnp.dot(att.astype(jnp.bfloat16), s_wo[...],
                        preferred_element_type=jnp.float32) + s_bo[...]

        # --- cross-attention over context_x (bf16 memory, fused KV) ---------
        ctx16 = ctx_ref[...].reshape(bb * Skc, D)
        x = cross_block(x, ctx16, cmb_ref[...], c_g[...], c_b[...],
                        c_wq[...], c_bq[...], c_wkv[...], c_bkv[...],
                        c_wo[...], c_bo[...], Skc)

        # --- cross-attention over encoder_x ----------------------------------
        enc16 = enc_ref[...].reshape(bb * Ske, D)
        x = cross_block(x, enc16, emb_ref[...], e_g[...], e_b[...],
                        e_wq[...], e_bq[...], e_wkv[...], e_bkv[...],
                        e_wo[...], e_bo[...], Ske)

        # --- position-wise feed-forward --------------------------------------
        xn16 = _layer_norm(x, f_g[...], f_b[...]).astype(jnp.bfloat16)
        h1 = jnp.dot(xn16, f_w1[...],
                     preferred_element_type=jnp.float32) + f_b1[...]
        h1 = jnp.maximum(h1, 0.0)
        x = x + jnp.dot(h1.astype(jnp.bfloat16), f_w2[...],
                        preferred_element_type=jnp.float32) + f_b2[...]

        x_scr[...] = x

        # HBM writeback only once per batch-block, after the last layer.
        @pl.when(n == pl.num_programs(1) - 1)
        def _():
            out_ref[...] = x.reshape(bb, Sq, D).astype(out_ref.dtype)

    return kernel


# ---------------------------------------------------------------------------
# pallas_call wrapper
# ---------------------------------------------------------------------------
def _flat_params(params):
    flat = [params["self_att"][k]
            for k in ("ln_g", "ln_b", "wqkv", "bqkv", "wo", "bo")]
    for blk in ("ctx_att", "enc_att"):
        flat += [params[blk][k]
                 for k in ("ln_g", "ln_b", "wq", "bq", "wkv", "bkv", "wo", "bo")]
    flat += [params["ff"][k] for k in ("ln_g", "ln_b", "w1", "b1", "w2", "b2")]
    return flat


def _pick_bb(B, max_bb=8):
    bb = 1
    for cand in range(1, min(B, max_bb) + 1):
        if B % cand == 0:
            bb = cand
    return bb


def _vmem_capacity_bytes():
    try:
        cap = getattr(pltpu.get_tpu_info(), "vmem_capacity_bytes", None)
        if cap:
            return int(cap)
    except Exception:
        pass
    return 128 << 20  # v5e/v6e default if the query is unavailable


def double_forward_cross_attention_transformer(x, context_x, encoder_x,
                                               mask, context_mask,
                                               encoder_mask, params, H):
    B, Sq, D = x.shape
    Skc = context_x.shape[1]
    Ske = encoder_x.shape[1]
    N = params["self_att"]["wqkv"].shape[0]
    assert D % H == 0

    bb = _pick_bb(B)

    # bf16 memories (pure K/V matmul inputs -> no extra precision loss); x
    # stays f32 so the resident residual stream is seeded exactly.
    ctx16 = context_x.astype(jnp.bfloat16)
    enc16 = encoder_x.astype(jnp.bfloat16)

    # Additive mask bias, computed once (masks are layer-invariant), bf16.
    def to_bias(m):
        return jnp.where(m != 0, 0.0, NEG_INF).astype(jnp.bfloat16)
    mb, cmb, emb = to_bias(mask), to_bias(context_mask), to_bias(encoder_mask)

    flat = _flat_params(params)
    data = [x, ctx16, enc16, mb, cmb, emb]

    def data_spec(a):
        # one block = bb batch elements; constant across the layer axis
        return pl.BlockSpec((bb,) + a.shape[1:], lambda g, n: (g, 0, 0))

    def weight_spec(a):
        # per-layer block, selected by the layer grid index (double-buffered)
        return pl.BlockSpec((None,) + a.shape[1:], lambda g, n: (n, 0, 0))

    in_specs = [data_spec(a) for a in data] + [weight_spec(a) for a in flat]

    # Chip-aware VMEM budget: fail loudly if the double-buffered working set
    # does not fit this generation (instead of silently min()-capping).
    def blk_bytes(a, lead):
        return lead * int(math.prod(a.shape[1:])) * a.dtype.itemsize
    per_step = (sum(blk_bytes(a, bb) for a in data)
                + sum(blk_bytes(a, 1) for a in flat)
                + blk_bytes(x, bb))                       # output block
    scratch_bytes = bb * Sq * D * 4
    need = 2 * per_step + scratch_bytes + (4 << 20)       # dbl-buffer + temps
    cap = int(_vmem_capacity_bytes() * 0.8)               # ~102MiB v5e/v6e, ~51MiB v7x
    if need > cap:
        raise ValueError(
            f"fused layer stack needs ~{need >> 20} MiB of scoped VMEM but only "
            f"~{cap >> 20} MiB is available on this TPU generation; reduce the "
            f"batch block (bb={bb}) or split the layer axis into per-sublayer "
            f"grid steps (see TODO in the header).")

    kernel = _make_stack_kernel(bb, Sq, Skc, Ske, D, H)
    return pl.pallas_call(
        kernel,
        out_shape=jax.ShapeDtypeStruct((B, Sq, D), x.dtype),
        grid=(B // bb, N),
        in_specs=in_specs,
        out_specs=data_spec(x),
        scratch_shapes=[pltpu.VMEM((bb * Sq, D), jnp.float32)],
        compiler_params=pltpu.CompilerParams(
            dimension_semantics=("parallel", "arbitrary"),
            vmem_limit_bytes=cap),
    )(x, ctx16, enc16, mb, cmb, emb, *flat)


# ---------------------------------------------------------------------------
# Parameter init (deterministic, torch nn.Linear-style uniform bounds).
# Weights stacked over layers (leading N axis); matmul weights in bf16,
# biases / LN parameters in f32.  1/sqrt(dk) is folded into the Q projection.
# ---------------------------------------------------------------------------
def _linear_init(key, fan_in, fan_out, n_layers):
    bound = 1.0 / math.sqrt(fan_in)
    kw, kb = jax.random.split(key)
    w = jax.random.uniform(kw, (n_layers, fan_in, fan_out), jnp.float32,
                           -bound, bound)
    b = jax.random.uniform(kb, (n_layers, 1, fan_out), jnp.float32,
                           -bound, bound)
    return w, b


def _ln_params(d_model, n_layers):
    return (jnp.ones((n_layers, 1, d_model), jnp.float32),
            jnp.zeros((n_layers, 1, d_model), jnp.float32))


def _self_attn_params(key, d_model, H, n_layers):
    scale = 1.0 / math.sqrt(d_model // H)
    kq, kk, kv, ko = jax.random.split(key, 4)
    wq, bq = _linear_init(kq, d_model, d_model, n_layers)
    wk, bk = _linear_init(kk, d_model, d_model, n_layers)
    wv, bv = _linear_init(kv, d_model, d_model, n_layers)
    wo, bo = _linear_init(ko, d_model, d_model, n_layers)
    ln_g, ln_b = _ln_params(d_model, n_layers)
    # Fuse Q,K,V into one (D, 3D) projection; fold the attention scale into Q.
    wqkv = jnp.concatenate([wq * scale, wk, wv], axis=-1).astype(jnp.bfloat16)
    bqkv = jnp.concatenate([bq * scale, bk, bv], axis=-1)
    return dict(ln_g=ln_g, ln_b=ln_b, wqkv=wqkv, bqkv=bqkv,
                wo=wo.astype(jnp.bfloat16), bo=bo)


def _cross_attn_params(key, d_model, H, n_layers):
    scale = 1.0 / math.sqrt(d_model // H)
    kq, kk, kv, ko = jax.random.split(key, 4)
    wq, bq = _linear_init(kq, d_model, d_model, n_layers)
    wk, bk = _linear_init(kk, d_model, d_model, n_layers)
    wv, bv = _linear_init(kv, d_model, d_model, n_layers)
    wo, bo = _linear_init(ko, d_model, d_model, n_layers)
    ln_g, ln_b = _ln_params(d_model, n_layers)
    return dict(ln_g=ln_g, ln_b=ln_b,
                wq=(wq * scale).astype(jnp.bfloat16), bq=bq * scale,
                wkv=jnp.concatenate([wk, wv], axis=-1).astype(jnp.bfloat16),
                bkv=jnp.concatenate([bk, bv], axis=-1),
                wo=wo.astype(jnp.bfloat16), bo=bo)


def _ff_params(key, d_model, d_ff, n_layers):
    k1, k2 = jax.random.split(key)
    w1, b1 = _linear_init(k1, d_model, d_ff, n_layers)
    w2, b2 = _linear_init(k2, d_ff, d_model, n_layers)
    ln_g, ln_b = _ln_params(d_model, n_layers)
    return dict(ln_g=ln_g, ln_b=ln_b, w1=w1.astype(jnp.bfloat16), b1=b1,
                w2=w2.astype(jnp.bfloat16), b2=b2)


def init_transformer_params(key, d_model, H, d_ff, N):
    ks, kc, ke, kf = jax.random.split(key, 4)
    return dict(self_att=_self_attn_params(ks, d_model, H, N),
                ctx_att=_cross_attn_params(kc, d_model, H, N),
                enc_att=_cross_attn_params(ke, d_model, H, N),
                ff=_ff_params(kf, d_model, d_ff, N))


# ---------------------------------------------------------------------------
if __name__ == "__main__":
    B, Sq, Skc, Ske = 2, 8, 8, 16
    d_model, H, d_ff, N = 32, 4, 64, 2
    # dropout (dout_p) is an inference no-op and is omitted.

    key = jax.random.PRNGKey(0)
    kx, kc, ke, kp = jax.random.split(key, 4)
    x = jax.random.normal(kx, (B, Sq, d_model), jnp.float32)
    context_x = jax.random.normal(kc, (B, Skc, d_model), jnp.float32)
    encoder_x = jax.random.normal(ke, (B, Ske, d_model), jnp.float32)

    # causal mask for the self-attn branch, full visibility for both cross-attn
    mask = jnp.broadcast_to(
        jnp.tril(jnp.ones((Sq, Sq), jnp.float32))[None], (B, Sq, Sq))
    context_mask = jnp.ones((B, Sq, Skc), jnp.float32)
    encoder_mask = jnp.ones((B, Sq, Ske), jnp.float32)

    params = init_transformer_params(kp, d_model, H, d_ff, N)

    out = double_forward_cross_attention_transformer(
        x, context_x, encoder_x, mask, context_mask, encoder_mask, params, H)
    out = jax.block_until_ready(out)
    assert out.shape == (B, Sq, d_model)
    assert bool(jnp.all(jnp.isfinite(out)))
    print("KERNEL_OK")
</pallas_src>

<mosaic_0001>
module attributes {stable_mosaic.version = 11 : i64} {
  func.func @kernel(%arg0: i32, %arg1: i32, %arg2: memref<2x8x32xf32, #tpu.memory_space<vmem>>, %arg3: memref<2x8x32xbf16, #tpu.memory_space<vmem>>, %arg4: memref<2x16x32xbf16, #tpu.memory_space<vmem>>, %arg5: memref<2x8x8xbf16, #tpu.memory_space<vmem>>, %arg6: memref<2x8x8xbf16, #tpu.memory_space<vmem>>, %arg7: memref<2x8x16xbf16, #tpu.memory_space<vmem>>, %arg8: memref<1x1x32xf32, #tpu.memory_space<vmem>>, %arg9: memref<1x1x32xf32, #tpu.memory_space<vmem>>, %arg10: memref<1x32x96xbf16, #tpu.memory_space<vmem>>, %arg11: memref<1x1x96xf32, #tpu.memory_space<vmem>>, %arg12: memref<1x32x32xbf16, #tpu.memory_space<vmem>>, %arg13: memref<1x1x32xf32, #tpu.memory_space<vmem>>, %arg14: memref<1x1x32xf32, #tpu.memory_space<vmem>>, %arg15: memref<1x1x32xf32, #tpu.memory_space<vmem>>, %arg16: memref<1x32x32xbf16, #tpu.memory_space<vmem>>, %arg17: memref<1x1x32xf32, #tpu.memory_space<vmem>>, %arg18: memref<1x32x64xbf16, #tpu.memory_space<vmem>>, %arg19: memref<1x1x64xf32, #tpu.memory_space<vmem>>, %arg20: memref<1x32x32xbf16, #tpu.memory_space<vmem>>, %arg21: memref<1x1x32xf32, #tpu.memory_space<vmem>>, %arg22: memref<1x1x32xf32, #tpu.memory_space<vmem>>, %arg23: memref<1x1x32xf32, #tpu.memory_space<vmem>>, %arg24: memref<1x32x32xbf16, #tpu.memory_space<vmem>>, %arg25: memref<1x1x32xf32, #tpu.memory_space<vmem>>, %arg26: memref<1x32x64xbf16, #tpu.memory_space<vmem>>, %arg27: memref<1x1x64xf32, #tpu.memory_space<vmem>>, %arg28: memref<1x32x32xbf16, #tpu.memory_space<vmem>>, %arg29: memref<1x1x32xf32, #tpu.memory_space<vmem>>, %arg30: memref<1x1x32xf32, #tpu.memory_space<vmem>>, %arg31: memref<1x1x32xf32, #tpu.memory_space<vmem>>, %arg32: memref<1x32x64xbf16, #tpu.memory_space<vmem>>, %arg33: memref<1x1x64xf32, #tpu.memory_space<vmem>>, %arg34: memref<1x64x32xbf16, #tpu.memory_space<vmem>>, %arg35: memref<1x1x32xf32, #tpu.memory_space<vmem>>, %arg36: memref<2x8x32xf32, #tpu.memory_space<vmem>>, %arg37: memref<16x32xf32, #tpu.memory_space<vmem>>) attributes {dimension_semantics = [#tpu.dimension_semantics<parallel>, #tpu.dimension_semantics<arbitrary>], iteration_bounds = array<i64: 1, 2>, scalar_prefetch = 0 : i64, scratch_operands = 1 : i64, tpu.core_type = #tpu.core_type<tc>, window_params = [{transform_indices = @transform_0, window_bounds = array<i64: 2, 8, 32>}, {transform_indices = @transform_1, window_bounds = array<i64: 2, 8, 32>}, {transform_indices = @transform_2, window_bounds = array<i64: 2, 16, 32>}, {transform_indices = @transform_3, window_bounds = array<i64: 2, 8, 8>}, {transform_indices = @transform_4, window_bounds = array<i64: 2, 8, 8>}, {transform_indices = @transform_5, window_bounds = array<i64: 2, 8, 16>}, {transform_indices = @transform_6, window_bounds = array<i64: 1, 1, 32>}, {transform_indices = @transform_7, window_bounds = array<i64: 1, 1, 32>}, {transform_indices = @transform_8, window_bounds = array<i64: 1, 32, 96>}, {transform_indices = @transform_9, window_bounds = array<i64: 1, 1, 96>}, {transform_indices = @transform_10, window_bounds = array<i64: 1, 32, 32>}, {transform_indices = @transform_11, window_bounds = array<i64: 1, 1, 32>}, {transform_indices = @transform_12, window_bounds = array<i64: 1, 1, 32>}, {transform_indices = @transform_13, window_bounds = array<i64: 1, 1, 32>}, {transform_indices = @transform_14, window_bounds = array<i64: 1, 32, 32>}, {transform_indices = @transform_15, window_bounds = array<i64: 1, 1, 32>}, {transform_indices = @transform_16, window_bounds = array<i64: 1, 32, 64>}, {transform_indices = @transform_17, window_bounds = array<i64: 1, 1, 64>}, {transform_indices = @transform_18, window_bounds = array<i64: 1, 32, 32>}, {transform_indices = @transform_19, window_bounds = array<i64: 1, 1, 32>}, {transform_indices = @transform_20, window_bounds = array<i64: 1, 1, 32>}, {transform_indices = @transform_21, window_bounds = array<i64: 1, 1, 32>}, {transform_indices = @transform_22, window_bounds = array<i64: 1, 32, 32>}, {transform_indices = @transform_23, window_bounds = array<i64: 1, 1, 32>}, {transform_indices = @transform_24, window_bounds = array<i64: 1, 32, 64>}, {transform_indices = @transform_25, window_bounds = array<i64: 1, 1, 64>}, {transform_indices = @transform_26, window_bounds = array<i64: 1, 32, 32>}, {transform_indices = @transform_27, window_bounds = array<i64: 1, 1, 32>}, {transform_indices = @transform_28, window_bounds = array<i64: 1, 1, 32>}, {transform_indices = @transform_29, window_bounds = array<i64: 1, 1, 32>}, {transform_indices = @transform_30, window_bounds = array<i64: 1, 32, 64>}, {transform_indices = @transform_31, window_bounds = array<i64: 1, 1, 64>}, {transform_indices = @transform_32, window_bounds = array<i64: 1, 64, 32>}, {transform_indices = @transform_33, window_bounds = array<i64: 1, 1, 32>}, {transform_indices = @transform_34, window_bounds = array<i64: 2, 8, 32>}]} {
    %c0_i32 = arith.constant 0 : i32
    %0 = arith.cmpi eq, %arg1, %c0_i32 : i32
    %1 = arith.extui %0 : i1 to i32
    %c0_i32_0 = arith.constant 0 : i32
    %2 = arith.cmpi ne, %1, %c0_i32_0 : i32
    scf.if %2 {
      %c0_146 = arith.constant 0 : index
      %c0_147 = arith.constant 0 : index
      %c0_148 = arith.constant 0 : index
      %486 = vector.load %arg2[%c0_146, %c0_147, %c0_148] : memref<2x8x32xf32, #tpu.memory_space<vmem>>, vector<2x8x32xf32>
      %487 = vector.shape_cast %486 : vector<2x8x32xf32> to vector<16x32xf32>
      %c0_149 = arith.constant 0 : index
      %c0_150 = arith.constant 0 : index
      %488 = vector.load %arg37[%c0_149, %c0_150] : memref<16x32xf32, #tpu.memory_space<vmem>>, vector<16x32xf32>
      tpu.vector_store %arg37[%c0_149, %c0_150], %487 {strides = array<i32>} : memref<16x32xf32, #tpu.memory_space<vmem>>, vector<16x32xf32>,
    } else {
    }
    %c0 = arith.constant 0 : index
    %c0_1 = arith.constant 0 : index
    %3 = vector.load %arg37[%c0, %c0_1] : memref<16x32xf32, #tpu.memory_space<vmem>>, vector<16x32xf32>
    %c0_2 = arith.constant 0 : index
    %c0_3 = arith.constant 0 : index
    %c0_4 = arith.constant 0 : index
    %4 = vector.load %arg8[%c0_2, %c0_3, %c0_4] : memref<1x1x32xf32, #tpu.memory_space<vmem>>, vector<1x1x32xf32>
    %5 = vector.shape_cast %4 : vector<1x1x32xf32> to vector<1x32xf32>
    %c0_5 = arith.constant 0 : index
    %c0_6 = arith.constant 0 : index
    %c0_7 = arith.constant 0 : index
    %6 = vector.load %arg9[%c0_5, %c0_6, %c0_7] : memref<1x1x32xf32, #tpu.memory_space<vmem>>, vector<1x1x32xf32>
    %7 = vector.shape_cast %6 : vector<1x1x32xf32> to vector<1x32xf32>
    %cst = arith.constant dense<0.000000e+00> : vector<16xf32>
    %8 = vector.multi_reduction <add>, %3, %cst [1] : vector<16x32xf32> to vector<16xf32>
    %9 = vector.shape_cast %8 : vector<16xf32> to vector<16x1xf32>
    %cst_8 = arith.constant 3.200000e+01 : f32
    %10 = vector.broadcast %cst_8 : f32 to vector<16x1xf32>
    %11 = arith.divf %9, %10 : vector<16x1xf32>
    %12 = arith.mulf %3, %3 : vector<16x32xf32>
    %cst_9 = arith.constant dense<0.000000e+00> : vector<16xf32>
    %13 = vector.multi_reduction <add>, %12, %cst_9 [1] : vector<16x32xf32> to vector<16xf32>
    %14 = vector.shape_cast %13 : vector<16xf32> to vector<16x1xf32>
    %cst_10 = arith.constant 3.200000e+01 : f32
    %15 = vector.broadcast %cst_10 : f32 to vector<16x1xf32>
    %16 = arith.divf %14, %15 : vector<16x1xf32>
    %17 = arith.mulf %11, %11 : vector<16x1xf32>
    %18 = arith.subf %16, %17 : vector<16x1xf32>
    %19 = vector.broadcast %11 : vector<16x1xf32> to vector<16x32xf32>
    %20 = arith.subf %3, %19 : vector<16x32xf32>
    %cst_11 = arith.constant 9.99999974E-6 : f32
    %21 = vector.broadcast %cst_11 : f32 to vector<16x1xf32>
    %22 = arith.addf %18, %21 : vector<16x1xf32>
    %23 = math.rsqrt %22 : vector<16x1xf32>
    %24 = vector.broadcast %23 : vector<16x1xf32> to vector<16x32xf32>
    %25 = arith.mulf %20, %24 : vector<16x32xf32>
    %26 = vector.broadcast %5 : vector<1x32xf32> to vector<16x32xf32>
    %27 = arith.mulf %25, %26 : vector<16x32xf32>
    %28 = vector.broadcast %7 : vector<1x32xf32> to vector<16x32xf32>
    %29 = arith.addf %27, %28 : vector<16x32xf32>
    %30 = arith.truncf %29 : vector<16x32xf32> to vector<16x32xbf16>
    %c0_12 = arith.constant 0 : index
    %c0_13 = arith.constant 0 : index
    %c0_14 = arith.constant 0 : index
    %31 = vector.load %arg10[%c0_12, %c0_13, %c0_14] : memref<1x32x96xbf16, #tpu.memory_space<vmem>>, vector<1x32x96xbf16>
    %32 = vector.shape_cast %31 : vector<1x32x96xbf16> to vector<32x96xbf16>
    %cst_15 = arith.constant dense<0.000000e+00> : vector<16x96xf32>
    %33 = tpu.matmul %30, %32, %cst_15 {dimension_numbers = #tpu.dot_dimension_numbers<[1], [0], [0], [1], [0, 0, 1, 1], [], []>} : vector<16x32xbf16>, vector<32x96xbf16>, vector<16x96xf32> -> vector<16x96xf32>
    %c0_16 = arith.constant 0 : index
    %c0_17 = arith.constant 0 : index
    %c0_18 = arith.constant 0 : index
    %34 = vector.load %arg11[%c0_16, %c0_17, %c0_18] : memref<1x1x96xf32, #tpu.memory_space<vmem>>, vector<1x1x96xf32>
    %35 = vector.shape_cast %34 : vector<1x1x96xf32> to vector<1x96xf32>
    %36 = vector.broadcast %35 : vector<1x96xf32> to vector<16x96xf32>
    %37 = arith.addf %33, %36 : vector<16x96xf32>
    %38 = vector.extract_strided_slice %37 {offsets = [0, 0], sizes = [16, 32], strides = [1, 1]} : vector<16x96xf32> to vector<16x32xf32>
    %39 = vector.extract_strided_slice %37 {offsets = [0, 32], sizes = [16, 32], strides = [1, 1]} : vector<16x96xf32> to vector<16x32xf32>
    %40 = vector.extract_strided_slice %37 {offsets = [0, 64], sizes = [16, 32], strides = [1, 1]} : vector<16x96xf32> to vector<16x32xf32>
    %c0_19 = arith.constant 0 : index
    %c0_20 = arith.constant 0 : index
    %c0_21 = arith.constant 0 : index
    %41 = vector.load %arg5[%c0_19, %c0_20, %c0_21] : memref<2x8x8xbf16, #tpu.memory_space<vmem>>, vector<2x8x8xbf16>
    %42 = arith.truncf %38 : vector<16x32xf32> to vector<16x32xbf16>
    %43 = vector.extract_strided_slice %42 {offsets = [0, 0], sizes = [8, 8], strides = [1, 1]} : vector<16x32xbf16> to vector<8x8xbf16>
    %44 = vector.extract_strided_slice %42 {offsets = [0, 8], sizes = [8, 8], strides = [1, 1]} : vector<16x32xbf16> to vector<8x8xbf16>
    %45 = vector.extract_strided_slice %42 {offsets = [0, 16], sizes = [8, 8], strides = [1, 1]} : vector<16x32xbf16> to vector<8x8xbf16>
    %46 = vector.extract_strided_slice %42 {offsets = [0, 24], sizes = [8, 8], strides = [1, 1]} : vector<16x32xbf16> to vector<8x8xbf16>
    %47 = vector.extract_strided_slice %42 {offsets = [8, 0], sizes = [8, 8], strides = [1, 1]} : vector<16x32xbf16> to vector<8x8xbf16>
    %48 = vector.extract_strided_slice %42 {offsets = [8, 8], sizes = [8, 8], strides = [1, 1]} : vector<16x32xbf16> to vector<8x8xbf16>
    %49 = vector.extract_strided_slice %42 {offsets = [8, 16], sizes = [8, 8], strides = [1, 1]} : vector<16x32xbf16> to vector<8x8xbf16>
    %50 = vector.extract_strided_slice %42 {offsets = [8, 24], sizes = [8, 8], strides = [1, 1]} : vector<16x32xbf16> to vector<8x8xbf16>
    %51 = vector.shape_cast %43 : vector<8x8xbf16> to vector<1x8x8xbf16>
    %52 = vector.shape_cast %44 : vector<8x8xbf16> to vector<1x8x8xbf16>
    %53 = vector.shape_cast %45 : vector<8x8xbf16> to vector<1x8x8xbf16>
    %54 = vector.shape_cast %46 : vector<8x8xbf16> to vector<1x8x8xbf16>
    %55 = vector.shape_cast %47 : vector<8x8xbf16> to vector<1x8x8xbf16>
    %56 = vector.shape_cast %48 : vector<8x8xbf16> to vector<1x8x8xbf16>
    %57 = vector.shape_cast %49 : vector<8x8xbf16> to vector<1x8x8xbf16>
    %58 = vector.shape_cast %50 : vector<8x8xbf16> to vector<1x8x8xbf16>
    %59 = tpu.concatenate %51, %52, %53, %54, %55, %56, %57, %58 in 0 : vector<1x8x8xbf16>, vector<1x8x8xbf16>, vector<1x8x8xbf16>, vector<1x8x8xbf16>, vector<1x8x8xbf16>, vector<1x8x8xbf16>, vector<1x8x8xbf16>, vector<1x8x8xbf16> -> vector<8x8x8xbf16>
    %60 = arith.truncf %39 : vector<16x32xf32> to vector<16x32xbf16>
    %61 = vector.extract_strided_slice %60 {offsets = [0, 0], sizes = [8, 8], strides = [1, 1]} : vector<16x32xbf16> to vector<8x8xbf16>
    %62 = vector.extract_strided_slice %60 {offsets = [0, 8], sizes = [8, 8], strides = [1, 1]} : vector<16x32xbf16> to vector<8x8xbf16>
    %63 = vector.extract_strided_slice %60 {offsets = [0, 16], sizes = [8, 8], strides = [1, 1]} : vector<16x32xbf16> to vector<8x8xbf16>
    %64 = vector.extract_strided_slice %60 {offsets = [0, 24], sizes = [8, 8], strides = [1, 1]} : vector<16x32xbf16> to vector<8x8xbf16>
    %65 = vector.extract_strided_slice %60 {offsets = [8, 0], sizes = [8, 8], strides = [1, 1]} : vector<16x32xbf16> to vector<8x8xbf16>
    %66 = vector.extract_strided_slice %60 {offsets = [8, 8], sizes = [8, 8], strides = [1, 1]} : vector<16x32xbf16> to vector<8x8xbf16>
    %67 = vector.extract_strided_slice %60 {offsets = [8, 16], sizes = [8, 8], strides = [1, 1]} : vector<16x32xbf16> to vector<8x8xbf16>
    %68 = vector.extract_strided_slice %60 {offsets = [8, 24], sizes = [8, 8], strides = [1, 1]} : vector<16x32xbf16> to vector<8x8xbf16>
    %69 = vector.shape_cast %61 : vector<8x8xbf16> to vector<1x8x8xbf16>
    %70 = vector.shape_cast %62 : vector<8x8xbf16> to vector<1x8x8xbf16>
    %71 = vector.shape_cast %63 : vector<8x8xbf16> to vector<1x8x8xbf16>
    %72 = vector.shape_cast %64 : vector<8x8xbf16> to vector<1x8x8xbf16>
    %73 = vector.shape_cast %65 : vector<8x8xbf16> to vector<1x8x8xbf16>
    %74 = vector.shape_cast %66 : vector<8x8xbf16> to vector<1x8x8xbf16>
    %75 = vector.shape_cast %67 : vector<8x8xbf16> to vector<1x8x8xbf16>
    %76 = vector.shape_cast %68 : vector<8x8xbf16> to vector<1x8x8xbf16>
    %77 = tpu.concatenate %69, %70, %71, %72, %73, %74, %75, %76 in 0 : vector<1x8x8xbf16>, vector<1x8x8xbf16>, vector<1x8x8xbf16>, vector<1x8x8xbf16>, vector<1x8x8xbf16>, vector<1x8x8xbf16>, vector<1x8x8xbf16>, vector<1x8x8xbf16> -> vector<8x8x8xbf16>
    %78 = arith.truncf %40 : vector<16x32xf32> to vector<16x32xbf16>
    %79 = vector.extract_strided_slice %78 {offsets = [0, 0], sizes = [8, 8], strides = [1, 1]} : vector<16x32xbf16> to vector<8x8xbf16>
    %80 = vector.extract_strided_slice %78 {offsets = [0, 8], sizes = [8, 8], strides = [1, 1]} : vector<16x32xbf16> to vector<8x8xbf16>
    %81 = vector.extract_strided_slice %78 {offsets = [0, 16], sizes = [8, 8], strides = [1, 1]} : vector<16x32xbf16> to vector<8x8xbf16>
    %82 = vector.extract_strided_slice %78 {offsets = [0, 24], sizes = [8, 8], strides = [1, 1]} : vector<16x32xbf16> to vector<8x8xbf16>
    %83 = vector.extract_strided_slice %78 {offsets = [8, 0], sizes = [8, 8], strides = [1, 1]} : vector<16x32xbf16> to vector<8x8xbf16>
    %84 = vector.extract_strided_slice %78 {offsets = [8, 8], sizes = [8, 8], strides = [1, 1]} : vector<16x32xbf16> to vector<8x8xbf16>
    %85 = vector.extract_strided_slice %78 {offsets = [8, 16], sizes = [8, 8], strides = [1, 1]} : vector<16x32xbf16> to vector<8x8xbf16>
    %86 = vector.extract_strided_slice %78 {offsets = [8, 24], sizes = [8, 8], strides = [1, 1]} : vector<16x32xbf16> to vector<8x8xbf16>
    %87 = vector.shape_cast %79 : vector<8x8xbf16> to vector<1x8x8xbf16>
    %88 = vector.shape_cast %80 : vector<8x8xbf16> to vector<1x8x8xbf16>
    %89 = vector.shape_cast %81 : vector<8x8xbf16> to vector<1x8x8xbf16>
    %90 = vector.shape_cast %82 : vector<8x8xbf16> to vector<1x8x8xbf16>
    %91 = vector.shape_cast %83 : vector<8x8xbf16> to vector<1x8x8xbf16>
    %92 = vector.shape_cast %84 : vector<8x8xbf16> to vector<1x8x8xbf16>
    %93 = vector.shape_cast %85 : vector<8x8xbf16> to vector<1x8x8xbf16>
    %94 = vector.shape_cast %86 : vector<8x8xbf16> to vector<1x8x8xbf16>
    %95 = tpu.concatenate %87, %88, %89, %90, %91, %92, %93, %94 in 0 : vector<1x8x8xbf16>, vector<1x8x8xbf16>, vector<1x8x8xbf16>, vector<1x8x8xbf16>, vector<1x8x8xbf16>, vector<1x8x8xbf16>, vector<1x8x8xbf16>, vector<1x8x8xbf16> -> vector<8x8x8xbf16>
    "tpu.trace_start"() <{level = 10 : i32, message = "bqd,bkd->bqk"}> : () -> ()
    %cst_22 = arith.constant dense<0.000000e+00> : vector<8x8x8xf32>
    %96 = tpu.matmul %59, %77, %cst_22 {dimension_numbers = #tpu.dot_dimension_numbers<[2], [2], [1], [1], [0, 0, 0, 1, 1, 1], [0], [0]>} : vector<8x8x8xbf16>, vector<8x8x8xbf16>, vector<8x8x8xf32> -> vector<8x8x8xf32>
    "tpu.trace_stop"() : () -> ()
    %97 = vector.shape_cast %96 : vector<8x8x8xf32> to vector<2x4x8x8xf32>
    %98 = vector.shape_cast %41 : vector<2x8x8xbf16> to vector<2x1x8x8xbf16>
    %99 = arith.extf %98 : vector<2x1x8x8xbf16> to vector<2x1x8x8xf32>
    %100 = vector.broadcast %99 : vector<2x1x8x8xf32> to vector<2x4x8x8xf32>
    %101 = arith.addf %97, %100 : vector<2x4x8x8xf32>
    %cst_23 = arith.constant dense<0xFF800000> : vector<2x4x8xf32>
    %102 = vector.multi_reduction <maximumf>, %101, %cst_23 [3] : vector<2x4x8x8xf32> to vector<2x4x8xf32>
    %103 = vector.shape_cast %102 : vector<2x4x8xf32> to vector<2x4x8x1xf32>
    %104 = vector.broadcast %103 : vector<2x4x8x1xf32> to vector<2x4x8x8xf32>
    %105 = arith.subf %101, %104 : vector<2x4x8x8xf32>
    %106 = math.exp %105 : vector<2x4x8x8xf32>
    %cst_24 = arith.constant dense<0.000000e+00> : vector<2x4x8xf32>
    %107 = vector.multi_reduction <add>, %106, %cst_24 [3] : vector<2x4x8x8xf32> to vector<2x4x8xf32>
    %108 = vector.shape_cast %107 : vector<2x4x8xf32> to vector<2x4x8x1xf32>
    %109 = tpu.reciprocal %108 {approx = true} : vector<2x4x8x1xf32> -> vector<2x4x8x1xf32>
    %110 = vector.broadcast %109 : vector<2x4x8x1xf32> to vector<2x4x8x8xf32>
    %111 = arith.mulf %106, %110 : vector<2x4x8x8xf32>
    %112 = vector.shape_cast %111 : vector<2x4x8x8xf32> to vector<8x8x8xf32>
    %113 = arith.truncf %112 : vector<8x8x8xf32> to vector<8x8x8xbf16>
    "tpu.trace_start"() <{level = 10 : i32, message = "bqk,bkd->bqd"}> : () -> ()
    %cst_25 = arith.constant dense<0.000000e+00> : vector<8x8x8xf32>
    %114 = tpu.matmul %113, %95, %cst_25 {dimension_numbers = #tpu.dot_dimension_numbers<[2], [1], [1], [2], [0, 0, 0, 1, 1, 2], [0], [0]>} : vector<8x8x8xbf16>, vector<8x8x8xbf16>, vector<8x8x8xf32> -> vector<8x8x8xf32>
    "tpu.trace_stop"() : () -> ()
    %115 = vector.extract_strided_slice %114 {offsets = [0, 0, 0], sizes = [1, 8, 8], strides = [1, 1, 1]} : vector<8x8x8xf32> to vector<1x8x8xf32>
    %116 = vector.shape_cast %115 : vector<1x8x8xf32> to vector<8x8xf32>
    %117 = vector.extract_strided_slice %114 {offsets = [1, 0, 0], sizes = [1, 8, 8], strides = [1, 1, 1]} : vector<8x8x8xf32> to vector<1x8x8xf32>
    %118 = vector.shape_cast %117 : vector<1x8x8xf32> to vector<8x8xf32>
    %119 = vector.extract_strided_slice %114 {offsets = [2, 0, 0], sizes = [1, 8, 8], strides = [1, 1, 1]} : vector<8x8x8xf32> to vector<1x8x8xf32>
    %120 = vector.shape_cast %119 : vector<1x8x8xf32> to vector<8x8xf32>
    %121 = vector.extract_strided_slice %114 {offsets = [3, 0, 0], sizes = [1, 8, 8], strides = [1, 1, 1]} : vector<8x8x8xf32> to vector<1x8x8xf32>
    %122 = vector.shape_cast %121 : vector<1x8x8xf32> to vector<8x8xf32>
    %123 = tpu.concatenate %116, %118, %120, %122 in 1 : vector<8x8xf32>, vector<8x8xf32>, vector<8x8xf32>, vector<8x8xf32> -> vector<8x32xf32>
    %124 = vector.extract_strided_slice %114 {offsets = [4, 0, 0], sizes = [1, 8, 8], strides = [1, 1, 1]} : vector<8x8x8xf32> to vector<1x8x8xf32>
    %125 = vector.shape_cast %124 : vector<1x8x8xf32> to vector<8x8xf32>
    %126 = vector.extract_strided_slice %114 {offsets = [5, 0, 0], sizes = [1, 8, 8], strides = [1, 1, 1]} : vector<8x8x8xf32> to vector<1x8x8xf32>
    %127 = vector.shape_cast %126 : vector<1x8x8xf32> to vector<8x8xf32>
    %128 = vector.extract_strided_slice %114 {offsets = [6, 0, 0], sizes = [1, 8, 8], strides = [1, 1, 1]} : vector<8x8x8xf32> to vector<1x8x8xf32>
    %129 = vector.shape_cast %128 : vector<1x8x8xf32> to vector<8x8xf32>
    %130 = vector.extract_strided_slice %114 {offsets = [7, 0, 0], sizes = [1, 8, 8], strides = [1, 1, 1]} : vector<8x8x8xf32> to vector<1x8x8xf32>
    %131 = vector.shape_cast %130 : vector<1x8x8xf32> to vector<8x8xf32>
    %132 = tpu.concatenate %125, %127, %129, %131 in 1 : vector<8x8xf32>, vector<8x8xf32>, vector<8x8xf32>, vector<8x8xf32> -> vector<8x32xf32>
    %133 = tpu.concatenate %123, %132 in 0 : vector<8x32xf32>, vector<8x32xf32> -> vector<16x32xf32>
    %134 = arith.truncf %133 : vector<16x32xf32> to vector<16x32xbf16>
    %c0_26 = arith.constant 0 : index
    %c0_27 = arith.constant 0 : index
    %c0_28 = arith.constant 0 : index
    %135 = vector.load %arg12[%c0_26, %c0_27, %c0_28] : memref<1x32x32xbf16, #tpu.memory_space<vmem>>, vector<1x32x32xbf16>
    %136 = vector.shape_cast %135 : vector<1x32x32xbf16> to vector<32x32xbf16>
    %cst_29 = arith.constant dense<0.000000e+00> : vector<16x32xf32>
    %137 = tpu.matmul %134, %136, %cst_29 {dimension_numbers = #tpu.dot_dimension_numbers<[1], [0], [0], [1], [0, 0, 1, 1], [], []>} : vector<16x32xbf16>, vector<32x32xbf16>, vector<16x32xf32> -> vector<16x32xf32>
    %138 = arith.addf %3, %137 : vector<16x32xf32>
    %c0_30 = arith.constant 0 : index
    %c0_31 = arith.constant 0 : index
    %c0_32 = arith.constant 0 : index
    %139 = vector.load %arg13[%c0_30, %c0_31, %c0_32] : memref<1x1x32xf32, #tpu.memory_space<vmem>>, vector<1x1x32xf32>
    %140 = vector.shape_cast %139 : vector<1x1x32xf32> to vector<1x32xf32>
    %141 = vector.broadcast %140 : vector<1x32xf32> to vector<16x32xf32>
    %142 = arith.addf %138, %141 : vector<16x32xf32>
    %c0_33 = arith.constant 0 : index
    %c0_34 = arith.constant 0 : index
    %c0_35 = arith.constant 0 : index
    %143 = vector.load %arg3[%c0_33, %c0_34, %c0_35] : memref<2x8x32xbf16, #tpu.memory_space<vmem>>, vector<2x8x32xbf16>
    %144 = vector.shape_cast %143 : vector<2x8x32xbf16> to vector<16x32xbf16>
    %c0_36 = arith.constant 0 : index
    %c0_37 = arith.constant 0 : index
    %c0_38 = arith.constant 0 : index
    %145 = vector.load %arg6[%c0_36, %c0_37, %c0_38] : memref<2x8x8xbf16, #tpu.memory_space<vmem>>, vector<2x8x8xbf16>
    %c0_39 = arith.constant 0 : index
    %c0_40 = arith.constant 0 : index
    %c0_41 = arith.constant 0 : index
    %146 = vector.load %arg14[%c0_39, %c0_40, %c0_41] : memref<1x1x32xf32, #tpu.memory_space<vmem>>, vector<1x1x32xf32>
    %147 = vector.shape_cast %146 : vector<1x1x32xf32> to vector<1x32xf32>
    %c0_42 = arith.constant 0 : index
    %c0_43 = arith.constant 0 : index
    %c0_44 = arith.constant 0 : index
    %148 = vector.load %arg15[%c0_42, %c0_43, %c0_44] : memref<1x1x32xf32, #tpu.memory_space<vmem>>, vector<1x1x32xf32>
    %149 = vector.shape_cast %148 : vector<1x1x32xf32> to vector<1x32xf32>
    %c0_45 = arith.constant 0 : index
    %c0_46 = arith.constant 0 : index
    %c0_47 = arith.constant 0 : index
    %150 = vector.load %arg16[%c0_45, %c0_46, %c0_47] : memref<1x32x32xbf16, #tpu.memory_space<vmem>>, vector<1x32x32xbf16>
    %151 = vector.shape_cast %150 : vector<1x32x32xbf16> to vector<32x32xbf16>
    %c0_48 = arith.constant 0 : index
    %c0_49 = arith.constant 0 : index
    %c0_50 = arith.constant 0 : index
    %152 = vector.load %arg17[%c0_48, %c0_49, %c0_50] : memref<1x1x32xf32, #tpu.memory_space<vmem>>, vector<1x1x32xf32>
    %153 = vector.shape_cast %152 : vector<1x1x32xf32> to vector<1x32xf32>
    %c0_51 = arith.constant 0 : index
    %c0_52 = arith.constant 0 : index
    %c0_53 = arith.constant 0 : index
    %154 = vector.load %arg18[%c0_51, %c0_52, %c0_53] : memref<1x32x64xbf16, #tpu.memory_space<vmem>>, vector<1x32x64xbf16>
    %155 = vector.shape_cast %154 : vector<1x32x64xbf16> to vector<32x64xbf16>
    %c0_54 = arith.constant 0 : index
    %c0_55 = arith.constant 0 : index
    %c0_56 = arith.constant 0 : index
    %156 = vector.load %arg19[%c0_54, %c0_55, %c0_56] : memref<1x1x64xf32, #tpu.memory_space<vmem>>, vector<1x1x64xf32>
    %157 = vector.shape_cast %156 : vector<1x1x64xf32> to vector<1x64xf32>
    %c0_57 = arith.constant 0 : index
    %c0_58 = arith.constant 0 : index
    %c0_59 = arith.constant 0 : index
    %158 = vector.load %arg20[%c0_57, %c0_58, %c0_59] : memref<1x32x32xbf16, #tpu.memory_space<vmem>>, vector<1x32x32xbf16>
    %159 = vector.shape_cast %158 : vector<1x32x32xbf16> to vector<32x32xbf16>
    %c0_60 = arith.constant 0 : index
    %c0_61 = arith.constant 0 : index
    %c0_62 = arith.constant 0 : index
    %160 = vector.load %arg21[%c0_60, %c0_61, %c0_62] : memref<1x1x32xf32, #tpu.memory_space<vmem>>, vector<1x1x32xf32>
    %161 = vector.shape_cast %160 : vector<1x1x32xf32> to vector<1x32xf32>
    %cst_63 = arith.constant dense<0.000000e+00> : vector<16xf32>
    %162 = vector.multi_reduction <add>, %142, %cst_63 [1] : vector<16x32xf32> to vector<16xf32>
    %163 = vector.shape_cast %162 : vector<16xf32> to vector<16x1xf32>
    %cst_64 = arith.constant 3.200000e+01 : f32
    %164 = vector.broadcast %cst_64 : f32 to vector<16x1xf32>
    %165 = arith.divf %163, %164 : vector<16x1xf32>
    %166 = arith.mulf %142, %142 : vector<16x32xf32>
    %cst_65 = arith.constant dense<0.000000e+00> : vector<16xf32>
    %167 = vector.multi_reduction <add>, %166, %cst_65 [1] : vector<16x32xf32> to vector<16xf32>
    %168 = vector.shape_cast %167 : vector<16xf32> to vector<16x1xf32>
    %cst_66 = arith.constant 3.200000e+01 : f32
    %169 = vector.broadcast %cst_66 : f32 to vector<16x1xf32>
    %170 = arith.divf %168, %169 : vector<16x1xf32>
    %171 = arith.mulf %165, %165 : vector<16x1xf32>
    %172 = arith.subf %170, %171 : vector<16x1xf32>
    %173 = vector.broadcast %165 : vector<16x1xf32> to vector<16x32xf32>
    %174 = arith.subf %142, %173 : vector<16x32xf32>
    %cst_67 = arith.constant 9.99999974E-6 : f32
    %175 = vector.broadcast %cst_67 : f32 to vector<16x1xf32>
    %176 = arith.addf %172, %175 : vector<16x1xf32>
    %177 = math.rsqrt %176 : vector<16x1xf32>
    %178 = vector.broadcast %177 : vector<16x1xf32> to vector<16x32xf32>
    %179 = arith.mulf %174, %178 : vector<16x32xf32>
    %180 = vector.broadcast %147 : vector<1x32xf32> to vector<16x32xf32>
    %181 = arith.mulf %179, %180 : vector<16x32xf32>
    %182 = vector.broadcast %149 : vector<1x32xf32> to vector<16x32xf32>
    %183 = arith.addf %181, %182 : vector<16x32xf32>
    %184 = arith.truncf %183 : vector<16x32xf32> to vector<16x32xbf16>
    %cst_68 = arith.constant dense<0.000000e+00> : vector<16x32xf32>
    %185 = tpu.matmul %184, %151, %cst_68 {dimension_numbers = #tpu.dot_dimension_numbers<[1], [0], [0], [1], [0, 0, 1, 1], [], []>} : vector<16x32xbf16>, vector<32x32xbf16>, vector<16x32xf32> -> vector<16x32xf32>
    %186 = vector.broadcast %153 : vector<1x32xf32> to vector<16x32xf32>
    %187 = arith.addf %185, %186 : vector<16x32xf32>
    %cst_69 = arith.constant dense<0.000000e+00> : vector<16x64xf32>
    %188 = tpu.matmul %144, %155, %cst_69 {dimension_numbers = #tpu.dot_dimension_numbers<[1], [0], [0], [1], [0, 0, 1, 1], [], []>} : vector<16x32xbf16>, vector<32x64xbf16>, vector<16x64xf32> -> vector<16x64xf32>
    %189 = vector.broadcast %157 : vector<1x64xf32> to vector<16x64xf32>
    %190 = arith.addf %188, %189 : vector<16x64xf32>
    %191 = vector.extract_strided_slice %190 {offsets = [0, 0], sizes = [16, 32], strides = [1, 1]} : vector<16x64xf32> to vector<16x32xf32>
    %192 = vector.extract_strided_slice %190 {offsets = [0, 32], sizes = [16, 32], strides = [1, 1]} : vector<16x64xf32> to vector<16x32xf32>
    %193 = arith.truncf %187 : vector<16x32xf32> to vector<16x32xbf16>
    %194 = vector.extract_strided_slice %193 {offsets = [0, 0], sizes = [8, 8], strides = [1, 1]} : vector<16x32xbf16> to vector<8x8xbf16>
    %195 = vector.extract_strided_slice %193 {offsets = [0, 8], sizes = [8, 8], strides = [1, 1]} : vector<16x32xbf16> to vector<8x8xbf16>
    %196 = vector.extract_strided_slice %193 {offsets = [0, 16], sizes = [8, 8], strides = [1, 1]} : vector<16x32xbf16> to vector<8x8xbf16>
    %197 = vector.extract_strided_slice %193 {offsets = [0, 24], sizes = [8, 8], strides = [1, 1]} : vector<16x32xbf16> to vector<8x8xbf16>
    %198 = vector.extract_strided_slice %193 {offsets = [8, 0], sizes = [8, 8], strides = [1, 1]} : vector<16x32xbf16> to vector<8x8xbf16>
    %199 = vector.extract_strided_slice %193 {offsets = [8, 8], sizes = [8, 8], strides = [1, 1]} : vector<16x32xbf16> to vector<8x8xbf16>
    %200 = vector.extract_strided_slice %193 {offsets = [8, 16], sizes = [8, 8], strides = [1, 1]} : vector<16x32xbf16> to vector<8x8xbf16>
    %201 = vector.extract_strided_slice %193 {offsets = [8, 24], sizes = [8, 8], strides = [1, 1]} : vector<16x32xbf16> to vector<8x8xbf16>
    %202 = vector.shape_cast %194 : vector<8x8xbf16> to vector<1x8x8xbf16>
    %203 = vector.shape_cast %195 : vector<8x8xbf16> to vector<1x8x8xbf16>
    %204 = vector.shape_cast %196 : vector<8x8xbf16> to vector<1x8x8xbf16>
    %205 = vector.shape_cast %197 : vector<8x8xbf16> to vector<1x8x8xbf16>
    %206 = vector.shape_cast %198 : vector<8x8xbf16> to vector<1x8x8xbf16>
    %207 = vector.shape_cast %199 : vector<8x8xbf16> to vector<1x8x8xbf16>
    %208 = vector.shape_cast %200 : vector<8x8xbf16> to vector<1x8x8xbf16>
    %209 = vector.shape_cast %201 : vector<8x8xbf16> to vector<1x8x8xbf16>
    %210 = tpu.concatenate %202, %203, %204, %205, %206, %207, %208, %209 in 0 : vector<1x8x8xbf16>, vector<1x8x8xbf16>, vector<1x8x8xbf16>, vector<1x8x8xbf16>, vector<1x8x8xbf16>, vector<1x8x8xbf16>, vector<1x8x8xbf16>, vector<1x8x8xbf16> -> vector<8x8x8xbf16>
    %211 = arith.truncf %191 : vector<16x32xf32> to vector<16x32xbf16>
    %212 = vector.extract_strided_slice %211 {offsets = [0, 0], sizes = [8, 8], strides = [1, 1]} : vector<16x32xbf16> to vector<8x8xbf16>
    %213 = vector.extract_strided_slice %211 {offsets = [0, 8], sizes = [8, 8], strides = [1, 1]} : vector<16x32xbf16> to vector<8x8xbf16>
    %214 = vector.extract_strided_slice %211 {offsets = [0, 16], sizes = [8, 8], strides = [1, 1]} : vector<16x32xbf16> to vector<8x8xbf16>
    %215 = vector.extract_strided_slice %211 {offsets = [0, 24], sizes = [8, 8], strides = [1, 1]} : vector<16x32xbf16> to vector<8x8xbf16>
    %216 = vector.extract_strided_slice %211 {offsets = [8, 0], sizes = [8, 8], strides = [1, 1]} : vector<16x32xbf16> to vector<8x8xbf16>
    %217 = vector.extract_strided_slice %211 {offsets = [8, 8], sizes = [8, 8], strides = [1, 1]} : vector<16x32xbf16> to vector<8x8xbf16>
    %218 = vector.extract_strided_slice %211 {offsets = [8, 16], sizes = [8, 8], strides = [1, 1]} : vector<16x32xbf16> to vector<8x8xbf16>
    %219 = vector.extract_strided_slice %211 {offsets = [8, 24], sizes = [8, 8], strides = [1, 1]} : vector<16x32xbf16> to vector<8x8xbf16>
    %220 = vector.shape_cast %212 : vector<8x8xbf16> to vector<1x8x8xbf16>
    %221 = vector.shape_cast %213 : vector<8x8xbf16> to vector<1x8x8xbf16>
    %222 = vector.shape_cast %214 : vector<8x8xbf16> to vector<1x8x8xbf16>
    %223 = vector.shape_cast %215 : vector<8x8xbf16> to vector<1x8x8xbf16>
    %224 = vector.shape_cast %216 : vector<8x8xbf16> to vector<1x8x8xbf16>
    %225 = vector.shape_cast %217 : vector<8x8xbf16> to vector<1x8x8xbf16>
    %226 = vector.shape_cast %218 : vector<8x8xbf16> to vector<1x8x8xbf16>
    %227 = vector.shape_cast %219 : vector<8x8xbf16> to vector<1x8x8xbf16>
    %228 = tpu.concatenate %220, %221, %222, %223, %224, %225, %226, %227 in 0 : vector<1x8x8xbf16>, vector<1x8x8xbf16>, vector<1x8x8xbf16>, vector<1x8x8xbf16>, vector<1x8x8xbf16>, vector<1x8x8xbf16>, vector<1x8x8xbf16>, vector<1x8x8xbf16> -> vector<8x8x8xbf16>
    %229 = arith.truncf %192 : vector<16x32xf32> to vector<16x32xbf16>
    %230 = vector.extract_strided_slice %229 {offsets = [0, 0], sizes = [8, 8], strides = [1, 1]} : vector<16x32xbf16> to vector<8x8xbf16>
    %231 = vector.extract_strided_slice %229 {offsets = [0, 8], sizes = [8, 8], strides = [1, 1]} : vector<16x32xbf16> to vector<8x8xbf16>
    %232 = vector.extract_strided_slice %229 {offsets = [0, 16], sizes = [8, 8], strides = [1, 1]} : vector<16x32xbf16> to vector<8x8xbf16>
    %233 = vector.extract_strided_slice %229 {offsets = [0, 24], sizes = [8, 8], strides = [1, 1]} : vector<16x32xbf16> to vector<8x8xbf16>
    %234 = vector.extract_strided_slice %229 {offsets = [8, 0], sizes = [8, 8], strides = [1, 1]} : vector<16x32xbf16> to vector<8x8xbf16>
    %235 = vector.extract_strided_slice %229 {offsets = [8, 8], sizes = [8, 8], strides = [1, 1]} : vector<16x32xbf16> to vector<8x8xbf16>
    %236 = vector.extract_strided_slice %229 {offsets = [8, 16], sizes = [8, 8], strides = [1, 1]} : vector<16x32xbf16> to vector<8x8xbf16>
    %237 = vector.extract_strided_slice %229 {offsets = [8, 24], sizes = [8, 8], strides = [1, 1]} : vector<16x32xbf16> to vector<8x8xbf16>
    %238 = vector.shape_cast %230 : vector<8x8xbf16> to vector<1x8x8xbf16>
    %239 = vector.shape_cast %231 : vector<8x8xbf16> to vector<1x8x8xbf16>
    %240 = vector.shape_cast %232 : vector<8x8xbf16> to vector<1x8x8xbf16>
    %241 = vector.shape_cast %233 : vector<8x8xbf16> to vector<1x8x8xbf16>
    %242 = vector.shape_cast %234 : vector<8x8xbf16> to vector<1x8x8xbf16>
    %243 = vector.shape_cast %235 : vector<8x8xbf16> to vector<1x8x8xbf16>
    %244 = vector.shape_cast %236 : vector<8x8xbf16> to vector<1x8x8xbf16>
    %245 = vector.shape_cast %237 : vector<8x8xbf16> to vector<1x8x8xbf16>
    %246 = tpu.concatenate %238, %239, %240, %241, %242, %243, %244, %245 in 0 : vector<1x8x8xbf16>, vector<1x8x8xbf16>, vector<1x8x8xbf16>, vector<1x8x8xbf16>, vector<1x8x8xbf16>, vector<1x8x8xbf16>, vector<1x8x8xbf16>, vector<1x8x8xbf16> -> vector<8x8x8xbf16>
    "tpu.trace_start"() <{level = 10 : i32, message = "bqd,bkd->bqk"}> : () -> ()
    %cst_70 = arith.constant dense<0.000000e+00> : vector<8x8x8xf32>
    %247 = tpu.matmul %210, %228, %cst_70 {dimension_numbers = #tpu.dot_dimension_numbers<[2], [2], [1], [1], [0, 0, 0, 1, 1, 1], [0], [0]>} : vector<8x8x8xbf16>, vector<8x8x8xbf16>, vector<8x8x8xf32> -> vector<8x8x8xf32>
    "tpu.trace_stop"() : () -> ()
    %248 = vector.shape_cast %247 : vector<8x8x8xf32> to vector<2x4x8x8xf32>
    %249 = vector.shape_cast %145 : vector<2x8x8xbf16> to vector<2x1x8x8xbf16>
    %250 = arith.extf %249 : vector<2x1x8x8xbf16> to vector<2x1x8x8xf32>
    %251 = vector.broadcast %250 : vector<2x1x8x8xf32> to vector<2x4x8x8xf32>
    %252 = arith.addf %248, %251 : vector<2x4x8x8xf32>
    %cst_71 = arith.constant dense<0xFF800000> : vector<2x4x8xf32>
    %253 = vector.multi_reduction <maximumf>, %252, %cst_71 [3] : vector<2x4x8x8xf32> to vector<2x4x8xf32>
    %254 = vector.shape_cast %253 : vector<2x4x8xf32> to vector<2x4x8x1xf32>
    %255 = vector.broadcast %254 : vector<2x4x8x1xf32> to vector<2x4x8x8xf32>
    %256 = arith.subf %252, %255 : vector<2x4x8x8xf32>
    %257 = math.exp %256 : vector<2x4x8x8xf32>
    %cst_72 = arith.constant dense<0.000000e+00> : vector<2x4x8xf32>
    %258 = vector.multi_reduction <add>, %257, %cst_72 [3] : vector<2x4x8x8xf32> to vector<2x4x8xf32>
    %259 = vector.shape_cast %258 : vector<2x4x8xf32> to vector<2x4x8x1xf32>
    %260 = tpu.reciprocal %259 {approx = true} : vector<2x4x8x1xf32> -> vector<2x4x8x1xf32>
    %261 = vector.broadcast %260 : vector<2x4x8x1xf32> to vector<2x4x8x8xf32>
    %262 = arith.mulf %257, %261 : vector<2x4x8x8xf32>
    %263 = vector.shape_cast %262 : vector<2x4x8x8xf32> to vector<8x8x8xf32>
    %264 = arith.truncf %263 : vector<8x8x8xf32> to vector<8x8x8xbf16>
    "tpu.trace_start"() <{level = 10 : i32, message = "bqk,bkd->bqd"}> : () -> ()
    %cst_73 = arith.constant dense<0.000000e+00> : vector<8x8x8xf32>
    %265 = tpu.matmul %264, %246, %cst_73 {dimension_numbers = #tpu.dot_dimension_numbers<[2], [1], [1], [2], [0, 0, 0, 1, 1, 2], [0], [0]>} : vector<8x8x8xbf16>, vector<8x8x8xbf16>, vector<8x8x8xf32> -> vector<8x8x8xf32>
    "tpu.trace_stop"() : () -> ()
    %266 = vector.extract_strided_slice %265 {offsets = [0, 0, 0], sizes = [1, 8, 8], strides = [1, 1, 1]} : vector<8x8x8xf32> to vector<1x8x8xf32>
    %267 = vector.shape_cast %266 : vector<1x8x8xf32> to vector<8x8xf32>
    %268 = vector.extract_strided_slice %265 {offsets = [1, 0, 0], sizes = [1, 8, 8], strides = [1, 1, 1]} : vector<8x8x8xf32> to vector<1x8x8xf32>
    %269 = vector.shape_cast %268 : vector<1x8x8xf32> to vector<8x8xf32>
    %270 = vector.extract_strided_slice %265 {offsets = [2, 0, 0], sizes = [1, 8, 8], strides = [1, 1, 1]} : vector<8x8x8xf32> to vector<1x8x8xf32>
    %271 = vector.shape_cast %270 : vector<1x8x8xf32> to vector<8x8xf32>
    %272 = vector.extract_strided_slice %265 {offsets = [3, 0, 0], sizes = [1, 8, 8], strides = [1, 1, 1]} : vector<8x8x8xf32> to vector<1x8x8xf32>
    %273 = vector.shape_cast %272 : vector<1x8x8xf32> to vector<8x8xf32>
    %274 = tpu.concatenate %267, %269, %271, %273 in 1 : vector<8x8xf32>, vector<8x8xf32>, vector<8x8xf32>, vector<8x8xf32> -> vector<8x32xf32>
    %275 = vector.extract_strided_slice %265 {offsets = [4, 0, 0], sizes = [1, 8, 8], strides = [1, 1, 1]} : vector<8x8x8xf32> to vector<1x8x8xf32>
    %276 = vector.shape_cast %275 : vector<1x8x8xf32> to vector<8x8xf32>
    %277 = vector.extract_strided_slice %265 {offsets = [5, 0, 0], sizes = [1, 8, 8], strides = [1, 1, 1]} : vector<8x8x8xf32> to vector<1x8x8xf32>
    %278 = vector.shape_cast %277 : vector<1x8x8xf32> to vector<8x8xf32>
    %279 = vector.extract_strided_slice %265 {offsets = [6, 0, 0], sizes = [1, 8, 8], strides = [1, 1, 1]} : vector<8x8x8xf32> to vector<1x8x8xf32>
    %280 = vector.shape_cast %279 : vector<1x8x8xf32> to vector<8x8xf32>
    %281 = vector.extract_strided_slice %265 {offsets = [7, 0, 0], sizes = [1, 8, 8], strides = [1, 1, 1]} : vector<8x8x8xf32> to vector<1x8x8xf32>
    %282 = vector.shape_cast %281 : vector<1x8x8xf32> to vector<8x8xf32>
    %283 = tpu.concatenate %276, %278, %280, %282 in 1 : vector<8x8xf32>, vector<8x8xf32>, vector<8x8xf32>, vector<8x8xf32> -> vector<8x32xf32>
    %284 = tpu.concatenate %274, %283 in 0 : vector<8x32xf32>, vector<8x32xf32> -> vector<16x32xf32>
    %285 = arith.truncf %284 : vector<16x32xf32> to vector<16x32xbf16>
    %cst_74 = arith.constant dense<0.000000e+00> : vector<16x32xf32>
    %286 = tpu.matmul %285, %159, %cst_74 {dimension_numbers = #tpu.dot_dimension_numbers<[1], [0], [0], [1], [0, 0, 1, 1], [], []>} : vector<16x32xbf16>, vector<32x32xbf16>, vector<16x32xf32> -> vector<16x32xf32>
    %287 = arith.addf %142, %286 : vector<16x32xf32>
    %288 = vector.broadcast %161 : vector<1x32xf32> to vector<16x32xf32>
    %289 = arith.addf %287, %288 : vector<16x32xf32>
    %c0_75 = arith.constant 0 : index
    %c0_76 = arith.constant 0 : index
    %c0_77 = arith.constant 0 : index
    %290 = vector.load %arg4[%c0_75, %c0_76, %c0_77] : memref<2x16x32xbf16, #tpu.memory_space<vmem>>, vector<2x16x32xbf16>
    %291 = vector.shape_cast %290 : vector<2x16x32xbf16> to vector<32x32xbf16>
    %c0_78 = arith.constant 0 : index
    %c0_79 = arith.constant 0 : index
    %c0_80 = arith.constant 0 : index
    %292 = vector.load %arg7[%c0_78, %c0_79, %c0_80] : memref<2x8x16xbf16, #tpu.memory_space<vmem>>, vector<2x8x16xbf16>
    %c0_81 = arith.constant 0 : index
    %c0_82 = arith.constant 0 : index
    %c0_83 = arith.constant 0 : index
    %293 = vector.load %arg22[%c0_81, %c0_82, %c0_83] : memref<1x1x32xf32, #tpu.memory_space<vmem>>, vector<1x1x32xf32>
    %294 = vector.shape_cast %293 : vector<1x1x32xf32> to vector<1x32xf32>
    %c0_84 = arith.constant 0 : index
    %c0_85 = arith.constant 0 : index
    %c0_86 = arith.constant 0 : index
    %295 = vector.load %arg23[%c0_84, %c0_85, %c0_86] : memref<1x1x32xf32, #tpu.memory_space<vmem>>, vector<1x1x32xf32>
    %296 = vector.shape_cast %295 : vector<1x1x32xf32> to vector<1x32xf32>
    %c0_87 = arith.constant 0 : index
    %c0_88 = arith.constant 0 : index
    %c0_89 = arith.constant 0 : index
    %297 = vector.load %arg24[%c0_87, %c0_88, %c0_89] : memref<1x32x32xbf16, #tpu.memory_space<vmem>>, vector<1x32x32xbf16>
    %298 = vector.shape_cast %297 : vector<1x32x32xbf16> to vector<32x32xbf16>
    %c0_90 = arith.constant 0 : index
    %c0_91 = arith.constant 0 : index
    %c0_92 = arith.constant 0 : index
    %299 = vector.load %arg25[%c0_90, %c0_91, %c0_92] : memref<1x1x32xf32, #tpu.memory_space<vmem>>, vector<1x1x32xf32>
    %300 = vector.shape_cast %299 : vector<1x1x32xf32> to vector<1x32xf32>
    %c0_93 = arith.constant 0 : index
    %c0_94 = arith.constant 0 : index
    %c0_95 = arith.constant 0 : index
    %301 = vector.load %arg26[%c0_93, %c0_94, %c0_95] : memref<1x32x64xbf16, #tpu.memory_space<vmem>>, vector<1x32x64xbf16>
    %302 = vector.shape_cast %301 : vector<1x32x64xbf16> to vector<32x64xbf16>
    %c0_96 = arith.constant 0 : index
    %c0_97 = arith.constant 0 : index
    %c0_98 = arith.constant 0 : index
    %303 = vector.load %arg27[%c0_96, %c0_97, %c0_98] : memref<1x1x64xf32, #tpu.memory_space<vmem>>, vector<1x1x64xf32>
    %304 = vector.shape_cast %303 : vector<1x1x64xf32> to vector<1x64xf32>
    %c0_99 = arith.constant 0 : index
    %c0_100 = arith.constant 0 : index
    %c0_101 = arith.constant 0 : index
    %305 = vector.load %arg28[%c0_99, %c0_100, %c0_101] : memref<1x32x32xbf16, #tpu.memory_space<vmem>>, vector<1x32x32xbf16>
    %306 = vector.shape_cast %305 : vector<1x32x32xbf16> to vector<32x32xbf16>
    %c0_102 = arith.constant 0 : index
    %c0_103 = arith.constant 0 : index
    %c0_104 = arith.constant 0 : index
    %307 = vector.load %arg29[%c0_102, %c0_103, %c0_104] : memref<1x1x32xf32, #tpu.memory_space<vmem>>, vector<1x1x32xf32>
    %308 = vector.shape_cast %307 : vector<1x1x32xf32> to vector<1x32xf32>
    %cst_105 = arith.constant dense<0.000000e+00> : vector<16xf32>
    %309 = vector.multi_reduction <add>, %289, %cst_105 [1] : vector<16x32xf32> to vector<16xf32>
    %310 = vector.shape_cast %309 : vector<16xf32> to vector<16x1xf32>
    %cst_106 = arith.constant 3.200000e+01 : f32
    %311 = vector.broadcast %cst_106 : f32 to vector<16x1xf32>
    %312 = arith.divf %310, %311 : vector<16x1xf32>
    %313 = arith.mulf %289, %289 : vector<16x32xf32>
    %cst_107 = arith.constant dense<0.000000e+00> : vector<16xf32>
    %314 = vector.multi_reduction <add>, %313, %cst_107 [1] : vector<16x32xf32> to vector<16xf32>
    %315 = vector.shape_cast %314 : vector<16xf32> to vector<16x1xf32>
    %cst_108 = arith.constant 3.200000e+01 : f32
    %316 = vector.broadcast %cst_108 : f32 to vector<16x1xf32>
    %317 = arith.divf %315, %316 : vector<16x1xf32>
    %318 = arith.mulf %312, %312 : vector<16x1xf32>
    %319 = arith.subf %317, %318 : vector<16x1xf32>
    %320 = vector.broadcast %312 : vector<16x1xf32> to vector<16x32xf32>
    %321 = arith.subf %289, %320 : vector<16x32xf32>
    %cst_109 = arith.constant 9.99999974E-6 : f32
    %322 = vector.broadcast %cst_109 : f32 to vector<16x1xf32>
    %323 = arith.addf %319, %322 : vector<16x1xf32>
    %324 = math.rsqrt %323 : vector<16x1xf32>
    %325 = vector.broadcast %324 : vector<16x1xf32> to vector<16x32xf32>
    %326 = arith.mulf %321, %325 : vector<16x32xf32>
    %327 = vector.broadcast %294 : vector<1x32xf32> to vector<16x32xf32>
    %328 = arith.mulf %326, %327 : vector<16x32xf32>
    %329 = vector.broadcast %296 : vector<1x32xf32> to vector<16x32xf32>
    %330 = arith.addf %328, %329 : vector<16x32xf32>
    %331 = arith.truncf %330 : vector<16x32xf32> to vector<16x32xbf16>
    %cst_110 = arith.constant dense<0.000000e+00> : vector<16x32xf32>
    %332 = tpu.matmul %331, %298, %cst_110 {dimension_numbers = #tpu.dot_dimension_numbers<[1], [0], [0], [1], [0, 0, 1, 1], [], []>} : vector<16x32xbf16>, vector<32x32xbf16>, vector<16x32xf32> -> vector<16x32xf32>
    %333 = vector.broadcast %300 : vector<1x32xf32> to vector<16x32xf32>
    %334 = arith.addf %332, %333 : vector<16x32xf32>
    %cst_111 = arith.constant dense<0.000000e+00> : vector<32x64xf32>
    %335 = tpu.matmul %291, %302, %cst_111 {dimension_numbers = #tpu.dot_dimension_numbers<[1], [0], [0], [1], [0, 0, 1, 1], [], []>} : vector<32x32xbf16>, vector<32x64xbf16>, vector<32x64xf32> -> vector<32x64xf32>
    %336 = vector.broadcast %304 : vector<1x64xf32> to vector<32x64xf32>
    %337 = arith.addf %335, %336 : vector<32x64xf32>
    %338 = vector.extract_strided_slice %337 {offsets = [0, 0], sizes = [32, 32], strides = [1, 1]} : vector<32x64xf32> to vector<32x32xf32>
    %339 = vector.extract_strided_slice %337 {offsets = [0, 32], sizes = [32, 32], strides = [1, 1]} : vector<32x64xf32> to vector<32x32xf32>
    %340 = arith.truncf %334 : vector<16x32xf32> to vector<16x32xbf16>
    %341 = vector.extract_strided_slice %340 {offsets = [0, 0], sizes = [8, 8], strides = [1, 1]} : vector<16x32xbf16> to vector<8x8xbf16>
    %342 = vector.extract_strided_slice %340 {offsets = [0, 8], sizes = [8, 8], strides = [1, 1]} : vector<16x32xbf16> to vector<8x8xbf16>
    %343 = vector.extract_strided_slice %340 {offsets = [0, 16], sizes = [8, 8], strides = [1, 1]} : vector<16x32xbf16> to vector<8x8xbf16>
    %344 = vector.extract_strided_slice %340 {offsets = [0, 24], sizes = [8, 8], strides = [1, 1]} : vector<16x32xbf16> to vector<8x8xbf16>
    %345 = vector.extract_strided_slice %340 {offsets = [8, 0], sizes = [8, 8], strides = [1, 1]} : vector<16x32xbf16> to vector<8x8xbf16>
    %346 = vector.extract_strided_slice %340 {offsets = [8, 8], sizes = [8, 8], strides = [1, 1]} : vector<16x32xbf16> to vector<8x8xbf16>
    %347 = vector.extract_strided_slice %340 {offsets = [8, 16], sizes = [8, 8], strides = [1, 1]} : vector<16x32xbf16> to vector<8x8xbf16>
    %348 = vector.extract_strided_slice %340 {offsets = [8, 24], sizes = [8, 8], strides = [1, 1]} : vector<16x32xbf16> to vector<8x8xbf16>
    %349 = vector.shape_cast %341 : vector<8x8xbf16> to vector<1x8x8xbf16>
    %350 = vector.shape_cast %342 : vector<8x8xbf16> to vector<1x8x8xbf16>
    %351 = vector.shape_cast %343 : vector<8x8xbf16> to vector<1x8x8xbf16>
    %352 = vector.shape_cast %344 : vector<8x8xbf16> to vector<1x8x8xbf16>
    %353 = vector.shape_cast %345 : vector<8x8xbf16> to vector<1x8x8xbf16>
    %354 = vector.shape_cast %346 : vector<8x8xbf16> to vector<1x8x8xbf16>
    %355 = vector.shape_cast %347 : vector<8x8xbf16> to vector<1x8x8xbf16>
    %356 = vector.shape_cast %348 : vector<8x8xbf16> to vector<1x8x8xbf16>
    %357 = tpu.concatenate %349, %350, %351, %352, %353, %354, %355, %356 in 0 : vector<1x8x8xbf16>, vector<1x8x8xbf16>, vector<1x8x8xbf16>, vector<1x8x8xbf16>, vector<1x8x8xbf16>, vector<1x8x8xbf16>, vector<1x8x8xbf16>, vector<1x8x8xbf16> -> vector<8x8x8xbf16>
    %358 = arith.truncf %338 : vector<32x32xf32> to vector<32x32xbf16>
    %359 = vector.extract_strided_slice %358 {offsets = [0, 0], sizes = [16, 8], strides = [1, 1]} : vector<32x32xbf16> to vector<16x8xbf16>
    %360 = vector.extract_strided_slice %358 {offsets = [0, 8], sizes = [16, 8], strides = [1, 1]} : vector<32x32xbf16> to vector<16x8xbf16>
    %361 = vector.extract_strided_slice %358 {offsets = [0, 16], sizes = [16, 8], strides = [1, 1]} : vector<32x32xbf16> to vector<16x8xbf16>
    %362 = vector.extract_strided_slice %358 {offsets = [0, 24], sizes = [16, 8], strides = [1, 1]} : vector<32x32xbf16> to vector<16x8xbf16>
    %363 = vector.extract_strided_slice %358 {offsets = [16, 0], sizes = [16, 8], strides = [1, 1]} : vector<32x32xbf16> to vector<16x8xbf16>
    %364 = vector.extract_strided_slice %358 {offsets = [16, 8], sizes = [16, 8], strides = [1, 1]} : vector<32x32xbf16> to vector<16x8xbf16>
    %365 = vector.extract_strided_slice %358 {offsets = [16, 16], sizes = [16, 8], strides = [1, 1]} : vector<32x32xbf16> to vector<16x8xbf16>
    %366 = vector.extract_strided_slice %358 {offsets = [16, 24], sizes = [16, 8], strides = [1, 1]} : vector<32x32xbf16> to vector<16x8xbf16>
    %367 = vector.shape_cast %359 : vector<16x8xbf16> to vector<1x16x8xbf16>
    %368 = vector.shape_cast %360 : vector<16x8xbf16> to vector<1x16x8xbf16>
    %369 = vector.shape_cast %361 : vector<16x8xbf16> to vector<1x16x8xbf16>
    %370 = vector.shape_cast %362 : vector<16x8xbf16> to vector<1x16x8xbf16>
    %371 = vector.shape_cast %363 : vector<16x8xbf16> to vector<1x16x8xbf16>
    %372 = vector.shape_cast %364 : vector<16x8xbf16> to vector<1x16x8xbf16>
    %373 = vector.shape_cast %365 : vector<16x8xbf16> to vector<1x16x8xbf16>
    %374 = vector.shape_cast %366 : vector<16x8xbf16> to vector<1x16x8xbf16>
    %375 = tpu.concatenate %367, %368, %369, %370, %371, %372, %373, %374 in 0 : vector<1x16x8xbf16>, vector<1x16x8xbf16>, vector<1x16x8xbf16>, vector<1x16x8xbf16>, vector<1x16x8xbf16>, vector<1x16x8xbf16>, vector<1x16x8xbf16>, vector<1x16x8xbf16> -> vector<8x16x8xbf16>
    %376 = arith.truncf %339 : vector<32x32xf32> to vector<32x32xbf16>
    %377 = vector.extract_strided_slice %376 {offsets = [0, 0], sizes = [16, 8], strides = [1, 1]} : vector<32x32xbf16> to vector<16x8xbf16>
    %378 = vector.extract_strided_slice %376 {offsets = [0, 8], sizes = [16, 8], strides = [1, 1]} : vector<32x32xbf16> to vector<16x8xbf16>
    %379 = vector.extract_strided_slice %376 {offsets = [0, 16], sizes = [16, 8], strides = [1, 1]} : vector<32x32xbf16> to vector<16x8xbf16>
    %380 = vector.extract_strided_slice %376 {offsets = [0, 24], sizes = [16, 8], strides = [1, 1]} : vector<32x32xbf16> to vector<16x8xbf16>
    %381 = vector.extract_strided_slice %376 {offsets = [16, 0], sizes = [16, 8], strides = [1, 1]} : vector<32x32xbf16> to vector<16x8xbf16>
    %382 = vector.extract_strided_slice %376 {offsets = [16, 8], sizes = [16, 8], strides = [1, 1]} : vector<32x32xbf16> to vector<16x8xbf16>
    %383 = vector.extract_strided_slice %376 {offsets = [16, 16], sizes = [16, 8], strides = [1, 1]} : vector<32x32xbf16> to vector<16x8xbf16>
    %384 = vector.extract_strided_slice %376 {offsets = [16, 24], sizes = [16, 8], strides = [1, 1]} : vector<32x32xbf16> to vector<16x8xbf16>
    %385 = vector.shape_cast %377 : vector<16x8xbf16> to vector<1x16x8xbf16>
    %386 = vector.shape_cast %378 : vector<16x8xbf16> to vector<1x16x8xbf16>
    %387 = vector.shape_cast %379 : vector<16x8xbf16> to vector<1x16x8xbf16>
    %388 = vector.shape_cast %380 : vector<16x8xbf16> to vector<1x16x8xbf16>
    %389 = vector.shape_cast %381 : vector<16x8xbf16> to vector<1x16x8xbf16>
    %390 = vector.shape_cast %382 : vector<16x8xbf16> to vector<1x16x8xbf16>
    %391 = vector.shape_cast %383 : vector<16x8xbf16> to vector<1x16x8xbf16>
    %392 = vector.shape_cast %384 : vector<16x8xbf16> to vector<1x16x8xbf16>
    %393 = tpu.concatenate %385, %386, %387, %388, %389, %390, %391, %392 in 0 : vector<1x16x8xbf16>, vector<1x16x8xbf16>, vector<1x16x8xbf16>, vector<1x16x8xbf16>, vector<1x16x8xbf16>, vector<1x16x8xbf16>, vector<1x16x8xbf16>, vector<1x16x8xbf16> -> vector<8x16x8xbf16>
    "tpu.trace_start"() <{level = 10 : i32, message = "bqd,bkd->bqk"}> : () -> ()
    %cst_112 = arith.constant dense<0.000000e+00> : vector<8x8x16xf32>
    %394 = tpu.matmul %357, %375, %cst_112 {dimension_numbers = #tpu.dot_dimension_numbers<[2], [2], [1], [1], [0, 0, 0, 1, 1, 1], [0], [0]>} : vector<8x8x8xbf16>, vector<8x16x8xbf16>, vector<8x8x16xf32> -> vector<8x8x16xf32>
    "tpu.trace_stop"() : () -> ()
    %395 = vector.shape_cast %394 : vector<8x8x16xf32> to vector<2x4x8x16xf32>
    %396 = vector.shape_cast %292 : vector<2x8x16xbf16> to vector<2x1x8x16xbf16>
    %397 = arith.extf %396 : vector<2x1x8x16xbf16> to vector<2x1x8x16xf32>
    %398 = vector.broadcast %397 : vector<2x1x8x16xf32> to vector<2x4x8x16xf32>
    %399 = arith.addf %395, %398 : vector<2x4x8x16xf32>
    %cst_113 = arith.constant dense<0xFF800000> : vector<2x4x8xf32>
    %400 = vector.multi_reduction <maximumf>, %399, %cst_113 [3] : vector<2x4x8x16xf32> to vector<2x4x8xf32>
    %401 = vector.shape_cast %400 : vector<2x4x8xf32> to vector<2x4x8x1xf32>
    %402 = vector.broadcast %401 : vector<2x4x8x1xf32> to vector<2x4x8x16xf32>
    %403 = arith.subf %399, %402 : vector<2x4x8x16xf32>
    %404 = math.exp %403 : vector<2x4x8x16xf32>
    %cst_114 = arith.constant dense<0.000000e+00> : vector<2x4x8xf32>
    %405 = vector.multi_reduction <add>, %404, %cst_114 [3] : vector<2x4x8x16xf32> to vector<2x4x8xf32>
    %406 = vector.shape_cast %405 : vector<2x4x8xf32> to vector<2x4x8x1xf32>
    %407 = tpu.reciprocal %406 {approx = true} : vector<2x4x8x1xf32> -> vector<2x4x8x1xf32>
    %408 = vector.broadcast %407 : vector<2x4x8x1xf32> to vector<2x4x8x16xf32>
    %409 = arith.mulf %404, %408 : vector<2x4x8x16xf32>
    %410 = vector.shape_cast %409 : vector<2x4x8x16xf32> to vector<8x8x16xf32>
    %411 = arith.truncf %410 : vector<8x8x16xf32> to vector<8x8x16xbf16>
    "tpu.trace_start"() <{level = 10 : i32, message = "bqk,bkd->bqd"}> : () -> ()
    %cst_115 = arith.constant dense<0.000000e+00> : vector<8x8x8xf32>
    %412 = tpu.matmul %411, %393, %cst_115 {dimension_numbers = #tpu.dot_dimension_numbers<[2], [1], [1], [2], [0, 0, 0, 1, 1, 2], [0], [0]>} : vector<8x8x16xbf16>, vector<8x16x8xbf16>, vector<8x8x8xf32> -> vector<8x8x8xf32>
    "tpu.trace_stop"() : () -> ()
    %413 = vector.extract_strided_slice %412 {offsets = [0, 0, 0], sizes = [1, 8, 8], strides = [1, 1, 1]} : vector<8x8x8xf32> to vector<1x8x8xf32>
    %414 = vector.shape_cast %413 : vector<1x8x8xf32> to vector<8x8xf32>
    %415 = vector.extract_strided_slice %412 {offsets = [1, 0, 0], sizes = [1, 8, 8], strides = [1, 1, 1]} : vector<8x8x8xf32> to vector<1x8x8xf32>
    %416 = vector.shape_cast %415 : vector<1x8x8xf32> to vector<8x8xf32>
    %417 = vector.extract_strided_slice %412 {offsets = [2, 0, 0], sizes = [1, 8, 8], strides = [1, 1, 1]} : vector<8x8x8xf32> to vector<1x8x8xf32>
    %418 = vector.shape_cast %417 : vector<1x8x8xf32> to vector<8x8xf32>
    %419 = vector.extract_strided_slice %412 {offsets = [3, 0, 0], sizes = [1, 8, 8], strides = [1, 1, 1]} : vector<8x8x8xf32> to vector<1x8x8xf32>
    %420 = vector.shape_cast %419 : vector<1x8x8xf32> to vector<8x8xf32>
    %421 = tpu.concatenate %414, %416, %418, %420 in 1 : vector<8x8xf32>, vector<8x8xf32>, vector<8x8xf32>, vector<8x8xf32> -> vector<8x32xf32>
    %422 = vector.extract_strided_slice %412 {offsets = [4, 0, 0], sizes = [1, 8, 8], strides = [1, 1, 1]} : vector<8x8x8xf32> to vector<1x8x8xf32>
    %423 = vector.shape_cast %422 : vector<1x8x8xf32> to vector<8x8xf32>
    %424 = vector.extract_strided_slice %412 {offsets = [5, 0, 0], sizes = [1, 8, 8], strides = [1, 1, 1]} : vector<8x8x8xf32> to vector<1x8x8xf32>
    %425 = vector.shape_cast %424 : vector<1x8x8xf32> to vector<8x8xf32>
    %426 = vector.extract_strided_slice %412 {offsets = [6, 0, 0], sizes = [1, 8, 8], strides = [1, 1, 1]} : vector<8x8x8xf32> to vector<1x8x8xf32>
    %427 = vector.shape_cast %426 : vector<1x8x8xf32> to vector<8x8xf32>
    %428 = vector.extract_strided_slice %412 {offsets = [7, 0, 0], sizes = [1, 8, 8], strides = [1, 1, 1]} : vector<8x8x8xf32> to vector<1x8x8xf32>
    %429 = vector.shape_cast %428 : vector<1x8x8xf32> to vector<8x8xf32>
    %430 = tpu.concatenate %423, %425, %427, %429 in 1 : vector<8x8xf32>, vector<8x8xf32>, vector<8x8xf32>, vector<8x8xf32> -> vector<8x32xf32>
    %431 = tpu.concatenate %421, %430 in 0 : vector<8x32xf32>, vector<8x32xf32> -> vector<16x32xf32>
    %432 = arith.truncf %431 : vector<16x32xf32> to vector<16x32xbf16>
    %cst_116 = arith.constant dense<0.000000e+00> : vector<16x32xf32>
    %433 = tpu.matmul %432, %306, %cst_116 {dimension_numbers = #tpu.dot_dimension_numbers<[1], [0], [0], [1], [0, 0, 1, 1], [], []>} : vector<16x32xbf16>, vector<32x32xbf16>, vector<16x32xf32> -> vector<16x32xf32>
    %434 = arith.addf %289, %433 : vector<16x32xf32>
    %435 = vector.broadcast %308 : vector<1x32xf32> to vector<16x32xf32>
    %436 = arith.addf %434, %435 : vector<16x32xf32>
    %c0_117 = arith.constant 0 : index
    %c0_118 = arith.constant 0 : index
    %c0_119 = arith.constant 0 : index
    %437 = vector.load %arg30[%c0_117, %c0_118, %c0_119] : memref<1x1x32xf32, #tpu.memory_space<vmem>>, vector<1x1x32xf32>
    %438 = vector.shape_cast %437 : vector<1x1x32xf32> to vector<1x32xf32>
    %c0_120 = arith.constant 0 : index
    %c0_121 = arith.constant 0 : index
    %c0_122 = arith.constant 0 : index
    %439 = vector.load %arg31[%c0_120, %c0_121, %c0_122] : memref<1x1x32xf32, #tpu.memory_space<vmem>>, vector<1x1x32xf32>
    %440 = vector.shape_cast %439 : vector<1x1x32xf32> to vector<1x32xf32>
    %cst_123 = arith.constant dense<0.000000e+00> : vector<16xf32>
    %441 = vector.multi_reduction <add>, %436, %cst_123 [1] : vector<16x32xf32> to vector<16xf32>
    %442 = vector.shape_cast %441 : vector<16xf32> to vector<16x1xf32>
    %cst_124 = arith.constant 3.200000e+01 : f32
    %443 = vector.broadcast %cst_124 : f32 to vector<16x1xf32>
    %444 = arith.divf %442, %443 : vector<16x1xf32>
    %445 = arith.mulf %436, %436 : vector<16x32xf32>
    %cst_125 = arith.constant dense<0.000000e+00> : vector<16xf32>
    %446 = vector.multi_reduction <add>, %445, %cst_125 [1] : vector<16x32xf32> to vector<16xf32>
    %447 = vector.shape_cast %446 : vector<16xf32> to vector<16x1xf32>
    %cst_126 = arith.constant 3.200000e+01 : f32
    %448 = vector.broadcast %cst_126 : f32 to vector<16x1xf32>
    %449 = arith.divf %447, %448 : vector<16x1xf32>
    %450 = arith.mulf %444, %444 : vector<16x1xf32>
    %451 = arith.subf %449, %450 : vector<16x1xf32>
    %452 = vector.broadcast %444 : vector<16x1xf32> to vector<16x32xf32>
    %453 = arith.subf %436, %452 : vector<16x32xf32>
    %cst_127 = arith.constant 9.99999974E-6 : f32
    %454 = vector.broadcast %cst_127 : f32 to vector<16x1xf32>
    %455 = arith.addf %451, %454 : vector<16x1xf32>
    %456 = math.rsqrt %455 : vector<16x1xf32>
    %457 = vector.broadcast %456 : vector<16x1xf32> to vector<16x32xf32>
    %458 = arith.mulf %453, %457 : vector<16x32xf32>
    %459 = vector.broadcast %438 : vector<1x32xf32> to vector<16x32xf32>
    %460 = arith.mulf %458, %459 : vector<16x32xf32>
    %461 = vector.broadcast %440 : vector<1x32xf32> to vector<16x32xf32>
    %462 = arith.addf %460, %461 : vector<16x32xf32>
    %463 = arith.truncf %462 : vector<16x32xf32> to vector<16x32xbf16>
    %c0_128 = arith.constant 0 : index
    %c0_129 = arith.constant 0 : index
    %c0_130 = arith.constant 0 : index
    %464 = vector.load %arg32[%c0_128, %c0_129, %c0_130] : memref<1x32x64xbf16, #tpu.memory_space<vmem>>, vector<1x32x64xbf16>
    %465 = vector.shape_cast %464 : vector<1x32x64xbf16> to vector<32x64xbf16>
    %cst_131 = arith.constant dense<0.000000e+00> : vector<16x64xf32>
    %466 = tpu.matmul %463, %465, %cst_131 {dimension_numbers = #tpu.dot_dimension_numbers<[1], [0], [0], [1], [0, 0, 1, 1], [], []>} : vector<16x32xbf16>, vector<32x64xbf16>, vector<16x64xf32> -> vector<16x64xf32>
    %c0_132 = arith.constant 0 : index
    %c0_133 = arith.constant 0 : index
    %c0_134 = arith.constant 0 : index
    %467 = vector.load %arg33[%c0_132, %c0_133, %c0_134] : memref<1x1x64xf32, #tpu.memory_space<vmem>>, vector<1x1x64xf32>
    %468 = vector.shape_cast %467 : vector<1x1x64xf32> to vector<1x64xf32>
    %469 = vector.broadcast %468 : vector<1x64xf32> to vector<16x64xf32>
    %470 = arith.addf %466, %469 : vector<16x64xf32>
    %cst_135 = arith.constant 0.000000e+00 : f32
    %471 = vector.broadcast %cst_135 : f32 to vector<16x64xf32>
    %472 = arith.maximumf %470, %471 : vector<16x64xf32>
    %473 = arith.truncf %472 : vector<16x64xf32> to vector<16x64xbf16>
    %c0_136 = arith.constant 0 : index
    %c0_137 = arith.constant 0 : index
    %c0_138 = arith.constant 0 : index
    %474 = vector.load %arg34[%c0_136, %c0_137, %c0_138] : memref<1x64x32xbf16, #tpu.memory_space<vmem>>, vector<1x64x32xbf16>
    %475 = vector.shape_cast %474 : vector<1x64x32xbf16> to vector<64x32xbf16>
    %cst_139 = arith.constant dense<0.000000e+00> : vector<16x32xf32>
    %476 = tpu.matmul %473, %475, %cst_139 {dimension_numbers = #tpu.dot_dimension_numbers<[1], [0], [0], [1], [0, 0, 1, 1], [], []>} : vector<16x64xbf16>, vector<64x32xbf16>, vector<16x32xf32> -> vector<16x32xf32>
    %477 = arith.addf %436, %476 : vector<16x32xf32>
    %c0_140 = arith.constant 0 : index
    %c0_141 = arith.constant 0 : index
    %c0_142 = arith.constant 0 : index
    %478 = vector.load %arg35[%c0_140, %c0_141, %c0_142] : memref<1x1x32xf32, #tpu.memory_space<vmem>>, vector<1x1x32xf32>
    %479 = vector.shape_cast %478 : vector<1x1x32xf32> to vector<1x32xf32>
    %480 = vector.broadcast %479 : vector<1x32xf32> to vector<16x32xf32>
    %481 = arith.addf %477, %480 : vector<16x32xf32>
    %c0_143 = arith.constant 0 : index
    %c0_144 = arith.constant 0 : index
    %482 = vector.load %arg37[%c0_143, %c0_144] : memref<16x32xf32, #tpu.memory_space<vmem>>, vector<16x32xf32>
    tpu.vector_store %arg37[%c0_143, %c0_144], %481 {strides = array<i32>} : memref<16x32xf32, #tpu.memory_space<vmem>>, vector<16x32xf32>,
    %c1_i32 = arith.constant 1 : i32
    %483 = arith.cmpi eq, %arg1, %c1_i32 : i32
    %484 = arith.extui %483 : i1 to i32
    %c0_i32_145 = arith.constant 0 : i32
    %485 = arith.cmpi ne, %484, %c0_i32_145 : i32
    scf.if %485 {
      %486 = vector.shape_cast %481 : vector<16x32xf32> to vector<2x8x32xf32>
      %c0_146 = arith.constant 0 : index
      %c0_147 = arith.constant 0 : index
      %c0_148 = arith.constant 0 : index
      %487 = vector.load %arg36[%c0_146, %c0_147, %c0_148] : memref<2x8x32xf32, #tpu.memory_space<vmem>>, vector<2x8x32xf32>
      tpu.vector_store %arg36[%c0_146, %c0_147, %c0_148], %486 {strides = array<i32>} : memref<2x8x32xf32, #tpu.memory_space<vmem>>, vector<2x8x32xf32>,
    } else {
    }
    return
  }
  func.func @transform_0(%arg0: i32, %arg1: i32) -> (i32, i32, i32) {
    %c0_i32 = arith.constant 0 : i32
    %c0_i32_0 = arith.constant 0 : i32
    %c0_i32_1 = arith.constant 0 : i32
    return %arg0, %c0_i32, %c0_i32_0 : i32, i32, i32
  }
  func.func @transform_1(%arg0: i32, %arg1: i32) -> (i32, i32, i32) {
    %c0_i32 = arith.constant 0 : i32
    %c0_i32_0 = arith.constant 0 : i32
    %c0_i32_1 = arith.constant 0 : i32
    return %arg0, %c0_i32, %c0_i32_0 : i32, i32, i32
  }
  func.func @transform_2(%arg0: i32, %arg1: i32) -> (i32, i32, i32) {
    %c0_i32 = arith.constant 0 : i32
    %c0_i32_0 = arith.constant 0 : i32
    %c0_i32_1 = arith.constant 0 : i32
    return %arg0, %c0_i32, %c0_i32_0 : i32, i32, i32
  }
  func.func @transform_3(%arg0: i32, %arg1: i32) -> (i32, i32, i32) {
    %c0_i32 = arith.constant 0 : i32
    %c0_i32_0 = arith.constant 0 : i32
    %c0_i32_1 = arith.constant 0 : i32
    return %arg0, %c0_i32, %c0_i32_0 : i32, i32, i32
  }
  func.func @transform_4(%arg0: i32, %arg1: i32) -> (i32, i32, i32) {
    %c0_i32 = arith.constant 0 : i32
    %c0_i32_0 = arith.constant 0 : i32
    %c0_i32_1 = arith.constant 0 : i32
    return %arg0, %c0_i32, %c0_i32_0 : i32, i32, i32
  }
  func.func @transform_5(%arg0: i32, %arg1: i32) -> (i32, i32, i32) {
    %c0_i32 = arith.constant 0 : i32
    %c0_i32_0 = arith.constant 0 : i32
    %c0_i32_1 = arith.constant 0 : i32
    return %arg0, %c0_i32, %c0_i32_0 : i32, i32, i32
  }
  func.func @transform_6(%arg0: i32, %arg1: i32) -> (i32, i32, i32) {
    %c0_i32 = arith.constant 0 : i32
    %c0_i32_0 = arith.constant 0 : i32
    %c0_i32_1 = arith.constant 0 : i32
    return %arg1, %c0_i32, %c0_i32_0 : i32, i32, i32
  }
  func.func @transform_7(%arg0: i32, %arg1: i32) -> (i32, i32, i32) {
    %c0_i32 = arith.constant 0 : i32
    %c0_i32_0 = arith.constant 0 : i32
    %c0_i32_1 = arith.constant 0 : i32
    return %arg1, %c0_i32, %c0_i32_0 : i32, i32, i32
  }
  func.func @transform_8(%arg0: i32, %arg1: i32) -> (i32, i32, i32) {
    %c0_i32 = arith.constant 0 : i32
    %c0_i32_0 = arith.constant 0 : i32
    %c0_i32_1 = arith.constant 0 : i32
    return %arg1, %c0_i32, %c0_i32_0 : i32, i32, i32
  }
  func.func @transform_9(%arg0: i32, %arg1: i32) -> (i32, i32, i32) {
    %c0_i32 = arith.constant 0 : i32
    %c0_i32_0 = arith.constant 0 : i32
    %c0_i32_1 = arith.constant 0 : i32
    return %arg1, %c0_i32, %c0_i32_0 : i32, i32, i32
  }
  func.func @transform_10(%arg0: i32, %arg1: i32) -> (i32, i32, i32) {
    %c0_i32 = arith.constant 0 : i32
    %c0_i32_0 = arith.constant 0 : i32
    %c0_i32_1 = arith.constant 0 : i32
    return %arg1, %c0_i32, %c0_i32_0 : i32, i32, i32
  }
  func.func @transform_11(%arg0: i32, %arg1: i32) -> (i32, i32, i32) {
    %c0_i32 = arith.constant 0 : i32
    %c0_i32_0 = arith.constant 0 : i32
    %c0_i32_1 = arith.constant 0 : i32
    return %arg1, %c0_i32, %c0_i32_0 : i32, i32, i32
  }
  func.func @transform_12(%arg0: i32, %arg1: i32) -> (i32, i32, i32) {
    %c0_i32 = arith.constant 0 : i32
    %c0_i32_0 = arith.constant 0 : i32
    %c0_i32_1 = arith.constant 0 : i32
    return %arg1, %c0_i32, %c0_i32_0 : i32, i32, i32
  }
  func.func @transform_13(%arg0: i32, %arg1: i32) -> (i32, i32, i32) {
    %c0_i32 = arith.constant 0 : i32
    %c0_i32_0 = arith.constant 0 : i32
    %c0_i32_1 = arith.constant 0 : i32
    return %arg1, %c0_i32, %c0_i32_0 : i32, i32, i32
  }
  func.func @transform_14(%arg0: i32, %arg1: i32) -> (i32, i32, i32) {
    %c0_i32 = arith.constant 0 : i32
    %c0_i32_0 = arith.constant 0 : i32
    %c0_i32_1 = arith.constant 0 : i32
    return %arg1, %c0_i32, %c0_i32_0 : i32, i32, i32
  }
  func.func @transform_15(%arg0: i32, %arg1: i32) -> (i32, i32, i32) {
    %c0_i32 = arith.constant 0 : i32
    %c0_i32_0 = arith.constant 0 : i32
    %c0_i32_1 = arith.constant 0 : i32
    return %arg1, %c0_i32, %c0_i32_0 : i32, i32, i32
  }
  func.func @transform_16(%arg0: i32, %arg1: i32) -> (i32, i32, i32) {
    %c0_i32 = arith.constant 0 : i32
    %c0_i32_0 = arith.constant 0 : i32
    %c0_i32_1 = arith.constant 0 : i32
    return %arg1, %c0_i32, %c0_i32_0 : i32, i32, i32
  }
  func.func @transform_17(%arg0: i32, %arg1: i32) -> (i32, i32, i32) {
    %c0_i32 = arith.constant 0 : i32
    %c0_i32_0 = arith.constant 0 : i32
    %c0_i32_1 = arith.constant 0 : i32
    return %arg1, %c0_i32, %c0_i32_0 : i32, i32, i32
  }
  func.func @transform_18(%arg0: i32, %arg1: i32) -> (i32, i32, i32) {
    %c0_i32 = arith.constant 0 : i32
    %c0_i32_0 = arith.constant 0 : i32
    %c0_i32_1 = arith.constant 0 : i32
    return %arg1, %c0_i32, %c0_i32_0 : i32, i32, i32
  }
  func.func @transform_19(%arg0: i32, %arg1: i32) -> (i32, i32, i32) {
    %c0_i32 = arith.constant 0 : i32
    %c0_i32_0 = arith.constant 0 : i32
    %c0_i32_1 = arith.constant 0 : i32
    return %arg1, %c0_i32, %c0_i32_0 : i32, i32, i32
  }
  func.func @transform_20(%arg0: i32, %arg1: i32) -> (i32, i32, i32) {
    %c0_i32 = arith.constant 0 : i32
    %c0_i32_0 = arith.constant 0 : i32
    %c0_i32_1 = arith.constant 0 : i32
    return %arg1, %c0_i32, %c0_i32_0 : i32, i32, i32
  }
  func.func @transform_21(%arg0: i32, %arg1: i32) -> (i32, i32, i32) {
    %c0_i32 = arith.constant 0 : i32
    %c0_i32_0 = arith.constant 0 : i32
    %c0_i32_1 = arith.constant 0 : i32
    return %arg1, %c0_i32, %c0_i32_0 : i32, i32, i32
  }
  func.func @transform_22(%arg0: i32, %arg1: i32) -> (i32, i32, i32) {
    %c0_i32 = arith.constant 0 : i32
    %c0_i32_0 = arith.constant 0 : i32
    %c0_i32_1 = arith.constant 0 : i32
    return %arg1, %c0_i32, %c0_i32_0 : i32, i32, i32
  }
  func.func @transform_23(%arg0: i32, %arg1: i32) -> (i32, i32, i32) {
    %c0_i32 = arith.constant 0 : i32
    %c0_i32_0 = arith.constant 0 : i32
    %c0_i32_1 = arith.constant 0 : i32
    return %arg1, %c0_i32, %c0_i32_0 : i32, i32, i32
  }
  func.func @transform_24(%arg0: i32, %arg1: i32) -> (i32, i32, i32) {
    %c0_i32 = arith.constant 0 : i32
    %c0_i32_0 = arith.constant 0 : i32
    %c0_i32_1 = arith.constant 0 : i32
    return %arg1, %c0_i32, %c0_i32_0 : i32, i32, i32
  }
  func.func @transform_25(%arg0: i32, %arg1: i32) -> (i32, i32, i32) {
    %c0_i32 = arith.constant 0 : i32
    %c0_i32_0 = arith.constant 0 : i32
    %c0_i32_1 = arith.constant 0 : i32
    return %arg1, %c0_i32, %c0_i32_0 : i32, i32, i32
  }
  func.func @transform_26(%arg0: i32, %arg1: i32) -> (i32, i32, i32) {
    %c0_i32 = arith.constant 0 : i32
    %c0_i32_0 = arith.constant 0 : i32
    %c0_i32_1 = arith.constant 0 : i32
    return %arg1, %c0_i32, %c0_i32_0 : i32, i32, i32
  }
  func.func @transform_27(%arg0: i32, %arg1: i32) -> (i32, i32, i32) {
    %c0_i32 = arith.constant 0 : i32
    %c0_i32_0 = arith.constant 0 : i32
    %c0_i32_1 = arith.constant 0 : i32
    return %arg1, %c0_i32, %c0_i32_0 : i32, i32, i32
  }
  func.func @transform_28(%arg0: i32, %arg1: i32) -> (i32, i32, i32) {
    %c0_i32 = arith.constant 0 : i32
    %c0_i32_0 = arith.constant 0 : i32
    %c0_i32_1 = arith.constant 0 : i32
    return %arg1, %c0_i32, %c0_i32_0 : i32, i32, i32
  }
  func.func @transform_29(%arg0: i32, %arg1: i32) -> (i32, i32, i32) {
    %c0_i32 = arith.constant 0 : i32
    %c0_i32_0 = arith.constant 0 : i32
    %c0_i32_1 = arith.constant 0 : i32
    return %arg1, %c0_i32, %c0_i32_0 : i32, i32, i32
  }
  func.func @transform_30(%arg0: i32, %arg1: i32) -> (i32, i32, i32) {
    %c0_i32 = arith.constant 0 : i32
    %c0_i32_0 = arith.constant 0 : i32
    %c0_i32_1 = arith.constant 0 : i32
    return %arg1, %c0_i32, %c0_i32_0 : i32, i32, i32
  }
  func.func @transform_31(%arg0: i32, %arg1: i32) -> (i32, i32, i32) {
    %c0_i32 = arith.constant 0 : i32
    %c0_i32_0 = arith.constant 0 : i32
    %c0_i32_1 = arith.constant 0 : i32
    return %arg1, %c0_i32, %c0_i32_0 : i32, i32, i32
  }
  func.func @transform_32(%arg0: i32, %arg1: i32) -> (i32, i32, i32) {
    %c0_i32 = arith.constant 0 : i32
    %c0_i32_0 = arith.constant 0 : i32
    %c0_i32_1 = arith.constant 0 : i32
    return %arg1, %c0_i32, %c0_i32_0 : i32, i32, i32
  }
  func.func @transform_33(%arg0: i32, %arg1: i32) -> (i32, i32, i32) {
    %c0_i32 = arith.constant 0 : i32
    %c0_i32_0 = arith.constant 0 : i32
    %c0_i32_1 = arith.constant 0 : i32
    return %arg1, %c0_i32, %c0_i32_0 : i32, i32, i32
  }
  func.func @transform_34(%arg0: i32, %arg1: i32) -> (i32, i32, i32) {
    %c0_i32 = arith.constant 0 : i32
    %c0_i32_0 = arith.constant 0 : i32
    %c0_i32_1 = arith.constant 0 : i32
    return %arg0, %c0_i32, %c0_i32_0 : i32, i32, i32
  }
}

</mosaic_0001>

<bundles_post_ra>
// kernel: tpu_custom_call.1
= control target key start
LH: loop header
LB: loop body
LE: loop exit
PB: predicated region body
PF: predicated region fallthrough
CT: control target
= control target key end

     0   :  { %s8629_s6 = smov 1   ;;  %s8630_s10 = smov 2   ;;  %s10623_s0 = inlined_call_operand.smem [shape: u32[35], index: -1, kind: input, shape index: {}] }
   0x1   :  { %s8723_s5 = sld [smem:[%s10623_s0]]   ;;  %s8631_s14 = smov 3  }
   0x2   :  { %s8728_s9 = sld [smem:[%s10623_s0 + %s8629_s6]]   ;;  %s8632_s18 = smov 4  }
   0x3   :  { %s8733_s13 = sld [smem:[%s10623_s0 + %s8630_s10]]   ;;  %s8633_s22 = smov 5  }
   0x4   :  { %s8738_s17 = sld [smem:[%s10623_s0 + %s8631_s14]]   ;;  %s8634_s26 = smov 6  }
   0x5   :  { %s8743_s21 = sld [smem:[%s10623_s0 + %s8632_s18]]   ;;  %s8635_s30 = smov 7  }
   0x6   :  { %s8748_s25 = sld [smem:[%s10623_s0 + %s8633_s22]]   ;;  %s8636_s4 = smov 8  }
   0x7   :  { %10688 = sst [smem:[#allocation49_spill]] %s8723_s5  ;;  %s8637_s10 = smov 9  }
   0x8   :  { %10689 = sst [smem:[#allocation50_spill]] %s8728_s9  ;;  %s8638_s15 = smov 10  }
   0x9   :  { %10690 = sst [smem:[#allocation51_spill]] %s8733_s13  ;;  %s8639_s20 = smov 11  }
   0xa   :  { %10691 = sst [smem:[#allocation52_spill]] %s8738_s17  ;;  %s8641_s1 = smov 13  }
   0xb   :  { %s8753_s29 = sld [smem:[%s10623_s0 + %s8634_s26]]   ;;  %s8640_s26 = smov 12  }
   0xc   :  { %s8758_s3 = sld [smem:[%s10623_s0 + %s8635_s30]]   ;;  %s8642_s7 = smov 14  }
   0xd   :  { %s8763_s8 = sld [smem:[%s10623_s0 + %s8636_s4]]   ;;  %s8644_s22 = smov 16  }
   0xe   :  { %s8768_s14 = sld [smem:[%s10623_s0 + %s8637_s10]]   ;;  %s8645_s28 = smov 17  }
   0xf   :  { %s8773_s19 = sld [smem:[%s10623_s0 + %s8638_s15]]   ;;  %s8643_s15 = smov 15  }
  0x10   :  { %s8778_s24 = sld [smem:[%s10623_s0 + %s8639_s20]]  }
  0x11   :  { %s8783_s30 = sld [smem:[%s10623_s0 + %s8640_s26]]  }
  0x12   :  { %10692 = sst [smem:[#allocation53_spill]] %s8758_s3 }
  0x13   :  { %10693 = sst [smem:[#allocation54_spill]] %s8763_s8 }
  0x14   :  { %10694 = sst [smem:[#allocation55_spill]] %s8768_s14 }
  0x15   :  { %10695 = sst [smem:[#allocation56_spill]] %s8773_s19 }
  0x16   :  { %s8788_s6 = sld [smem:[%s10623_s0 + %s8641_s1]]  }
  0x17   :  { %s8793_s12 = sld [smem:[%s10623_s0 + %s8642_s7]]   ;;  %s8646_s7 = smov 18  }
  0x18   :  { %s8798_s20 = sld [smem:[%s10623_s0 + %s8643_s15]]   ;;  %s8647_s15 = smov 19  }
  0x19   :  { %s8803_s27 = sld [smem:[%s10623_s0 + %s8644_s22]]   ;;  %s8648_s22 = smov 20  }
  0x1a   :  { %s8808_s4 = sld [smem:[%s10623_s0 + %s8645_s28]]   ;;  %s8649_s28 = smov 21  }
  0x1c   :  { %10696 = sst [smem:[#allocation57_spill]] %s8788_s6 }
  0x1d   :  { %10697 = sst [smem:[#allocation58_spill]] %s8793_s12 }
  0x1e   :  { %10698 = sst [smem:[#allocation59_spill]] %s8798_s20 }
  0x1f   :  { %10699 = sst [smem:[#allocation60_spill]] %s8803_s27 }
  0x20   :  { %10700 = sst [smem:[#allocation61_spill]] %s8808_s4 }
  0x21   :  { %s8813_s12 = sld [smem:[%s10623_s0 + %s8646_s7]]   ;;  %s8650_s7 = smov 22  }
  0x22   :  { %s8818_s20 = sld [smem:[%s10623_s0 + %s8647_s15]]   ;;  %s8651_s15 = smov 23  }
  0x23   :  { %s8823_s27 = sld [smem:[%s10623_s0 + %s8648_s22]]   ;;  %s8652_s22 = smov 24  }
  0x24   :  { %s8828_s4 = sld [smem:[%s10623_s0 + %s8649_s28]]   ;;  %s8653_s28 = smov 25  }
  0x27   :  { %10701 = sst [smem:[#allocation62_spill]] %s8813_s12 }
  0x28   :  { %10702 = sst [smem:[#allocation63_spill]] %s8818_s20 }
  0x29   :  { %10703 = sst [smem:[#allocation64_spill]] %s8823_s27 }
  0x2a   :  { %10704 = sst [smem:[#allocation65_spill]] %s8828_s4 }
  0x2b   :  { %s8833_s12 = sld [smem:[%s10623_s0 + %s8650_s7]]   ;;  %s8654_s7 = smov 26  }
  0x2c   :  { %s8838_s20 = sld [smem:[%s10623_s0 + %s8651_s15]]   ;;  %s8655_s15 = smov 27  }
  0x2d   :  { %s8843_s27 = sld [smem:[%s10623_s0 + %s8652_s22]]   ;;  %s8656_s22 = smov 28  }
  0x2e   :  { %s8848_s4 = sld [smem:[%s10623_s0 + %s8653_s28]]   ;;  %s8657_s28 = smov 29  }
  0x31   :  { %10705 = sst [smem:[#allocation66_spill]] %s8833_s12 }
  0x32   :  { %10706 = sst [smem:[#allocation67_spill]] %s8838_s20 }
  0x33   :  { %10707 = sst [smem:[#allocation68_spill]] %s8843_s27 }
  0x34   :  { %10708 = sst [smem:[#allocation69_spill]] %s8848_s4 }
  0x35   :  { %s8853_s12 = sld [smem:[%s10623_s0 + %s8654_s7]]   ;;  %s8658_s7 = smov 30  }
  0x36   :  { %s8858_s20 = sld [smem:[%s10623_s0 + %s8655_s15]]   ;;  %s8659_s15 = smov 31  }
  0x37   :  { %s8863_s27 = sld [smem:[%s10623_s0 + %s8656_s22]]   ;;  %s8660_s22 = smov 32  }
  0x38   :  { %s8868_s4 = sld [smem:[%s10623_s0 + %s8657_s28]]   ;;  %s8661_s28 = smov 33  }
  0x3b   :  { %10709 = sst [smem:[#allocation70_spill]] %s8853_s12 }
  0x3c   :  { %10710 = sst [smem:[#allocation71_spill]] %s8858_s20 }
  0x3d   :  { %10711 = sst [smem:[#allocation72_spill]] %s8863_s27 }
  0x3e   :  { %10712 = sst [smem:[#allocation73_spill]] %s8868_s4 }
  0x3f   :  { %s8873_s12 = sld [smem:[%s10623_s0 + %s8658_s7]]   ;;  %s8662_s7 = smov 34  }
  0x40   :  { %s8878_s20 = sld [smem:[%s10623_s0 + %s8659_s15]]  }
  0x41   :  { %s8883_s27 = sld [smem:[%s10623_s0 + %s8660_s22]]  }
  0x42   :  { %s8888_s4 = sld [smem:[%s10623_s0 + %s8661_s28]]  }
  0x45   :  { %10713 = sst [smem:[#allocation74_spill]] %s8873_s12 }
  0x46   :  { %s8893_s12 = sld [smem:[%s10623_s0 + %s8662_s7]]  }
  0x48   :  { %10714 = sst [smem:[#allocation75_spill]] %s8888_s4 }
  0x4c   :  { %10715 = sst [smem:[#allocation76_spill]] %s8893_s12 }
  0x4d   :  { %74 = vsyncpa [#allocation4], 0 }
  0x4e   :  { %75 = vsyncpa [#allocation7], 0 }
  0x4f   :  { %76 = vsyncpa [#allocation10], 0 }
  0x50   :  { %77 = vsyncpa [#allocation13], 0 }
  0x51   :  { %78 = vsyncpa [#allocation5], 0  ;;  %s8895_s15 = smov 0   ;;  %s8897_s16 = smov 0  }
  0x52   :  { %s8899_s18 = smov 0   ;;  %s8901_s22 = smov 0  }
  0x53   :  { %s8903_s23 = smov 0   ;;  %s8905_s26 = smov 0  }
  0x54 LB: > { %s10716_s4 = sld [smem:[#allocation75_spill]]  ;;  %s10717_s19 = sld [smem:[#allocation56_spill]]  ;;  %s8619_s22 = sphi %s8901_s22, %s10807_s22   ;;  %s8615_s18 = sphi %s8899_s18, %s10806_s18   ;;  %s8611_s16 = sphi %s8897_s16, %s10805_s16   ;;  %s8607_s15 = sphi %s8895_s15, %s10802_s15   ;;  %s8627_s26 = sphi %s8905_s26, %s84_s26   ;;  %s8623_s23 = sphi %s8903_s23, %s10808_s23  }
  0x55   : > { %s10718_s6 = sld [smem:[#allocation57_spill]]  ;;  %s10719_s14 = sld [smem:[#allocation55_spill]] }
  0x56   : > { %s10720_s13 = sld [smem:[#allocation51_spill]]  ;;  %s10721_s8 = sld [smem:[#allocation54_spill]] }
  0x57   : > { %s10722_s3 = sld [smem:[#allocation53_spill]]  ;;  %s10723_s5 = sld [smem:[#allocation49_spill]] }
  0x58   : > { %s10724_s17 = sld [smem:[#allocation52_spill]]  ;;  %s10725_s9 = sld [smem:[#allocation50_spill]] }
  0x59   : > { %10726 = sst [smem:[#allocation77_spill]] %s8611_s16  ;;  %s8924_s0 = sadd.s32 4294967295, %s8627_s26  }
  0x5a   : > { %10727 = sst [smem:[#allocation78_spill]] %s8619_s22  ;;  %s93_s28 = sadd.s32 1, %s8623_s23 }
  0x5b   : > { %10728 = sst [smem:[#allocation79_spill]] %s8924_s0  ;;  %p94_p0 = scmp.ge.s32.totalorder %s93_s28, 2 }
  0x5c   : > { %s259_s1 = sadd.s32 1, %s8615_s18  ;;  %p266_p1 = scmp.ne.s32.totalorder %s8615_s18, %s8611_s16 }
  0x5d   : > { %p267_p2 = scmp.eq.s32.totalorder %s8627_s26, 0  ;;  %s10810_s28 = smov (%p94_p0, %s93_s28), 0 }
  0x5e   : > { %10729 = sst [smem:[#allocation80_spill]] %s10810_s28  ;;  %p272_p4 = scmp.ne.s32.totalorder %s8611_s16, %s8607_s15 }
  0x5f   : > { %p8933_p3 = por %p267_p2, %p266_p1  ;;  %s256_s7 = ssub.s32 %s8623_s23, %s10810_s28 }
  0x60   : > { %p10645_p5 = scmp.eq.s32.totalorder %s8924_s0, 0  ;;  %p257_p6 = scmp.eq.s32.totalorder %s256_s7, 0 }
  0x61   : > { %s10730_s2 = scalar_select %p8933_p3, 1, 0 }
  0x62   : > { %p6470_p7 = scmp.ge.s32.totalorder %s8627_s26, 1  ;;  %p8944_p8 = por %p10645_p5, %p272_p4 }
  0x63   : > { %p1011_p9 = scmp.lt.s32.totalorder %s8627_s26, 3  ;;  %s8663_s15 = smov [#allocation6]  }
  0x64   : > { %s10731_s10 = scalar_select %p8944_p8, 1, 0 }
  0x65   : > { %s8950_s11 = scalar_select %p257_p6, %s8615_s18, %s259_s1  }
  0x66   : > { %10732 = sst [smem:[#allocation81_spill]] %s10731_s10  ;;  %p8952_p10 = pnand %p6470_p7, %p1011_p9 }
  0x67   : > { %10733 = sst [smem:[#allocation82_spill]] %s8950_s11  ;;  %s1042_s28 = sshll.u32 %s8663_s15, 4  ;;  %s1043_s28 = int_to_ptr.vmem [resolvable:$true] %s1042_s28 }
  0x68   : > { %s10734_s12 = scalar_select %p8952_p10, 1, 0 }
  0x69   : > { %p7258_p11 = pneg %p8952_p10  ;;  %s8664_s22 = smov [#allocation9]  }
  0x6a   : > { %s1075_s10 = sshll.u32 %s8664_s22, 4  ;;  %s7579_s1 = scalar_lea.hbm %s10725_s9, 128  ;;  %s8964_s10 = int_to_ptr.vmem [resolvable:$true] %s1075_s10 }
  0x6b   : > { %p8960_p12 = pnand %p7258_p11, %p10645_p5  ;;  %p7580_p13 = scmp.ne.s32.totalorder %s10725_s9, %s7579_s1 }
  0x6c   : > { %p7586_p4 = scmp.lt.u32.totalorder %s7579_s1, %s10725_s9 }
  0x6d   : > { %p8970_p0 = pneg %p8960_p12 }
  0x6f   : > { %p7582_p1 = pnand %p8970_p0, %p7580_p13 }
  0x71   : > { %p7583_p2 = pneg %p7582_p1 }
  0x73   : > { %p7588_p6 = pnand %p7586_p4, %p7583_p2 }
  0x75   : > { %7591 = shalt.err (!%p7588_p6)
}
  0x76   : > { %s7592_s15 = scalar_lea.vmem %s1043_s28, 128  ;;  %p7600_p5 = scmp.lt.s32.totalorder %s1043_s28, %s1043_s28 }
  0x77   : > { %p7593_p7 = scmp.ne.s32.totalorder %s1043_s28, %s7592_s15  ;;  %p7601_p8 = scmp.lt.s32.totalorder %s7592_s15, %s7592_s15 }
  0x79   : > { %p7595_p9 = pnand %p7593_p7, %p8970_p0  ;;  %p7602_p10 = por %p7601_p8, %p7600_p5 }
  0x7b   : > { %p7596_p11 = pneg %p7595_p9 }
  0x7d   : > { %p7603_p3 = pnand %p7602_p10, %p7596_p11 }
  0x7f   : > { %7606 = shalt.err (!%p7603_p3)
}
  0x80   : > { %s10651_s22 = smov 64   ;;  %s10653_s1 = smov 4  }
  0x81   : > { %7264 = dma.hbm_to_vmem [thread:$0]  (!%p8960_p12), %s10725_s9, 128, %s1043_s28, [#allocation7], %s10651_s22, %s10651_s22, %s10653_s1  }
  0x82   : > { %s7607_s16 = scalar_lea.hbm %s10724_s17, 128 }
  0x83   : > { %p7608_p13 = scmp.ne.s32.totalorder %s10724_s17, %s7607_s16  ;;  %p7614_p8 = scmp.lt.u32.totalorder %s7607_s16, %s10724_s17 }
  0x85   : > { %p7610_p1 = pnand %p7608_p13, %p8970_p0 }
  0x87   : > { %p7611_p5 = pneg %p7610_p1 }
  0x89   : > { %p7616_p3 = pnand %p7614_p8, %p7611_p5 }
  0x8b   : > { %7619 = shalt.err (!%p7616_p3)
}
  0x8c   : > { %s7620_s15 = scalar_lea.vmem %s8964_s10, 128  ;;  %p7628_p6 = scmp.lt.s32.totalorder %s8964_s10, %s8964_s10 }
  0x8d   : > { %p7621_p10 = scmp.ne.s32.totalorder %s8964_s10, %s7620_s15  ;;  %p7629_p7 = scmp.lt.s32.totalorder %s7620_s15, %s7620_s15 }
  0x8f   : > { %p7623_p2 = pnand %p7621_p10, %p8970_p0  ;;  %p7630_p9 = por %p7629_p7, %p7628_p6 }
  0x91   : > { %p7624_p4 = pneg %p7623_p2 }
  0x93   : > { %p7631_p11 = pnand %p7630_p9, %p7624_p4 }
  0x95   : > { %7634 = shalt.err (!%p7631_p11)
}
  0x96   : > { %7270 = dma.hbm_to_vmem [thread:$0]  (!%p8960_p12), %s10724_s17, 128, %s8964_s10, [#allocation10], %s10651_s22, %s10651_s22, %s10653_s1  }
  0x97   : > { %s8667_s16 = smov [#allocation3]   ;;  %s7635_s9 = scalar_lea.hbm %s10723_s5, 256 }
  0x98   : > { %s1026_s28 = sshll.u32 %s8667_s16, 4  ;;  %p7636_p13 = scmp.ne.s32.totalorder %s10723_s5, %s7635_s9  ;;  %s1027_s28 = int_to_ptr.vmem [resolvable:$true] %s1026_s28 }
  0x99   : > { %p7642_p8 = scmp.lt.u32.totalorder %s7635_s9, %s10723_s5 }
  0x9a   : > { %p7638_p1 = pnand %p7636_p13, %p8970_p0 }
  0x9c   : > { %p7639_p5 = pneg %p7638_p1 }
  0x9e   : > { %p7644_p3 = pnand %p7642_p8, %p7639_p5 }
  0xa0   : > { %7647 = shalt.err (!%p7644_p3)
}
  0xa1   : > { %s7648_s15 = scalar_lea.vmem %s1027_s28, 256  ;;  %p7656_p6 = scmp.lt.s32.totalorder %s1027_s28, %s1027_s28 }
  0xa2   : > { %p7649_p10 = scmp.ne.s32.totalorder %s1027_s28, %s7648_s15  ;;  %p7657_p7 = scmp.lt.s32.totalorder %s7648_s15, %s7648_s15 }
  0xa4   : > { %p7651_p2 = pnand %p7649_p10, %p8970_p0  ;;  %p7658_p9 = por %p7657_p7, %p7656_p6 }
  0xa6   : > { %p7652_p4 = pneg %p7651_p2 }
  0xa8   : > { %p7659_p11 = pnand %p7658_p9, %p7652_p4 }
  0xaa   : > { %7662 = shalt.err (!%p7659_p11)
}
  0xab   : > { %s8668_s10 = smov 128   ;;  %s8669_s9 = smov 8  }
  0xac   : > { %7261 = dma.hbm_to_vmem [thread:$0]  (!%p8960_p12), %s10723_s5, 256, %s1027_s28, [#allocation4], %s8668_s10, %s8668_s10, %s8669_s9  }
  0xad   : > { %s8670_s16 = smov [#allocation8]   ;;  %s8671_s1 = smov [#allocation11]  }
  0xae   : > { %s1059_s22 = sshll.u32 %s8670_s16, 4  ;;  %s1091_s17 = sshll.u32 %s8671_s1, 4  ;;  %s1060_s22 = int_to_ptr.vmem [resolvable:$true] %s1059_s22  ;;  %s9013_s17 = int_to_ptr.vmem [resolvable:$true] %s1091_s17 }
  0xaf   : > { %s7663_s15 = scalar_lea.hbm %s10720_s13, 256 }
  0xb0   : > { %p7664_p13 = scmp.ne.s32.totalorder %s10720_s13, %s7663_s15  ;;  %p7670_p8 = scmp.lt.u32.totalorder %s7663_s15, %s10720_s13 }
  0xb2   : > { %p7666_p1 = pnand %p7664_p13, %p8970_p0 }
  0xb4   : > { %p7667_p5 = pneg %p7666_p1 }
  0xb6   : > { %p7672_p3 = pnand %p7670_p8, %p7667_p5 }
  0xb8   : > { %7675 = shalt.err (!%p7672_p3)
}
  0xb9   : > { %s7676_s0 = scalar_lea.vmem %s1060_s22, 256  ;;  %p7684_p6 = scmp.lt.s32.totalorder %s1060_s22, %s1060_s22 }
  0xba   : > { %p7677_p10 = scmp.ne.s32.totalorder %s1060_s22, %s7676_s0  ;;  %p7685_p7 = scmp.lt.s32.totalorder %s7676_s0, %s7676_s0 }
  0xbc   : > { %p7679_p2 = pnand %p7677_p10, %p8970_p0  ;;  %p7686_p9 = por %p7685_p7, %p7684_p6 }
  0xbe   : > { %p7680_p4 = pneg %p7679_p2 }
  0xc0   : > { %p7687_p11 = pnand %p7686_p9, %p7680_p4 }
  0xc2   : > { %7690 = shalt.err (!%p7687_p11)
}
  0xc3   : > { %s10737_s1 = smov 4   ;;  %s10738_s28 = smov 64  }
  0xc4   : > { %7267 = dma.hbm_to_vmem [thread:$0]  (!%p8960_p12), %s10720_s13, 256, %s1060_s22, [#allocation7], %s10738_s28, %s10738_s28, %s10737_s1  }
  0xc5   : > { %s7691_s10 = scalar_lea.hbm %s8743_s21, 128 }
  0xc6   : > { %p7692_p13 = scmp.ne.s32.totalorder %s8743_s21, %s7691_s10  ;;  %p7698_p8 = scmp.lt.u32.totalorder %s7691_s10, %s8743_s21 }
  0xc8   : > { %p7694_p1 = pnand %p7692_p13, %p8970_p0 }
  0xca   : > { %p7695_p5 = pneg %p7694_p1 }
  0xcc   : > { %p7700_p3 = pnand %p7698_p8, %p7695_p5 }
  0xce   : > { %7703 = shalt.err (!%p7700_p3)
}
  0xcf   : > { %s7704_s0 = scalar_lea.vmem %s9013_s17, 128  ;;  %p7712_p6 = scmp.lt.s32.totalorder %s9013_s17, %s9013_s17 }
  0xd0   : > { %p7705_p10 = scmp.ne.s32.totalorder %s9013_s17, %s7704_s0  ;;  %p7713_p7 = scmp.lt.s32.totalorder %s7704_s0, %s7704_s0 }
  0xd2   : > { %p7707_p2 = pnand %p7705_p10, %p8970_p0  ;;  %p7714_p9 = por %p7713_p7, %p7712_p6 }
  0xd4   : > { %p7708_p4 = pneg %p7707_p2 }
  0xd6   : > { %p7715_p11 = pnand %p7714_p9, %p7708_p4 }
  0xd8   : > { %7718 = shalt.err (!%p7715_p11)
}
  0xd9   : > { %7273 = dma.hbm_to_vmem [thread:$0]  (!%p8960_p12), %s8743_s21, 128, %s9013_s17, [#allocation10], %s10738_s28, %s10738_s28, %s10737_s1  }
  0xda   : > { %s8672_s22 = smov [#allocation12]   ;;  %s7719_s16 = scalar_lea.hbm %s8748_s25, 128 }
  0xdb   : > { %s1107_s9 = sshll.u32 %s8672_s22, 4  ;;  %p7720_p13 = scmp.ne.s32.totalorder %s8748_s25, %s7719_s16  ;;  %s1108_s9 = int_to_ptr.vmem [resolvable:$true] %s1107_s9 }
  0xdc   : > { %p7726_p8 = scmp.lt.u32.totalorder %s7719_s16, %s8748_s25 }
  0xdd   : > { %p7722_p1 = pnand %p7720_p13, %p8970_p0 }
  0xdf   : > { %p7723_p5 = pneg %p7722_p1 }
  0xe1   : > { %p7728_p3 = pnand %p7726_p8, %p7723_p5 }
  0xe3   : > { %7731 = shalt.err (!%p7728_p3)
}
  0xe4   : > { %s7732_s15 = scalar_lea.vmem %s1108_s9, 128  ;;  %p7740_p6 = scmp.lt.s32.totalorder %s1108_s9, %s1108_s9 }
  0xe5   : > { %p7733_p10 = scmp.ne.s32.totalorder %s1108_s9, %s7732_s15  ;;  %p7741_p7 = scmp.lt.s32.totalorder %s7732_s15, %s7732_s15 }
  0xe7   : > { %p7735_p2 = pnand %p7733_p10, %p8970_p0  ;;  %p7742_p9 = por %p7741_p7, %p7740_p6 }
  0xe9   : > { %p7736_p4 = pneg %p7735_p2 }
  0xeb   : > { %p7743_p11 = pnand %p7742_p9, %p7736_p4 }
  0xed   : > { %7746 = shalt.err (!%p7743_p11)
}
  0xee   : > { %7276 = dma.hbm_to_vmem [thread:$0]  (!%p8960_p12), %s8748_s25, 128, %s1108_s9, [#allocation13], %s10738_s28, %s10738_s28, %s10737_s1  }
  0xef   : > { %p6477_p13 = scmp.ge.s32.totalorder %s8627_s26, 2 }
  0xf0   : > { %s1121_s17 = sand.u32 (!%p6477_p13), 1, %s8627_s26   ;;  %s9062_s11 = sand.u32 (!%p6477_p13), 1, %s8615_s18  }
  0xf1   : > { %1117 = sbr.rel (%p6477_p13) target bundleno = 894 (0x37e), region = 40  ;;  %s9065_s7 = sshll.u32 (!%p6477_p13), %s8623_s23, 4 }
  0xf2   : > { %s1124_s10 = scalar_lea.vmem (!%p6477_p13), [#allocation14], %s9062_s11  ;;  %s9070_s1 = scalar_lea.hbm (!%p6477_p13), %s8753_s29, %s9065_s7 }
  0xf3   : > { %s1131_s0 = sshll.u32 (!%p6477_p13), %s1124_s10, 4  ;;  %s9072_s28 = scalar_lea.sflag (!%p6477_p13), [#allocation4], %s1121_s17  ;;  %s1132_s0 = int_to_ptr.vmem [resolvable:$true] %s1131_s0 }
  0xf4   : > { %s7747_s22 = scalar_lea.hbm (!%p6477_p13), %s9070_s1, 16  ;;  %p10739_p0 = scmp.ne.s32.totalorder (!%p6477_p13), %s10730_s2, 0 }
  0xf5   : > { %p7748_p12 = scmp.ne.s32.totalorder (!%p6477_p13), %s9070_s1, %s7747_s22  ;;  %s7751_s9 = scalar_lea.hbm (!%p6477_p13), %s8753_s29, 32 }
  0xf6   : > { %p7752_p8 = scmp.lt.u32.totalorder (!%p6477_p13), %s9070_s1, %s8753_s29  ;;  %p7753_p3 = scmp.lt.u32.totalorder (!%p6477_p13), %s7751_s9, %s7747_s22 }
  0xf7   : > { %p7749_p1 = pnand (!%p6477_p13), %p7748_p12, %p10739_p0  ;;  %p7755_p2 = scmp.lt.u32.totalorder (!%p6477_p13), %s7747_s22, %s9070_s1 }
  0xf8   : > { %p7754_p10 = por %p7753_p3, %p7752_p8 }
  0xf9   : > { %p7750_p5 = pneg %p7749_p1 }
  0xfa   : > { %p7756_p4 = por %p7755_p2, %p7754_p10 }
  0xfc   : > { %p7757_p6 = pnand %p7756_p4, %p7750_p5 }
  0xfe   : > { %7760 = shalt.err (!%p7757_p6)
}
  0xff   : > { %s7761_s16 = scalar_lea.vmem %s1132_s0, 16  ;;  %s8673_s15 = smov [#allocation14]  }
 0x100   : > { %p7762_p7 = scmp.ne.s32.totalorder %s1132_s0, %s7761_s16  ;;  %s7765_s17 = sshll.u32 %s8673_s15, 4  ;;  %s7766_s17 = int_to_ptr.vmem [resolvable:$false] %s7765_s17 }
 0x101   : > { %s7767_s10 = scalar_lea.vmem %s7766_s17, 32  ;;  %p7768_p13 = scmp.lt.s32.totalorder %s1132_s0, %s7766_s17 }
 0x102   : > { %p7763_p9 = pnand %p7762_p7, %p10739_p0  ;;  %p7769_p12 = scmp.lt.s32.totalorder %s7767_s10, %s7761_s16 }
 0x104   : > { %p7764_p11 = pneg %p7763_p9  ;;  %p7770_p1 = por %p7769_p12, %p7768_p13 }
 0x106   : > { %p7771_p3 = pnand %p7770_p1, %p7764_p11 }
 0x108   : > { %7774 = shalt.err (!%p7771_p3)
}
 0x109   : > { %7186 = dma.hbm_to_vmem [thread:$0]  (%p10739_p0), %s9070_s1, 16, %s1132_s0, %s9072_s28  }
 0x10a   : > { %s9090_s22 = scalar_lea.hbm %s10722_s3, %s9065_s7  ;;  %s1141_s9 = scalar_lea.vmem [#allocation15], %s9062_s11 }
 0x10b   : > { %s1148_s16 = sshll.u32 %s1141_s9, 4  ;;  %s9094_s15 = sshll.u32 %s9062_s11, 4  ;;  %s1149_s16 = int_to_ptr.vmem [resolvable:$true] %s1148_s16 }
 0x10c   : > { %s7775_s17 = scalar_lea.hbm %s9090_s22, 16  ;;  %s7779_s10 = scalar_lea.hbm %s10722_s3, 32 }
 0x10d   : > { %p7776_p5 = scmp.ne.s32.totalorder %s9090_s22, %s7775_s17  ;;  %p7780_p2 = scmp.lt.u32.totalorder %s9090_s22, %s10722_s3 }
 0x10e   : > { %p7781_p4 = scmp.lt.u32.totalorder %s7779_s10, %s7775_s17  ;;  %p7783_p7 = scmp.lt.u32.totalorder %s7775_s17, %s9090_s22 }
 0x10f   : > { %p7777_p8 = pnand %p7776_p5, %p10739_p0 }
 0x110   : > { %p7782_p6 = por %p7781_p4, %p7780_p2 }
 0x111   : > { %p7778_p10 = pneg %p7777_p8 }
 0x112   : > { %p7784_p9 = por %p7783_p7, %p7782_p6 }
 0x114   : > { %p7785_p11 = pnand %p7784_p9, %p7778_p10 }
 0x116   : > { %7788 = shalt.err (!%p7785_p11)
}
 0x117   : > { %s7789_s0 = scalar_lea.vmem %s1149_s16, 16  ;;  %s8674_s1 = smov [#allocation15]  }
 0x118   : > { %p7790_p13 = scmp.ne.s32.totalorder %s1149_s16, %s7789_s0  ;;  %s7793_s9 = sshll.u32 %s8674_s1, 4  ;;  %s7794_s9 = int_to_ptr.vmem [resolvable:$false] %s7793_s9 }
 0x119   : > { %s7795_s5 = scalar_lea.vmem %s7794_s9, 32  ;;  %p7796_p3 = scmp.lt.s32.totalorder %s1149_s16, %s7794_s9 }
 0x11a   : > { %p7791_p12 = pnand %p7790_p13, %p10739_p0  ;;  %p7797_p5 = scmp.lt.s32.totalorder %s7795_s5, %s7789_s0 }
 0x11c   : > { %p7792_p1 = pneg %p7791_p12  ;;  %p7798_p8 = por %p7797_p5, %p7796_p3 }
 0x11e   : > { %p7799_p2 = pnand %p7798_p8, %p7792_p1 }
 0x120   : > { %7802 = shalt.err (!%p7799_p2)
}
 0x121   : > { %7187 = dma.hbm_to_vmem [thread:$0]  (%p10739_p0), %s9090_s22, 16, %s1149_s16, %s9072_s28  }
 0x122   : > { %s9111_s17 = sshll.u32 %s8623_s23, 8  ;;  %s1159_s10 = scalar_lea.vmem [#allocation16], %s9094_s15 }
 0x123   : > { %s1166_s1 = sshll.u32 %s1159_s10, 4  ;;  %s9116_s5 = scalar_lea.hbm %s10721_s8, %s9111_s17  ;;  %s9118_s1 = int_to_ptr.vmem [resolvable:$true] %s1166_s1 }
 0x124   : > { %s7803_s0 = scalar_lea.hbm %s9116_s5, 256  ;;  %s7807_s9 = scalar_lea.hbm %s10721_s8, 512 }
 0x125   : > { %p7804_p10 = scmp.ne.s32.totalorder %s9116_s5, %s7803_s0  ;;  %p7808_p7 = scmp.lt.u32.totalorder %s9116_s5, %s10721_s8 }
 0x126   : > { %p7809_p9 = scmp.lt.u32.totalorder %s7807_s9, %s7803_s0  ;;  %p7811_p13 = scmp.lt.u32.totalorder %s7803_s0, %s9116_s5 }
 0x127   : > { %p7805_p4 = pnand %p7804_p10, %p10739_p0 }
 0x128   : > { %p7810_p11 = por %p7809_p9, %p7808_p7 }
 0x129   : > { %p7806_p6 = pneg %p7805_p4 }
 0x12a   : > { %p7812_p12 = por %p7811_p13, %p7810_p11 }
 0x12c   : > { %p7813_p1 = pnand %p7812_p12, %p7806_p6 }
 0x12e   : > { %7816 = shalt.err (!%p7813_p1)
}
 0x12f   : > { %s7817_s22 = scalar_lea.vmem %s9118_s1, 256  ;;  %s8675_s16 = smov [#allocation16]  }
 0x130   : > { %p7818_p3 = scmp.ne.s32.totalorder %s9118_s1, %s7817_s22  ;;  %s7821_s10 = sshll.u32 %s8675_s16, 4  ;;  %s7822_s10 = int_to_ptr.vmem [resolvable:$false] %s7821_s10 }
 0x131   : > { %s7823_s3 = scalar_lea.vmem %s7822_s10, 512  ;;  %p7824_p2 = scmp.lt.s32.totalorder %s9118_s1, %s7822_s10 }
 0x132   : > { %p7819_p5 = pnand %p7818_p3, %p10739_p0  ;;  %p7825_p10 = scmp.lt.s32.totalorder %s7823_s3, %s7817_s22 }
 0x134   : > { %p7820_p8 = pneg %p7819_p5  ;;  %p7826_p4 = por %p7825_p10, %p7824_p2 }
 0x136   : > { %p7827_p7 = pnand %p7826_p4, %p7820_p8 }
 0x138   : > { %7830 = shalt.err (!%p7827_p7)
}
 0x139   : > { %s10663_s0 = smov 64   ;;  %s10666_s9 = smov 4  }
 0x13a   : > { %7188 = dma.hbm_to_vmem [thread:$0]  (%p10739_p0), %s9116_s5, 256, %s9118_s1, %s9072_s28, %s10663_s0, %s10663_s0, %s10666_s9  }
 0x13b   : > { %s9143_s3 = scalar_lea.hbm %s10719_s14, %s9065_s7  ;;  %s1179_s22 = scalar_lea.vmem [#allocation17], %s9062_s11 }
 0x13c   : > { %s1186_s16 = sshll.u32 %s1179_s22, 4  ;;  %s9148_s10 = scalar_lea.hbm %s10717_s19, %s9111_s17  ;;  %s1187_s16 = int_to_ptr.vmem [resolvable:$true] %s1186_s16 }
 0x13d   : > { %s7831_s8 = scalar_lea.hbm %s9143_s3, 16  ;;  %s7835_s13 = scalar_lea.hbm %s10719_s14, 32 }
 0x13e   : > { %p7832_p6 = scmp.ne.s32.totalorder %s9143_s3, %s7831_s8  ;;  %p7836_p13 = scmp.lt.u32.totalorder %s9143_s3, %s10719_s14 }
 0x13f   : > { %p7837_p12 = scmp.lt.u32.totalorder %s7835_s13, %s7831_s8  ;;  %p7839_p3 = scmp.lt.u32.totalorder %s7831_s8, %s9143_s3 }
 0x140   : > { %p7833_p9 = pnand %p7832_p6, %p10739_p0 }
 0x141   : > { %p7838_p1 = por %p7837_p12, %p7836_p13 }
 0x142   : > { %p7834_p11 = pneg %p7833_p9 }
 0x143   : > { %p7840_p5 = por %p7839_p3, %p7838_p1 }
 0x145   : > { %p7841_p8 = pnand %p7840_p5, %p7834_p11 }
 0x147   : > { %7844 = shalt.err (!%p7841_p8)
}
 0x148   : > { %s7845_s1 = scalar_lea.vmem %s1187_s16, 16  ;;  %s8678_s5 = smov [#allocation17]  }
 0x149   : > { %p7846_p2 = scmp.ne.s32.totalorder %s1187_s16, %s7845_s1  ;;  %s7849_s22 = sshll.u32 %s8678_s5, 4  ;;  %s7850_s22 = int_to_ptr.vmem [resolvable:$false] %s7849_s22 }
 0x14a   : > { %s7851_s0 = scalar_lea.vmem %s7850_s22, 32  ;;  %p7852_p7 = scmp.lt.s32.totalorder %s1187_s16, %s7850_s22 }
 0x14b   : > { %p7847_p10 = pnand %p7846_p2, %p10739_p0  ;;  %p7853_p6 = scmp.lt.s32.totalorder %s7851_s0, %s7845_s1 }
 0x14d   : > { %p7848_p4 = pneg %p7847_p10  ;;  %p7854_p9 = por %p7853_p6, %p7852_p7 }
 0x14f   : > { %p7855_p12 = pnand %p7854_p9, %p7848_p4 }
 0x151   : > { %7858 = shalt.err (!%p7855_p12)
}
 0x152   : > { %7189 = dma.hbm_to_vmem [thread:$0]  (%p10739_p0), %s9143_s3, 16, %s1187_s16, %s9072_s28  }
 0x153   : > { %s1197_s13 = scalar_lea.vmem [#allocation18], %s9094_s15  ;;  %s9169_s0 = scalar_lea.hbm %s8778_s24, %s9065_s7 }
 0x154   : > { %s1204_s8 = sshll.u32 %s1197_s13, 4  ;;  %s7859_s1 = scalar_lea.hbm %s9148_s10, 256  ;;  %s9165_s8 = int_to_ptr.vmem [resolvable:$true] %s1204_s8 }
 0x155   : > { %p7860_p11 = scmp.ne.s32.totalorder %s9148_s10, %s7859_s1  ;;  %s7863_s5 = scalar_lea.hbm %s10717_s19, 512 }
 0x156   : > { %p7864_p3 = scmp.lt.u32.totalorder %s9148_s10, %s10717_s19  ;;  %p7865_p5 = scmp.lt.u32.totalorder %s7863_s5, %s7859_s1 }
 0x157   : > { %p7861_p13 = pnand %p7860_p11, %p10739_p0  ;;  %p7867_p2 = scmp.lt.u32.totalorder %s7859_s1, %s9148_s10 }
 0x158   : > { %p7866_p8 = por %p7865_p5, %p7864_p3 }
 0x159   : > { %p7862_p1 = pneg %p7861_p13 }
 0x15a   : > { %p7868_p10 = por %p7867_p2, %p7866_p8 }
 0x15c   : > { %p7869_p4 = pnand %p7868_p10, %p7862_p1 }
 0x15e   : > { %7872 = shalt.err (!%p7869_p4)
}
 0x15f   : > { %s7873_s3 = scalar_lea.vmem %s9165_s8, 256  ;;  %s8679_s16 = smov [#allocation18]  }
 0x160   : > { %p7874_p7 = scmp.ne.s32.totalorder %s9165_s8, %s7873_s3  ;;  %s7877_s22 = sshll.u32 %s8679_s16, 4  ;;  %s7878_s22 = int_to_ptr.vmem [resolvable:$false] %s7877_s22 }
 0x161   : > { %s7879_s13 = scalar_lea.vmem %s7878_s22, 512  ;;  %p7880_p12 = scmp.lt.s32.totalorder %s9165_s8, %s7878_s22 }
 0x162   : > { %p7875_p6 = pnand %p7874_p7, %p10739_p0  ;;  %p7881_p11 = scmp.lt.s32.totalorder %s7879_s13, %s7873_s3 }
 0x164   : > { %p7876_p9 = pneg %p7875_p6  ;;  %p7882_p13 = por %p7881_p11, %p7880_p12 }
 0x166   : > { %p7883_p3 = pnand %p7882_p13, %p7876_p9 }
 0x168   : > { %7886 = shalt.err (!%p7883_p3)
}
 0x169   : > { %s10740_s1 = smov 64   ;;  %s1217_s5 = scalar_lea.vmem [#allocation19], %s9062_s11 }
 0x16a   : > { %7190 = dma.hbm_to_vmem [thread:$0]  (%p10739_p0), %s9148_s10, 256, %s9165_s8, %s9072_s28, %s10740_s1, %s10740_s1, %s10666_s9  }
 0x16b   : > { %s1224_s3 = sshll.u32 %s1217_s5, 4  ;;  %s9195_s16 = scalar_lea.hbm %s8783_s30, %s9065_s7  ;;  %s1225_s3 = int_to_ptr.vmem [resolvable:$true] %s1224_s3 }
 0x16c   : > { %s7887_s22 = scalar_lea.hbm %s9169_s0, 16  ;;  %s7891_s13 = scalar_lea.hbm %s8778_s24, 32 }
 0x16d   : > { %p7888_p1 = scmp.ne.s32.totalorder %s9169_s0, %s7887_s22  ;;  %p7892_p2 = scmp.lt.u32.totalorder %s9169_s0, %s8778_s24 }
 0x16e   : > { %p7893_p10 = scmp.lt.u32.totalorder %s7891_s13, %s7887_s22  ;;  %p7895_p7 = scmp.lt.u32.totalorder %s7887_s22, %s9169_s0 }
 0x16f   : > { %p7889_p5 = pnand %p7888_p1, %p10739_p0 }
 0x170   : > { %p7894_p4 = por %p7893_p10, %p7892_p2 }
 0x171   : > { %p7890_p8 = pneg %p7889_p5 }
 0x172   : > { %p7896_p6 = por %p7895_p7, %p7894_p4 }
 0x174   : > { %p7897_p9 = pnand %p7896_p6, %p7890_p8 }
 0x176   : > { %7900 = shalt.err (!%p7897_p9)
}
 0x177   : > { %s7901_s14 = scalar_lea.vmem %s1225_s3, 16  ;;  %s8680_s10 = smov [#allocation19]  }
 0x178   : > { %p7902_p12 = scmp.ne.s32.totalorder %s1225_s3, %s7901_s14  ;;  %s7905_s8 = sshll.u32 %s8680_s10, 4  ;;  %s7906_s8 = int_to_ptr.vmem [resolvable:$false] %s7905_s8 }
 0x179   : > { %s7907_s5 = scalar_lea.vmem %s7906_s8, 32  ;;  %p7908_p3 = scmp.lt.s32.totalorder %s1225_s3, %s7906_s8 }
 0x17a   : > { %p7903_p11 = pnand %p7902_p12, %p10739_p0  ;;  %p7909_p1 = scmp.lt.s32.totalorder %s7907_s5, %s7901_s14 }
 0x17c   : > { %p7904_p13 = pneg %p7903_p11  ;;  %p7910_p5 = por %p7909_p1, %p7908_p3 }
 0x17e   : > { %p7911_p2 = pnand %p7910_p5, %p7904_p13 }
 0x180   : > { %7914 = shalt.err (!%p7911_p2)
}
 0x181   : > { %7191 = dma.hbm_to_vmem [thread:$0]  (%p10739_p0), %s9169_s0, 16, %s1225_s3, %s9072_s28  }
 0x182   : > { %s1234_s22 = scalar_lea.vmem [#allocation20], %s9062_s11  ;;  %s9214_s13 = scalar_lea.hbm %s10718_s6, %s9065_s7 }
 0x183   : > { %s1241_s14 = sshll.u32 %s1234_s22, 4  ;;  %s7915_s10 = scalar_lea.hbm %s9195_s16, 16  ;;  %s1242_s14 = int_to_ptr.vmem [resolvable:$true] %s1241_s14 }
 0x184   : > { %p7916_p8 = scmp.ne.s32.totalorder %s9195_s16, %s7915_s10  ;;  %s7919_s8 = scalar_lea.hbm %s8783_s30, 32 }
 0x185   : > { %p7920_p7 = scmp.lt.u32.totalorder %s9195_s16, %s8783_s30  ;;  %p7921_p6 = scmp.lt.u32.totalorder %s7919_s8, %s7915_s10 }
 0x186   : > { %p7917_p10 = pnand %p7916_p8, %p10739_p0  ;;  %p7923_p12 = scmp.lt.u32.totalorder %s7915_s10, %s9195_s16 }
 0x187   : > { %p7922_p9 = por %p7921_p6, %p7920_p7 }
 0x188   : > { %p7918_p4 = pneg %p7917_p10 }
 0x189   : > { %p7924_p11 = por %p7923_p12, %p7922_p9 }
 0x18b   : > { %p7925_p13 = pnand %p7924_p11, %p7918_p4 }
 0x18d   : > { %7928 = shalt.err (!%p7925_p13)
}
 0x18e   : > { %s7929_s5 = scalar_lea.vmem %s1242_s14, 16  ;;  %s8681_s0 = smov [#allocation20]  }
 0x18f   : > { %p7930_p3 = scmp.ne.s32.totalorder %s1242_s14, %s7929_s5  ;;  %s7933_s3 = sshll.u32 %s8681_s0, 4  ;;  %s7934_s3 = int_to_ptr.vmem [resolvable:$false] %s7933_s3 }
 0x190   : > { %s7935_s22 = scalar_lea.vmem %s7934_s3, 32  ;;  %p7936_p2 = scmp.lt.s32.totalorder %s1242_s14, %s7934_s3 }
 0x191   : > { %p7931_p1 = pnand %p7930_p3, %p10739_p0  ;;  %p7937_p8 = scmp.lt.s32.totalorder %s7935_s22, %s7929_s5 }
 0x193   : > { %p7932_p5 = pneg %p7931_p1  ;;  %p7938_p10 = por %p7937_p8, %p7936_p2 }
 0x195   : > { %p7939_p6 = pnand %p7938_p10, %p7932_p5 }
 0x197   : > { %7942 = shalt.err (!%p7939_p6)
}
 0x198   : > { %s10741_s10 = sld [smem:[#allocation58_spill]]  ;;  %s1251_s8 = scalar_lea.vmem [#allocation21], %s9062_s11 }
 0x199   : > { %7192 = dma.hbm_to_vmem [thread:$0]  (%p10739_p0), %s9195_s16, 16, %s1242_s14, %s9072_s28  }
 0x19a   : > { %s1258_s5 = sshll.u32 %s1251_s8, 4  ;;  %s7943_s3 = scalar_lea.hbm %s9214_s13, 16  ;;  %s1259_s5 = int_to_ptr.vmem [resolvable:$true] %s1258_s5 }
 0x19b   : > { %p7944_p4 = scmp.ne.s32.totalorder %s9214_s13, %s7943_s3  ;;  %s7947_s22 = scalar_lea.hbm %s10718_s6, 32 }
 0x19c   : > { %p7948_p12 = scmp.lt.u32.totalorder %s9214_s13, %s10718_s6  ;;  %p7949_p11 = scmp.lt.u32.totalorder %s7947_s22, %s7943_s3 }
 0x19d   : > { %p7945_p7 = pnand %p7944_p4, %p10739_p0  ;;  %p7951_p3 = scmp.lt.u32.totalorder %s7943_s3, %s9214_s13 }
 0x19e   : > { %s9233_s0 = scalar_lea.hbm %s10741_s10, %s9111_s17  ;;  %p7950_p13 = por %p7949_p11, %p7948_p12 }
 0x19f   : > { %p7946_p9 = pneg %p7945_p7 }
 0x1a0   : > { %p7952_p1 = por %p7951_p3, %p7950_p13 }
 0x1a2   : > { %p7953_p5 = pnand %p7952_p1, %p7946_p9 }
 0x1a4   : > { %7956 = shalt.err (!%p7953_p5)
}
 0x1a5   : > { %s7957_s9 = scalar_lea.vmem %s1259_s5, 16  ;;  %s8682_s16 = smov [#allocation21]  }
 0x1a6   : > { %p7958_p2 = scmp.ne.s32.totalorder %s1259_s5, %s7957_s9  ;;  %s7961_s14 = sshll.u32 %s8682_s16, 4  ;;  %s7962_s14 = int_to_ptr.vmem [resolvable:$false] %s7961_s14 }
 0x1a7   : > { %s7963_s8 = scalar_lea.vmem %s7962_s14, 32  ;;  %p7964_p6 = scmp.lt.s32.totalorder %s1259_s5, %s7962_s14 }
 0x1a8   : > { %p7959_p8 = pnand %p7958_p2, %p10739_p0  ;;  %p7965_p4 = scmp.lt.s32.totalorder %s7963_s8, %s7957_s9 }
 0x1aa   : > { %p7960_p10 = pneg %p7959_p8  ;;  %p7966_p7 = por %p7965_p4, %p7964_p6 }
 0x1ac   : > { %p7967_p11 = pnand %p7966_p7, %p7960_p10 }
 0x1ae   : > { %7970 = shalt.err (!%p7967_p11)
}
 0x1af   : > { %s10742_s3 = sld [smem:[#allocation59_spill]]  ;;  %s1269_s22 = scalar_lea.vmem [#allocation22], %s9094_s15 }
 0x1b0   : > { %7193 = dma.hbm_to_vmem [thread:$0]  (%p10739_p0), %s9214_s13, 16, %s1259_s5, %s9072_s28  }
 0x1b1   : > { %s1276_s9 = sshll.u32 %s1269_s22, 4  ;;  %s7971_s14 = scalar_lea.hbm %s9233_s0, 256  ;;  %s9250_s9 = int_to_ptr.vmem [resolvable:$true] %s1276_s9 }
 0x1b2   : > { %p7972_p9 = scmp.ne.s32.totalorder %s9233_s0, %s7971_s14  ;;  %s7975_s8 = scalar_lea.hbm %s10741_s10, 512 }
 0x1b3   : > { %p7976_p3 = scmp.lt.u32.totalorder %s9233_s0, %s10741_s10  ;;  %p7977_p1 = scmp.lt.u32.totalorder %s7975_s8, %s7971_s14 }
 0x1b4   : > { %p7973_p12 = pnand %p7972_p9, %p10739_p0  ;;  %p7979_p2 = scmp.lt.u32.totalorder %s7971_s14, %s9233_s0 }
 0x1b5   : > { %s9254_s16 = scalar_lea.hbm %s10742_s3, %s9065_s7  ;;  %p7978_p5 = por %p7977_p1, %p7976_p3 }
 0x1b6   : > { %p7974_p13 = pneg %p7973_p12 }
 0x1b7   : > { %p7980_p8 = por %p7979_p2, %p7978_p5 }
 0x1b9   : > { %p7981_p10 = pnand %p7980_p8, %p7974_p13 }
 0x1bb   : > { %7984 = shalt.err (!%p7981_p10)
}
 0x1bc   : > { %s7985_s13 = scalar_lea.vmem %s9250_s9, 256  ;;  %s8683_s5 = smov [#allocation22]  }
 0x1bd   : > { %p7986_p6 = scmp.ne.s32.totalorder %s9250_s9, %s7985_s13  ;;  %s7989_s22 = sshll.u32 %s8683_s5, 4  ;;  %s7990_s22 = int_to_ptr.vmem [resolvable:$false] %s7989_s22 }
 0x1be   : > { %s7991_s6 = scalar_lea.vmem %s7990_s22, 512  ;;  %p7992_p11 = scmp.lt.s32.totalorder %s9250_s9, %s7990_s22 }
 0x1bf   : > { %p7987_p4 = pnand %p7986_p6, %p10739_p0  ;;  %p7993_p9 = scmp.lt.s32.totalorder %s7991_s6, %s7985_s13 }
 0x1c1   : > { %p7988_p7 = pneg %p7987_p4  ;;  %p7994_p12 = por %p7993_p9, %p7992_p11 }
 0x1c3   : > { %p7995_p3 = pnand %p7994_p12, %p7988_p7 }
 0x1c5   : > { %7998 = shalt.err (!%p7995_p3)
}
 0x1c6   : > { %s10743_s14 = smov 4   ;;  %s10744_s8 = sld [smem:[#allocation60_spill]] }
 0x1c7   : > { %7194 = dma.hbm_to_vmem [thread:$0]  (%p10739_p0), %s9233_s0, 256, %s9250_s9, %s9072_s28, %s10740_s1, %s10740_s1, %s10743_s14  }
 0x1c8   : > { %s1289_s6 = scalar_lea.vmem [#allocation23], %s9062_s11  ;;  %s7999_s22 = scalar_lea.hbm %s9254_s16, 16 }
 0x1c9   : > { %s1296_s13 = sshll.u32 %s1289_s6, 4  ;;  %p8000_p13 = scmp.ne.s32.totalorder %s9254_s16, %s7999_s22  ;;  %s1297_s13 = int_to_ptr.vmem [resolvable:$true] %s1296_s13 }
 0x1ca   : > { %s8003_s10 = scalar_lea.hbm %s10742_s3, 32  ;;  %p8004_p2 = scmp.lt.u32.totalorder %s9254_s16, %s10742_s3 }
 0x1cb   : > { %p8001_p1 = pnand %p8000_p13, %p10739_p0  ;;  %p8005_p8 = scmp.lt.u32.totalorder %s8003_s10, %s7999_s22 }
 0x1cc   : > { %s9280_s5 = scalar_lea.hbm %s10744_s8, %s9111_s17  ;;  %p8007_p6 = scmp.lt.u32.totalorder %s7999_s22, %s9254_s16 }
 0x1cd   : > { %p8002_p5 = pneg %p8001_p1  ;;  %p8006_p10 = por %p8005_p8, %p8004_p2 }
 0x1cf   : > { %p8008_p4 = por %p8007_p6, %p8006_p10 }
 0x1d1   : > { %p8009_p7 = pnand %p8008_p4, %p8002_p5 }
 0x1d3   : > { %8012 = shalt.err (!%p8009_p7)
}
 0x1d4   : > { %s8013_s19 = scalar_lea.vmem %s1297_s13, 16  ;;  %s8684_s0 = smov [#allocation23]  }
 0x1d5   : > { %p8014_p11 = scmp.ne.s32.totalorder %s1297_s13, %s8013_s19  ;;  %s8017_s9 = sshll.u32 %s8684_s0, 4  ;;  %s8018_s9 = int_to_ptr.vmem [resolvable:$false] %s8017_s9 }
 0x1d6   : > { %s8019_s6 = scalar_lea.vmem %s8018_s9, 32  ;;  %p8020_p3 = scmp.lt.s32.totalorder %s1297_s13, %s8018_s9 }
 0x1d7   : > { %p8015_p9 = pnand %p8014_p11, %p10739_p0  ;;  %p8021_p13 = scmp.lt.s32.totalorder %s8019_s6, %s8013_s19 }
 0x1d9   : > { %p8016_p12 = pneg %p8015_p9  ;;  %p8022_p1 = por %p8021_p13, %p8020_p3 }
 0x1db   : > { %p8023_p2 = pnand %p8022_p1, %p8016_p12 }
 0x1dd   : > { %8026 = shalt.err (!%p8023_p2)
}
 0x1de   : > { %s10745_s10 = sld [smem:[#allocation61_spill]]  ;;  %s1307_s22 = scalar_lea.vmem [#allocation24], %s9094_s15 }
 0x1df   : > { %7195 = dma.hbm_to_vmem [thread:$0]  (%p10739_p0), %s9254_s16, 16, %s1297_s13, %s9072_s28  }
 0x1e0   : > { %s1314_s19 = sshll.u32 %s1307_s22, 4  ;;  %s8027_s9 = scalar_lea.hbm %s9280_s5, 256  ;;  %s9297_s19 = int_to_ptr.vmem [resolvable:$true] %s1314_s19 }
 0x1e1   : > { %p8028_p5 = scmp.ne.s32.totalorder %s9280_s5, %s8027_s9  ;;  %s8031_s6 = scalar_lea.hbm %s10744_s8, 512 }
 0x1e2   : > { %p8032_p6 = scmp.lt.u32.totalorder %s9280_s5, %s10744_s8  ;;  %p8033_p4 = scmp.lt.u32.totalorder %s8031_s6, %s8027_s9 }
 0x1e3   : > { %p8029_p8 = pnand %p8028_p5, %p10739_p0  ;;  %p8035_p11 = scmp.lt.u32.totalorder %s8027_s9, %s9280_s5 }
 0x1e4   : > { %s9301_s0 = scalar_lea.hbm %s10745_s10, %s9065_s7  ;;  %p8034_p7 = por %p8033_p4, %p8032_p6 }
 0x1e5   : > { %p8030_p10 = pneg %p8029_p8 }
 0x1e6   : > { %p8036_p9 = por %p8035_p11, %p8034_p7 }
 0x1e8   : > { %p8037_p12 = pnand %p8036_p9, %p8030_p10 }
 0x1ea   : > { %8040 = shalt.err (!%p8037_p12)
}
 0x1eb   : > { %s8041_s16 = scalar_lea.vmem %s9297_s19, 256  ;;  %s8685_s13 = smov [#allocation24]  }
 0x1ec   : > { %p8042_p3 = scmp.ne.s32.totalorder %s9297_s19, %s8041_s16  ;;  %s8045_s22 = sshll.u32 %s8685_s13, 4  ;;  %s8046_s22 = int_to_ptr.vmem [resolvable:$false] %s8045_s22 }
 0x1ed   : > { %s8047_s3 = scalar_lea.vmem %s8046_s22, 512  ;;  %p8048_p2 = scmp.lt.s32.totalorder %s9297_s19, %s8046_s22 }
 0x1ee   : > { %p8043_p13 = pnand %p8042_p3, %p10739_p0  ;;  %p8049_p5 = scmp.lt.s32.totalorder %s8047_s3, %s8041_s16 }
 0x1f0   : > { %p8044_p1 = pneg %p8043_p13  ;;  %p8050_p8 = por %p8049_p5, %p8048_p2 }
 0x1f2   : > { %p8051_p6 = pnand %p8050_p8, %p8044_p1 }
 0x1f4   : > { %8054 = shalt.err (!%p8051_p6)
}
 0x1f5   : > { %s10746_s9 = sld [smem:[#allocation62_spill]]  ;;  %s1327_s3 = scalar_lea.vmem [#allocation25], %s9062_s11 }
 0x1f6   : > { %7196 = dma.hbm_to_vmem [thread:$0]  (%p10739_p0), %s9280_s5, 256, %s9297_s19, %s9072_s28, %s10740_s1, %s10740_s1, %s10743_s14  }
 0x1f7   : > { %s1334_s6 = sshll.u32 %s1327_s3, 4  ;;  %s8055_s13 = scalar_lea.hbm %s9301_s0, 16  ;;  %s1335_s6 = int_to_ptr.vmem [resolvable:$true] %s1334_s6 }
 0x1f8   : > { %p8056_p10 = scmp.ne.s32.totalorder %s9301_s0, %s8055_s13  ;;  %s8059_s22 = scalar_lea.hbm %s10745_s10, 32 }
 0x1f9   : > { %p8060_p11 = scmp.lt.u32.totalorder %s9301_s0, %s10745_s10  ;;  %p8061_p9 = scmp.lt.u32.totalorder %s8059_s22, %s8055_s13 }
 0x1fa   : > { %p8057_p4 = pnand %p8056_p10, %p10739_p0  ;;  %p8063_p3 = scmp.lt.u32.totalorder %s8055_s13, %s9301_s0 }
 0x1fb   : > { %s9327_s16 = scalar_lea.hbm %s10746_s9, %s9111_s17  ;;  %p8062_p12 = por %p8061_p9, %p8060_p11 }
 0x1fc   : > { %p8058_p7 = pneg %p8057_p4 }
 0x1fd   : > { %p8064_p13 = por %p8063_p3, %p8062_p12 }
 0x1ff   : > { %p8065_p1 = pnand %p8064_p13, %p8058_p7 }
 0x201   : > { %8068 = shalt.err (!%p8065_p1)
}
 0x202   : > { %s8069_s8 = scalar_lea.vmem %s1335_s6, 16  ;;  %s8686_s5 = smov [#allocation25]  }
 0x203   : > { %p8070_p2 = scmp.ne.s32.totalorder %s1335_s6, %s8069_s8  ;;  %s8073_s19 = sshll.u32 %s8686_s5, 4  ;;  %s8074_s19 = int_to_ptr.vmem [resolvable:$false] %s8073_s19 }
 0x204   : > { %s8075_s3 = scalar_lea.vmem %s8074_s19, 32  ;;  %p8076_p6 = scmp.lt.s32.totalorder %s1335_s6, %s8074_s19 }
 0x205   : > { %p8071_p5 = pnand %p8070_p2, %p10739_p0  ;;  %p8077_p10 = scmp.lt.s32.totalorder %s8075_s3, %s8069_s8 }
 0x207   : > { %p8072_p8 = pneg %p8071_p5  ;;  %p8078_p4 = por %p8077_p10, %p8076_p6 }
 0x209   : > { %p8079_p9 = pnand %p8078_p4, %p8072_p8 }
 0x20b   : > { %8082 = shalt.err (!%p8079_p9)
}
 0x20c   : > { %s10747_s13 = sld [smem:[#allocation63_spill]]  ;;  %s1345_s22 = scalar_lea.vmem [#allocation26], %s9094_s15 }
 0x20d   : > { %7197 = dma.hbm_to_vmem [thread:$0]  (%p10739_p0), %s9301_s0, 16, %s1335_s6, %s9072_s28  }
 0x20e   : > { %s1352_s8 = sshll.u32 %s1345_s22, 4  ;;  %s8083_s19 = scalar_lea.hbm %s9327_s16, 256  ;;  %s9344_s8 = int_to_ptr.vmem [resolvable:$true] %s1352_s8 }
 0x20f   : > { %p8084_p7 = scmp.ne.s32.totalorder %s9327_s16, %s8083_s19  ;;  %s8087_s3 = scalar_lea.hbm %s10746_s9, 512 }
 0x210   : > { %p8088_p3 = scmp.lt.u32.totalorder %s9327_s16, %s10746_s9  ;;  %p8089_p13 = scmp.lt.u32.totalorder %s8087_s3, %s8083_s19 }
 0x211   : > { %p8085_p11 = pnand %p8084_p7, %p10739_p0  ;;  %p8091_p2 = scmp.lt.u32.totalorder %s8083_s19, %s9327_s16 }
 0x212   : > { %s9348_s5 = scalar_lea.hbm %s10747_s13, %s9065_s7  ;;  %p8090_p1 = por %p8089_p13, %p8088_p3 }
 0x213   : > { %p8086_p12 = pneg %p8085_p11 }
 0x214   : > { %p8092_p5 = por %p8091_p2, %p8090_p1 }
 0x216   : > { %p8093_p8 = pnand %p8092_p5, %p8086_p12 }
 0x218   : > { %8096 = shalt.err (!%p8093_p8)
}
 0x219   : > { %s8097_s0 = scalar_lea.vmem %s9344_s8, 256  ;;  %s8687_s6 = smov [#allocation26]  }
 0x21a   : > { %p8098_p6 = scmp.ne.s32.totalorder %s9344_s8, %s8097_s0  ;;  %s8101_s22 = sshll.u32 %s8687_s6, 4  ;;  %s8102_s22 = int_to_ptr.vmem [resolvable:$false] %s8101_s22 }
 0x21b   : > { %s8103_s10 = scalar_lea.vmem %s8102_s22, 512  ;;  %p8104_p9 = scmp.lt.s32.totalorder %s9344_s8, %s8102_s22 }
 0x21c   : > { %p8099_p10 = pnand %p8098_p6, %p10739_p0  ;;  %p8105_p7 = scmp.lt.s32.totalorder %s8103_s10, %s8097_s0 }
 0x21e   : > { %p8100_p4 = pneg %p8099_p10  ;;  %p8106_p11 = por %p8105_p7, %p8104_p9 }
 0x220   : > { %p8107_p3 = pnand %p8106_p11, %p8100_p4 }
 0x222   : > { %8110 = shalt.err (!%p8107_p3)
}
 0x223   : > { %s10748_s19 = sld [smem:[#allocation64_spill]]  ;;  %s1365_s10 = scalar_lea.vmem [#allocation27], %s9062_s11 }
 0x224   : > { %7198 = dma.hbm_to_vmem [thread:$0]  (%p10739_p0), %s9327_s16, 256, %s9344_s8, %s9072_s28, %s10740_s1, %s10740_s1, %s10743_s14  }
 0x225   : > { %s1372_s3 = sshll.u32 %s1365_s10, 4  ;;  %s8111_s6 = scalar_lea.hbm %s9348_s5, 16  ;;  %s1373_s3 = int_to_ptr.vmem [resolvable:$true] %s1372_s3 }
 0x226   : > { %p8112_p12 = scmp.ne.s32.totalorder %s9348_s5, %s8111_s6  ;;  %s8115_s22 = scalar_lea.hbm %s10747_s13, 32 }
 0x227   : > { %p8116_p2 = scmp.lt.u32.totalorder %s9348_s5, %s10747_s13  ;;  %p8117_p5 = scmp.lt.u32.totalorder %s8115_s22, %s8111_s6 }
 0x228   : > { %p8113_p13 = pnand %p8112_p12, %p10739_p0  ;;  %p8119_p6 = scmp.lt.u32.totalorder %s8111_s6, %s9348_s5 }
 0x229   : > { %s9374_s0 = scalar_lea.hbm %s10748_s19, %s9065_s7  ;;  %p8118_p8 = por %p8117_p5, %p8116_p2 }
 0x22a   : > { %p8114_p1 = pneg %p8113_p13 }
 0x22b   : > { %p8120_p10 = por %p8119_p6, %p8118_p8 }
 0x22d   : > { %p8121_p4 = pnand %p8120_p10, %p8114_p1 }
 0x22f   : > { %8124 = shalt.err (!%p8121_p4)
}
 0x230   : > { %s8125_s9 = scalar_lea.vmem %s1373_s3, 16  ;;  %s8688_s16 = smov [#allocation27]  }
 0x231   : > { %p8126_p9 = scmp.ne.s32.totalorder %s1373_s3, %s8125_s9  ;;  %s8129_s8 = sshll.u32 %s8688_s16, 4  ;;  %s8130_s8 = int_to_ptr.vmem [resolvable:$false] %s8129_s8 }
 0x232   : > { %s8131_s10 = scalar_lea.vmem %s8130_s8, 32  ;;  %p8132_p3 = scmp.lt.s32.totalorder %s1373_s3, %s8130_s8 }
 0x233   : > { %p8127_p7 = pnand %p8126_p9, %p10739_p0  ;;  %p8133_p12 = scmp.lt.s32.totalorder %s8131_s10, %s8125_s9 }
 0x235   : > { %p8128_p11 = pneg %p8127_p7  ;;  %p8134_p13 = por %p8133_p12, %p8132_p3 }
 0x237   : > { %p8135_p2 = pnand %p8134_p13, %p8128_p11 }
 0x239   : > { %8138 = shalt.err (!%p8135_p2)
}
 0x23a   : > { %s10749_s6 = sld [smem:[#allocation65_spill]]  ;;  %s1382_s22 = scalar_lea.vmem [#allocation28], %s9062_s11 }
 0x23b   : > { %7199 = dma.hbm_to_vmem [thread:$0]  (%p10739_p0), %s9348_s5, 16, %s1373_s3, %s9072_s28  }
 0x23c   : > { %s1389_s9 = sshll.u32 %s1382_s22, 4  ;;  %s8139_s8 = scalar_lea.hbm %s9374_s0, 16  ;;  %s1390_s9 = int_to_ptr.vmem [resolvable:$true] %s1389_s9 }
 0x23d   : > { %p8140_p1 = scmp.ne.s32.totalorder %s9374_s0, %s8139_s8  ;;  %s8143_s10 = scalar_lea.hbm %s10748_s19, 32 }
 0x23e   : > { %p8144_p6 = scmp.lt.u32.totalorder %s9374_s0, %s10748_s19  ;;  %p8145_p10 = scmp.lt.u32.totalorder %s8143_s10, %s8139_s8 }
 0x23f   : > { %p8141_p5 = pnand %p8140_p1, %p10739_p0  ;;  %p8147_p9 = scmp.lt.u32.totalorder %s8139_s8, %s9374_s0 }
 0x240   : > { %s9393_s16 = scalar_lea.hbm %s10749_s6, %s9065_s7  ;;  %p8146_p4 = por %p8145_p10, %p8144_p6 }
 0x241   : > { %p8142_p8 = pneg %p8141_p5 }
 0x242   : > { %p8148_p7 = por %p8147_p9, %p8146_p4 }
 0x244   : > { %p8149_p11 = pnand %p8148_p7, %p8142_p8 }
 0x246   : > { %8152 = shalt.err (!%p8149_p11)
}
 0x247   : > { %s8153_s13 = scalar_lea.vmem %s1390_s9, 16  ;;  %s8689_s5 = smov [#allocation28]  }
 0x248   : > { %p8154_p3 = scmp.ne.s32.totalorder %s1390_s9, %s8153_s13  ;;  %s8157_s3 = sshll.u32 %s8689_s5, 4  ;;  %s8158_s3 = int_to_ptr.vmem [resolvable:$false] %s8157_s3 }
 0x249   : > { %s8159_s22 = scalar_lea.vmem %s8158_s3, 32  ;;  %p8160_p2 = scmp.lt.s32.totalorder %s1390_s9, %s8158_s3 }
 0x24a   : > { %p8155_p12 = pnand %p8154_p3, %p10739_p0  ;;  %p8161_p1 = scmp.lt.s32.totalorder %s8159_s22, %s8153_s13 }
 0x24c   : > { %p8156_p13 = pneg %p8155_p12  ;;  %p8162_p5 = por %p8161_p1, %p8160_p2 }
 0x24e   : > { %p8163_p6 = pnand %p8162_p5, %p8156_p13 }
 0x250   : > { %8166 = shalt.err (!%p8163_p6)
}
 0x251   : > { %s10750_s8 = sld [smem:[#allocation66_spill]]  ;;  %s1399_s10 = scalar_lea.vmem [#allocation29], %s9062_s11 }
 0x252   : > { %7200 = dma.hbm_to_vmem [thread:$0]  (%p10739_p0), %s9374_s0, 16, %s1390_s9, %s9072_s28  }
 0x253   : > { %s1406_s13 = sshll.u32 %s1399_s10, 4  ;;  %s8167_s3 = scalar_lea.hbm %s9393_s16, 16  ;;  %s1407_s13 = int_to_ptr.vmem [resolvable:$true] %s1406_s13 }
 0x254   : > { %p8168_p8 = scmp.ne.s32.totalorder %s9393_s16, %s8167_s3  ;;  %s8171_s22 = scalar_lea.hbm %s10749_s6, 32 }
 0x255   : > { %p8172_p9 = scmp.lt.u32.totalorder %s9393_s16, %s10749_s6  ;;  %p8173_p7 = scmp.lt.u32.totalorder %s8171_s22, %s8167_s3 }
 0x256   : > { %p8169_p10 = pnand %p8168_p8, %p10739_p0  ;;  %p8175_p3 = scmp.lt.u32.totalorder %s8167_s3, %s9393_s16 }
 0x257   : > { %s9412_s5 = scalar_lea.hbm %s10750_s8, %s9111_s17  ;;  %p8174_p11 = por %p8173_p7, %p8172_p9 }
 0x258   : > { %p8170_p4 = pneg %p8169_p10 }
 0x259   : > { %p8176_p12 = por %p8175_p3, %p8174_p11 }
 0x25b   : > { %p8177_p13 = pnand %p8176_p12, %p8170_p4 }
 0x25d   : > { %8180 = shalt.err (!%p8177_p13)
}
 0x25e   : > { %s8181_s19 = scalar_lea.vmem %s1407_s13, 16  ;;  %s8690_s0 = smov [#allocation29]  }
 0x25f   : > { %p8182_p2 = scmp.ne.s32.totalorder %s1407_s13, %s8181_s19  ;;  %s8185_s9 = sshll.u32 %s8690_s0, 4  ;;  %s8186_s9 = int_to_ptr.vmem [resolvable:$false] %s8185_s9 }
 0x260   : > { %s8187_s10 = scalar_lea.vmem %s8186_s9, 32  ;;  %p8188_p6 = scmp.lt.s32.totalorder %s1407_s13, %s8186_s9 }
 0x261   : > { %p8183_p1 = pnand %p8182_p2, %p10739_p0  ;;  %p8189_p8 = scmp.lt.s32.totalorder %s8187_s10, %s8181_s19 }
 0x263   : > { %p8184_p5 = pneg %p8183_p1  ;;  %p8190_p10 = por %p8189_p8, %p8188_p6 }
 0x265   : > { %p8191_p7 = pnand %p8190_p10, %p8184_p5 }
 0x267   : > { %8194 = shalt.err (!%p8191_p7)
}
 0x268   : > { %s10751_s3 = sld [smem:[#allocation67_spill]]  ;;  %s1417_s22 = scalar_lea.vmem [#allocation30], %s9094_s15 }
 0x269   : > { %7201 = dma.hbm_to_vmem [thread:$0]  (%p10739_p0), %s9393_s16, 16, %s1407_s13, %s9072_s28  }
 0x26a   : > { %s1424_s19 = sshll.u32 %s1417_s22, 4  ;;  %s8195_s9 = scalar_lea.hbm %s9412_s5, 256  ;;  %s9429_s19 = int_to_ptr.vmem [resolvable:$true] %s1424_s19 }
 0x26b   : > { %p8196_p4 = scmp.ne.s32.totalorder %s9412_s5, %s8195_s9  ;;  %s8199_s10 = scalar_lea.hbm %s10750_s8, 512 }
 0x26c   : > { %p8200_p3 = scmp.lt.u32.totalorder %s9412_s5, %s10750_s8  ;;  %p8201_p12 = scmp.lt.u32.totalorder %s8199_s10, %s8195_s9 }
 0x26d   : > { %p8197_p9 = pnand %p8196_p4, %p10739_p0  ;;  %p8203_p2 = scmp.lt.u32.totalorder %s8195_s9, %s9412_s5 }
 0x26e   : > { %s9433_s0 = scalar_lea.hbm %s10751_s3, %s9065_s7  ;;  %p8202_p13 = por %p8201_p12, %p8200_p3 }
 0x26f   : > { %p8198_p11 = pneg %p8197_p9 }
 0x270   : > { %p8204_p1 = por %p8203_p2, %p8202_p13 }
 0x272   : > { %p8205_p5 = pnand %p8204_p1, %p8198_p11 }
 0x274   : > { %8208 = shalt.err (!%p8205_p5)
}
 0x275   : > { %s8209_s16 = scalar_lea.vmem %s9429_s19, 256  ;;  %s8691_s13 = smov [#allocation30]  }
 0x276   : > { %p8210_p6 = scmp.ne.s32.totalorder %s9429_s19, %s8209_s16  ;;  %s8213_s22 = sshll.u32 %s8691_s13, 4  ;;  %s8214_s22 = int_to_ptr.vmem [resolvable:$false] %s8213_s22 }
 0x277   : > { %s8215_s6 = scalar_lea.vmem %s8214_s22, 512  ;;  %p8216_p7 = scmp.lt.s32.totalorder %s9429_s19, %s8214_s22 }
 0x278   : > { %p8211_p8 = pnand %p8210_p6, %p10739_p0  ;;  %p8217_p4 = scmp.lt.s32.totalorder %s8215_s6, %s8209_s16 }
 0x27a   : > { %p8212_p10 = pneg %p8211_p8  ;;  %p8218_p9 = por %p8217_p4, %p8216_p7 }
 0x27c   : > { %p8219_p3 = pnand %p8218_p9, %p8212_p10 }
 0x27e   : > { %8222 = shalt.err (!%p8219_p3)
}
 0x27f   : > { %s10752_s9 = sld [smem:[#allocation68_spill]]  ;;  %s1437_s6 = scalar_lea.vmem [#allocation31], %s9062_s11 }
 0x280   : > { %7202 = dma.hbm_to_vmem [thread:$0]  (%p10739_p0), %s9412_s5, 256, %s9429_s19, %s9072_s28, %s10740_s1, %s10740_s1, %s10743_s14  }
 0x281   : > { %s1444_s10 = sshll.u32 %s1437_s6, 4  ;;  %s8223_s13 = scalar_lea.hbm %s9433_s0, 16  ;;  %s1445_s10 = int_to_ptr.vmem [resolvable:$true] %s1444_s10 }
 0x282   : > { %p8224_p11 = scmp.ne.s32.totalorder %s9433_s0, %s8223_s13  ;;  %s8227_s22 = scalar_lea.hbm %s10751_s3, 32 }
 0x283   : > { %p8228_p2 = scmp.lt.u32.totalorder %s9433_s0, %s10751_s3  ;;  %p8229_p1 = scmp.lt.u32.totalorder %s8227_s22, %s8223_s13 }
 0x284   : > { %p8225_p12 = pnand %p8224_p11, %p10739_p0  ;;  %p8231_p6 = scmp.lt.u32.totalorder %s8223_s13, %s9433_s0 }
 0x285   : > { %s9459_s16 = scalar_lea.hbm %s10752_s9, %s9111_s17  ;;  %p8230_p5 = por %p8229_p1, %p8228_p2 }
 0x286   : > { %p8226_p13 = pneg %p8225_p12 }
 0x287   : > { %p8232_p8 = por %p8231_p6, %p8230_p5 }
 0x289   : > { %p8233_p10 = pnand %p8232_p8, %p8226_p13 }
 0x28b   : > { %8236 = shalt.err (!%p8233_p10)
}
 0x28c   : > { %s8237_s8 = scalar_lea.vmem %s1445_s10, 16  ;;  %s8692_s5 = smov [#allocation31]  }
 0x28d   : > { %p8238_p7 = scmp.ne.s32.totalorder %s1445_s10, %s8237_s8  ;;  %s8241_s19 = sshll.u32 %s8692_s5, 4  ;;  %s8242_s19 = int_to_ptr.vmem [resolvable:$false] %s8241_s19 }
 0x28e   : > { %s8243_s6 = scalar_lea.vmem %s8242_s19, 32  ;;  %p8244_p3 = scmp.lt.s32.totalorder %s1445_s10, %s8242_s19 }
 0x28f   : > { %p8239_p4 = pnand %p8238_p7, %p10739_p0  ;;  %p8245_p11 = scmp.lt.s32.totalorder %s8243_s6, %s8237_s8 }
 0x291   : > { %p8240_p9 = pneg %p8239_p4  ;;  %p8246_p12 = por %p8245_p11, %p8244_p3 }
 0x293   : > { %p8247_p1 = pnand %p8246_p12, %p8240_p9 }
 0x295   : > { %8250 = shalt.err (!%p8247_p1)
}
 0x296   : > { %s10753_s13 = sld [smem:[#allocation69_spill]]  ;;  %s1455_s22 = scalar_lea.vmem [#allocation32], %s9094_s15 }
 0x297   : > { %7203 = dma.hbm_to_vmem [thread:$0]  (%p10739_p0), %s9433_s0, 16, %s1445_s10, %s9072_s28  }
 0x298   : > { %s1462_s8 = sshll.u32 %s1455_s22, 4  ;;  %s8251_s19 = scalar_lea.hbm %s9459_s16, 256  ;;  %s9476_s8 = int_to_ptr.vmem [resolvable:$true] %s1462_s8 }
 0x299   : > { %p8252_p13 = scmp.ne.s32.totalorder %s9459_s16, %s8251_s19  ;;  %s8255_s6 = scalar_lea.hbm %s10752_s9, 512 }
 0x29a   : > { %p8256_p6 = scmp.lt.u32.totalorder %s9459_s16, %s10752_s9  ;;  %p8257_p8 = scmp.lt.u32.totalorder %s8255_s6, %s8251_s19 }
 0x29b   : > { %p8253_p2 = pnand %p8252_p13, %p10739_p0  ;;  %p8259_p7 = scmp.lt.u32.totalorder %s8251_s19, %s9459_s16 }
 0x29c   : > { %s9480_s5 = scalar_lea.hbm %s10753_s13, %s9065_s7  ;;  %p8258_p10 = por %p8257_p8, %p8256_p6 }
 0x29d   : > { %p8254_p5 = pneg %p8253_p2 }
 0x29e   : > { %p8260_p4 = por %p8259_p7, %p8258_p10 }
 0x2a0   : > { %p8261_p9 = pnand %p8260_p4, %p8254_p5 }
 0x2a2   : > { %8264 = shalt.err (!%p8261_p9)
}
 0x2a3   : > { %s8265_s0 = scalar_lea.vmem %s9476_s8, 256  ;;  %s8693_s10 = smov [#allocation32]  }
 0x2a4   : > { %p8266_p3 = scmp.ne.s32.totalorder %s9476_s8, %s8265_s0  ;;  %s8269_s22 = sshll.u32 %s8693_s10, 4  ;;  %s8270_s22 = int_to_ptr.vmem [resolvable:$false] %s8269_s22 }
 0x2a5   : > { %s8271_s3 = scalar_lea.vmem %s8270_s22, 512  ;;  %p8272_p1 = scmp.lt.s32.totalorder %s9476_s8, %s8270_s22 }
 0x2a6   : > { %p8267_p11 = pnand %p8266_p3, %p10739_p0  ;;  %p8273_p13 = scmp.lt.s32.totalorder %s8271_s3, %s8265_s0 }
 0x2a8   : > { %p8268_p12 = pneg %p8267_p11  ;;  %p8274_p2 = por %p8273_p13, %p8272_p1 }
 0x2aa   : > { %p8275_p6 = pnand %p8274_p2, %p8268_p12 }
 0x2ac   : > { %8278 = shalt.err (!%p8275_p6)
}
 0x2ad   : > { %s10754_s19 = sld [smem:[#allocation70_spill]]  ;;  %s1475_s3 = scalar_lea.vmem [#allocation33], %s9062_s11 }
 0x2ae   : > { %7204 = dma.hbm_to_vmem [thread:$0]  (%p10739_p0), %s9459_s16, 256, %s9476_s8, %s9072_s28, %s10740_s1, %s10740_s1, %s10743_s14  }
 0x2af   : > { %s1482_s6 = sshll.u32 %s1475_s3, 4  ;;  %s8279_s10 = scalar_lea.hbm %s9480_s5, 16  ;;  %s1483_s6 = int_to_ptr.vmem [resolvable:$true] %s1482_s6 }
 0x2b0   : > { %p8280_p5 = scmp.ne.s32.totalorder %s9480_s5, %s8279_s10  ;;  %s8283_s22 = scalar_lea.hbm %s10753_s13, 32 }
 0x2b1   : > { %p8284_p7 = scmp.lt.u32.totalorder %s9480_s5, %s10753_s13  ;;  %p8285_p4 = scmp.lt.u32.totalorder %s8283_s22, %s8279_s10 }
 0x2b2   : > { %p8281_p8 = pnand %p8280_p5, %p10739_p0  ;;  %p8287_p3 = scmp.lt.u32.totalorder %s8279_s10, %s9480_s5 }
 0x2b3   : > { %s9506_s0 = scalar_lea.hbm %s10754_s19, %s9111_s17  ;;  %p8286_p9 = por %p8285_p4, %p8284_p7 }
 0x2b4   : > { %p8282_p10 = pneg %p8281_p8 }
 0x2b5   : > { %p8288_p11 = por %p8287_p3, %p8286_p9 }
 0x2b7   : > { %p8289_p12 = pnand %p8288_p11, %p8282_p10 }
 0x2b9   : > { %8292 = shalt.err (!%p8289_p12)
}
 0x2ba   : > { %s8293_s9 = scalar_lea.vmem %s1483_s6, 16  ;;  %s8694_s16 = smov [#allocation33]  }
 0x2bb   : > { %p8294_p1 = scmp.ne.s32.totalorder %s1483_s6, %s8293_s9  ;;  %s8297_s8 = sshll.u32 %s8694_s16, 4  ;;  %s8298_s8 = int_to_ptr.vmem [resolvable:$false] %s8297_s8 }
 0x2bc   : > { %s8299_s3 = scalar_lea.vmem %s8298_s8, 32  ;;  %p8300_p6 = scmp.lt.s32.totalorder %s1483_s6, %s8298_s8 }
 0x2bd   : > { %p8295_p13 = pnand %p8294_p1, %p10739_p0  ;;  %p8301_p5 = scmp.lt.s32.totalorder %s8299_s3, %s8293_s9 }
 0x2bf   : > { %p8296_p2 = pneg %p8295_p13  ;;  %p8302_p8 = por %p8301_p5, %p8300_p6 }
 0x2c1   : > { %p8303_p4 = pnand %p8302_p8, %p8296_p2 }
 0x2c3   : > { %8306 = shalt.err (!%p8303_p4)
}
 0x2c4   : > { %s10755_s10 = sld [smem:[#allocation71_spill]]  ;;  %s1493_s22 = scalar_lea.vmem [#allocation34], %s9094_s15 }
 0x2c5   : > { %7205 = dma.hbm_to_vmem [thread:$0]  (%p10739_p0), %s9480_s5, 16, %s1483_s6, %s9072_s28  }
 0x2c6   : > { %s1500_s9 = sshll.u32 %s1493_s22, 4  ;;  %s8307_s8 = scalar_lea.hbm %s9506_s0, 256  ;;  %s9523_s9 = int_to_ptr.vmem [resolvable:$true] %s1500_s9 }
 0x2c7   : > { %p8308_p10 = scmp.ne.s32.totalorder %s9506_s0, %s8307_s8  ;;  %s8311_s3 = scalar_lea.hbm %s10754_s19, 512 }
 0x2c8   : > { %p8312_p3 = scmp.lt.u32.totalorder %s9506_s0, %s10754_s19  ;;  %p8313_p11 = scmp.lt.u32.totalorder %s8311_s3, %s8307_s8 }
 0x2c9   : > { %p8309_p7 = pnand %p8308_p10, %p10739_p0  ;;  %p8315_p1 = scmp.lt.u32.totalorder %s8307_s8, %s9506_s0 }
 0x2ca   : > { %s9527_s16 = scalar_lea.hbm %s10755_s10, %s9065_s7  ;;  %p8314_p12 = por %p8313_p11, %p8312_p3 }
 0x2cb   : > { %p8310_p9 = pneg %p8309_p7 }
 0x2cc   : > { %p8316_p13 = por %p8315_p1, %p8314_p12 }
 0x2ce   : > { %p8317_p2 = pnand %p8316_p13, %p8310_p9 }
 0x2d0   : > { %8320 = shalt.err (!%p8317_p2)
}
 0x2d1   : > { %s8321_s5 = scalar_lea.vmem %s9523_s9, 256  ;;  %s8695_s6 = smov [#allocation34]  }
 0x2d2   : > { %p8322_p6 = scmp.ne.s32.totalorder %s9523_s9, %s8321_s5  ;;  %s8325_s22 = sshll.u32 %s8695_s6, 4  ;;  %s8326_s22 = int_to_ptr.vmem [resolvable:$false] %s8325_s22 }
 0x2d3   : > { %s8327_s13 = scalar_lea.vmem %s8326_s22, 512  ;;  %p8328_p4 = scmp.lt.s32.totalorder %s9523_s9, %s8326_s22 }
 0x2d4   : > { %p8323_p5 = pnand %p8322_p6, %p10739_p0  ;;  %p8329_p10 = scmp.lt.s32.totalorder %s8327_s13, %s8321_s5 }
 0x2d6   : > { %p8324_p8 = pneg %p8323_p5  ;;  %p8330_p7 = por %p8329_p10, %p8328_p4 }
 0x2d8   : > { %p8331_p3 = pnand %p8330_p7, %p8324_p8 }
 0x2da   : > { %8334 = shalt.err (!%p8331_p3)
}
 0x2db   : > { %s10756_s8 = sld [smem:[#allocation72_spill]]  ;;  %s1513_s13 = scalar_lea.vmem [#allocation35], %s9062_s11 }
 0x2dc   : > { %7206 = dma.hbm_to_vmem [thread:$0]  (%p10739_p0), %s9506_s0, 256, %s9523_s9, %s9072_s28, %s10740_s1, %s10740_s1, %s10743_s14  }
 0x2dd   : > { %s1520_s3 = sshll.u32 %s1513_s13, 4  ;;  %s8335_s6 = scalar_lea.hbm %s9527_s16, 16  ;;  %s1521_s3 = int_to_ptr.vmem [resolvable:$true] %s1520_s3 }
 0x2de   : > { %p8336_p9 = scmp.ne.s32.totalorder %s9527_s16, %s8335_s6  ;;  %s8339_s22 = scalar_lea.hbm %s10755_s10, 32 }
 0x2df   : > { %p8340_p1 = scmp.lt.u32.totalorder %s9527_s16, %s10755_s10  ;;  %p8341_p13 = scmp.lt.u32.totalorder %s8339_s22, %s8335_s6 }
 0x2e0   : > { %p8337_p11 = pnand %p8336_p9, %p10739_p0  ;;  %p8343_p6 = scmp.lt.u32.totalorder %s8335_s6, %s9527_s16 }
 0x2e1   : > { %s9553_s5 = scalar_lea.hbm %s10756_s8, %s9065_s7  ;;  %p8342_p2 = por %p8341_p13, %p8340_p1 }
 0x2e2   : > { %p8338_p12 = pneg %p8337_p11 }
 0x2e3   : > { %p8344_p5 = por %p8343_p6, %p8342_p2 }
 0x2e5   : > { %p8345_p8 = pnand %p8344_p5, %p8338_p12 }
 0x2e7   : > { %8348 = shalt.err (!%p8345_p8)
}
 0x2e8   : > { %s8349_s19 = scalar_lea.vmem %s1521_s3, 16  ;;  %s8696_s0 = smov [#allocation35]  }
 0x2e9   : > { %p8350_p4 = scmp.ne.s32.totalorder %s1521_s3, %s8349_s19  ;;  %s8353_s9 = sshll.u32 %s8696_s0, 4  ;;  %s8354_s9 = int_to_ptr.vmem [resolvable:$false] %s8353_s9 }
 0x2ea   : > { %s8355_s13 = scalar_lea.vmem %s8354_s9, 32  ;;  %p8356_p3 = scmp.lt.s32.totalorder %s1521_s3, %s8354_s9 }
 0x2eb   : > { %p8351_p10 = pnand %p8350_p4, %p10739_p0  ;;  %p8357_p9 = scmp.lt.s32.totalorder %s8355_s13, %s8349_s19 }
 0x2ed   : > { %p8352_p7 = pneg %p8351_p10  ;;  %p8358_p11 = por %p8357_p9, %p8356_p3 }
 0x2ef   : > { %p8359_p1 = pnand %p8358_p11, %p8352_p7 }
 0x2f1   : > { %8362 = shalt.err (!%p8359_p1)
}
 0x2f2   : > { %s10757_s6 = sld [smem:[#allocation73_spill]]  ;;  %s1530_s22 = scalar_lea.vmem [#allocation36], %s9062_s11 }
 0x2f3   : > { %7207 = dma.hbm_to_vmem [thread:$0]  (%p10739_p0), %s9527_s16, 16, %s1521_s3, %s9072_s28  }
 0x2f4   : > { %s1537_s19 = sshll.u32 %s1530_s22, 4  ;;  %s8363_s9 = scalar_lea.hbm %s9553_s5, 16  ;;  %s1538_s19 = int_to_ptr.vmem [resolvable:$true] %s1537_s19 }
 0x2f5   : > { %p8364_p12 = scmp.ne.s32.totalorder %s9553_s5, %s8363_s9  ;;  %s8367_s13 = scalar_lea.hbm %s10756_s8, 32 }
 0x2f6   : > { %p8368_p6 = scmp.lt.u32.totalorder %s9553_s5, %s10756_s8  ;;  %p8369_p5 = scmp.lt.u32.totalorder %s8367_s13, %s8363_s9 }
 0x2f7   : > { %p8365_p13 = pnand %p8364_p12, %p10739_p0  ;;  %p8371_p4 = scmp.lt.u32.totalorder %s8363_s9, %s9553_s5 }
 0x2f8   : > { %s9572_s0 = scalar_lea.hbm %s10757_s6, %s9065_s7  ;;  %p8370_p8 = por %p8369_p5, %p8368_p6 }
 0x2f9   : > { %p8366_p2 = pneg %p8365_p13 }
 0x2fa   : > { %p8372_p10 = por %p8371_p4, %p8370_p8 }
 0x2fc   : > { %p8373_p7 = pnand %p8372_p10, %p8366_p2 }
 0x2fe   : > { %8376 = shalt.err (!%p8373_p7)
}
 0x2ff   : > { %s8377_s10 = scalar_lea.vmem %s1538_s19, 16  ;;  %s8697_s16 = smov [#allocation36]  }
 0x300   : > { %p8378_p3 = scmp.ne.s32.totalorder %s1538_s19, %s8377_s10  ;;  %s8381_s3 = sshll.u32 %s8697_s16, 4  ;;  %s8382_s3 = int_to_ptr.vmem [resolvable:$false] %s8381_s3 }
 0x301   : > { %s8383_s22 = scalar_lea.vmem %s8382_s3, 32  ;;  %p8384_p1 = scmp.lt.s32.totalorder %s1538_s19, %s8382_s3 }
 0x302   : > { %p8379_p9 = pnand %p8378_p3, %p10739_p0  ;;  %p8385_p12 = scmp.lt.s32.totalorder %s8383_s22, %s8377_s10 }
 0x304   : > { %p8380_p11 = pneg %p8379_p9  ;;  %p8386_p13 = por %p8385_p12, %p8384_p1 }
 0x306   : > { %p8387_p5 = pnand %p8386_p13, %p8380_p11 }
 0x308   : > { %8390 = shalt.err (!%p8387_p5)
}
 0x309   : > { %s10758_s9 = sld [smem:[#allocation74_spill]]  ;;  %s1547_s13 = scalar_lea.vmem [#allocation37], %s9062_s11 }
 0x30a   : > { %7208 = dma.hbm_to_vmem [thread:$0]  (%p10739_p0), %s9553_s5, 16, %s1538_s19, %s9072_s28  }
 0x30b   : > { %s1554_s10 = sshll.u32 %s1547_s13, 4  ;;  %s8391_s3 = scalar_lea.hbm %s9572_s0, 16  ;;  %s1555_s10 = int_to_ptr.vmem [resolvable:$true] %s1554_s10 }
 0x30c   : > { %p8392_p2 = scmp.ne.s32.totalorder %s9572_s0, %s8391_s3  ;;  %s8395_s22 = scalar_lea.hbm %s10757_s6, 32 }
 0x30d   : > { %p8396_p4 = scmp.lt.u32.totalorder %s9572_s0, %s10757_s6  ;;  %p8397_p10 = scmp.lt.u32.totalorder %s8395_s22, %s8391_s3 }
 0x30e   : > { %p8393_p6 = pnand %p8392_p2, %p10739_p0  ;;  %p8399_p3 = scmp.lt.u32.totalorder %s8391_s3, %s9572_s0 }
 0x30f   : > { %s9591_s16 = scalar_lea.hbm %s10758_s9, %s9111_s17  ;;  %p8398_p7 = por %p8397_p10, %p8396_p4 }
 0x310   : > { %p8394_p8 = pneg %p8393_p6 }
 0x311   : > { %p8400_p9 = por %p8399_p3, %p8398_p7 }
 0x313   : > { %p8401_p11 = pnand %p8400_p9, %p8394_p8 }
 0x315   : > { %8404 = shalt.err (!%p8401_p11)
}
 0x316   : > { %s8405_s8 = scalar_lea.vmem %s1555_s10, 16  ;;  %s8698_s17 = smov [#allocation37]  }
 0x317   : > { %p8406_p1 = scmp.ne.s32.totalorder %s1555_s10, %s8405_s8  ;;  %s8409_s5 = sshll.u32 %s8698_s17, 4  ;;  %s8410_s5 = int_to_ptr.vmem [resolvable:$false] %s8409_s5 }
 0x318   : > { %s8411_s19 = scalar_lea.vmem %s8410_s5, 32  ;;  %p8412_p5 = scmp.lt.s32.totalorder %s1555_s10, %s8410_s5 }
 0x319   : > { %p8407_p12 = pnand %p8406_p1, %p10739_p0  ;;  %p8413_p2 = scmp.lt.s32.totalorder %s8411_s19, %s8405_s8 }
 0x31b   : > { %p8408_p13 = pneg %p8407_p12  ;;  %p8414_p6 = por %p8413_p2, %p8412_p5 }
 0x31d   : > { %p8415_p4 = pnand %p8414_p6, %p8408_p13 }
 0x31f   : > { %8418 = shalt.err (!%p8415_p4)
}
 0x320   : > { %7209 = dma.hbm_to_vmem [thread:$0]  (%p10739_p0), %s9572_s0, 16, %s1555_s10, %s9072_s28  }
 0x321   : > { %s1565_s13 = scalar_lea.vmem [#allocation38], %s9094_s15  ;;  %s9612_s3 = scalar_lea.hbm %s8878_s20, %s9065_s7 }
 0x322   : > { %s1572_s8 = sshll.u32 %s1565_s13, 4  ;;  %s8419_s22 = scalar_lea.hbm %s9591_s16, 256  ;;  %s9608_s8 = int_to_ptr.vmem [resolvable:$true] %s1572_s8 }
 0x323   : > { %p8420_p8 = scmp.ne.s32.totalorder %s9591_s16, %s8419_s22  ;;  %s8423_s17 = scalar_lea.hbm %s10758_s9, 512 }
 0x324   : > { %p8424_p3 = scmp.lt.u32.totalorder %s9591_s16, %s10758_s9  ;;  %p8425_p9 = scmp.lt.u32.totalorder %s8423_s17, %s8419_s22 }
 0x325   : > { %p8421_p10 = pnand %p8420_p8, %p10739_p0  ;;  %p8427_p1 = scmp.lt.u32.totalorder %s8419_s22, %s9591_s16 }
 0x326   : > { %p8426_p11 = por %p8425_p9, %p8424_p3 }
 0x327   : > { %p8422_p7 = pneg %p8421_p10 }
 0x328   : > { %p8428_p12 = por %p8427_p1, %p8426_p11 }
 0x32a   : > { %p8429_p13 = pnand %p8428_p12, %p8422_p7 }
 0x32c   : > { %8432 = shalt.err (!%p8429_p13)
}
 0x32d   : > { %s8433_s15 = scalar_lea.vmem %s9608_s8, 256  ;;  %s8699_s0 = smov [#allocation38]  }
 0x32e   : > { %p8434_p5 = scmp.ne.s32.totalorder %s9608_s8, %s8433_s15  ;;  %s8437_s10 = sshll.u32 %s8699_s0, 4  ;;  %s8438_s10 = int_to_ptr.vmem [resolvable:$false] %s8437_s10 }
 0x32f   : > { %s8439_s5 = scalar_lea.vmem %s8438_s10, 512  ;;  %p8440_p4 = scmp.lt.s32.totalorder %s9608_s8, %s8438_s10 }
 0x330   : > { %p8435_p2 = pnand %p8434_p5, %p10739_p0  ;;  %p8441_p8 = scmp.lt.s32.totalorder %s8439_s5, %s8433_s15 }
 0x332   : > { %p8436_p6 = pneg %p8435_p2  ;;  %p8442_p10 = por %p8441_p8, %p8440_p4 }
 0x334   : > { %p8443_p3 = pnand %p8442_p10, %p8436_p6 }
 0x336   : > { %8446 = shalt.err (!%p8443_p3)
}
 0x337   : > { %7210 = dma.hbm_to_vmem [thread:$0]  (%p10739_p0), %s9591_s16, 256, %s9608_s8, %s9072_s28, %s10740_s1, %s10740_s1, %s10743_s14  }
 0x338   : > { %s1585_s19 = scalar_lea.vmem [#allocation39], %s9062_s11  ;;  %s6522_s22 = sshll.u32 %s9062_s11, 5 }
 0x339   : > { %s1592_s13 = sshll.u32 %s1585_s19, 4  ;;  %s8447_s17 = scalar_lea.hbm %s9612_s3, 16  ;;  %s1593_s13 = int_to_ptr.vmem [resolvable:$true] %s1592_s13 }
 0x33a   : > { %p8448_p7 = scmp.ne.s32.totalorder %s9612_s3, %s8447_s17  ;;  %s8451_s15 = scalar_lea.hbm %s8878_s20, 32 }
 0x33b   : > { %p8452_p1 = scmp.lt.u32.totalorder %s9612_s3, %s8878_s20  ;;  %p8453_p12 = scmp.lt.u32.totalorder %s8451_s15, %s8447_s17 }
 0x33c   : > { %p8449_p9 = pnand %p8448_p7, %p10739_p0  ;;  %p8455_p5 = scmp.lt.u32.totalorder %s8447_s17, %s9612_s3 }
 0x33d   : > { %p8454_p13 = por %p8453_p12, %p8452_p1 }
 0x33e   : > { %p8450_p11 = pneg %p8449_p9 }
 0x33f   : > { %p8456_p2 = por %p8455_p5, %p8454_p13 }
 0x341   : > { %p8457_p6 = pnand %p8456_p2, %p8450_p11 }
 0x343   : > { %8460 = shalt.err (!%p8457_p6)
}
 0x344   : > { %s8461_s0 = scalar_lea.vmem %s1593_s13, 16  ;;  %s8700_s16 = smov [#allocation39]  }
 0x345   : > { %p8462_p4 = scmp.ne.s32.totalorder %s1593_s13, %s8461_s0  ;;  %s8465_s8 = sshll.u32 %s8700_s16, 4  ;;  %s8466_s8 = int_to_ptr.vmem [resolvable:$false] %s8465_s8 }
 0x346   : > { %s8467_s10 = scalar_lea.vmem %s8466_s8, 32  ;;  %p8468_p3 = scmp.lt.s32.totalorder %s1593_s13, %s8466_s8 }
 0x347   : > { %p8463_p8 = pnand %p8462_p4, %p10739_p0  ;;  %p8469_p7 = scmp.lt.s32.totalorder %s8467_s10, %s8461_s0 }
 0x349   : > { %p8464_p10 = pneg %p8463_p8  ;;  %p8470_p9 = por %p8469_p7, %p8468_p3 }
 0x34b   : > { %p8471_p1 = pnand %p8470_p9, %p8464_p10 }
 0x34d   : > { %8474 = shalt.err (!%p8471_p1)
}
 0x34e   : > { %7211 = dma.hbm_to_vmem [thread:$0]  (%p10739_p0), %s9612_s3, 16, %s1593_s13, %s9072_s28  }
 0x34f   : > { %s6660_s5 = sshll.u32 %s8623_s23, 9  ;;  %s1603_s19 = scalar_lea.vmem [#allocation40], %s6522_s22 }
 0x350   : > { %s1610_s17 = sshll.u32 %s1603_s19, 4  ;;  %s9655_s15 = scalar_lea.hbm %s8883_s27, %s6660_s5  ;;  %s9657_s17 = int_to_ptr.vmem [resolvable:$true] %s1610_s17 }
 0x351   : > { %s8475_s0 = scalar_lea.hbm %s9655_s15, 512  ;;  %s8479_s16 = scalar_lea.hbm %s8883_s27, 1024 }
 0x352   : > { %p8476_p11 = scmp.ne.s32.totalorder %s9655_s15, %s8475_s0  ;;  %p8480_p5 = scmp.lt.u32.totalorder %s9655_s15, %s8883_s27 }
 0x353   : > { %p8481_p2 = scmp.lt.u32.totalorder %s8479_s16, %s8475_s0  ;;  %p8483_p4 = scmp.lt.u32.totalorder %s8475_s0, %s9655_s15 }
 0x354   : > { %p8477_p12 = pnand %p8476_p11, %p10739_p0 }
 0x355   : > { %p8482_p6 = por %p8481_p2, %p8480_p5 }
 0x356   : > { %p8478_p13 = pneg %p8477_p12 }
 0x357   : > { %p8484_p8 = por %p8483_p4, %p8482_p6 }
 0x359   : > { %p8485_p10 = pnand %p8484_p8, %p8478_p13 }
 0x35b   : > { %8488 = shalt.err (!%p8485_p10)
}
 0x35c   : > { %s8489_s3 = scalar_lea.vmem %s9657_s17, 512  ;;  %s8701_s13 = smov [#allocation40]  }
 0x35d   : > { %p8490_p3 = scmp.ne.s32.totalorder %s9657_s17, %s8489_s3  ;;  %s8493_s22 = sshll.u32 %s8701_s13, 4  ;;  %s8494_s22 = int_to_ptr.vmem [resolvable:$false] %s8493_s22 }
 0x35e   : > { %s8495_s8 = scalar_lea.vmem %s8494_s22, 1024  ;;  %p8496_p1 = scmp.lt.s32.totalorder %s9657_s17, %s8494_s22 }
 0x35f   : > { %p8491_p7 = pnand %p8490_p3, %p10739_p0  ;;  %p8497_p11 = scmp.lt.s32.totalorder %s8495_s8, %s8489_s3 }
 0x361   : > { %p8492_p9 = pneg %p8491_p7  ;;  %p8498_p12 = por %p8497_p11, %p8496_p1 }
 0x363   : > { %p8499_p5 = pnand %p8498_p12, %p8492_p9 }
 0x365   : > { %8502 = shalt.err (!%p8499_p5)
}
 0x366   : > { %7212 = dma.hbm_to_vmem [thread:$0]  (%p10739_p0), %s9655_s15, 512, %s9657_s17, %s9072_s28, %s10740_s1, %s10740_s1, %s10743_s14  }
 0x367   : > { %s9682_s10 = scalar_lea.hbm %s10716_s4, %s9065_s7  ;;  %s1623_s5 = scalar_lea.vmem [#allocation41], %s9062_s11 }
 0x368   : > { %s1630_s19 = sshll.u32 %s1623_s5, 4  ;;  %s8503_s0 = scalar_lea.hbm %s9682_s10, 16  ;;  %s1631_s19 = int_to_ptr.vmem [resolvable:$true] %s1630_s19 }
 0x369   : > { %p8504_p13 = scmp.ne.s32.totalorder %s9682_s10, %s8503_s0  ;;  %s8507_s16 = scalar_lea.hbm %s10716_s4, 32 }
 0x36a   : > { %p8508_p4 = scmp.lt.u32.totalorder %s9682_s10, %s10716_s4  ;;  %p8509_p8 = scmp.lt.u32.totalorder %s8507_s16, %s8503_s0 }
 0x36b   : > { %p8505_p2 = pnand %p8504_p13, %p10739_p0  ;;  %p8511_p3 = scmp.lt.u32.totalorder %s8503_s0, %s9682_s10 }
 0x36c   : > { %p8510_p10 = por %p8509_p8, %p8508_p4 }
 0x36d   : > { %p8506_p6 = pneg %p8505_p2 }
 0x36e   : > { %p8512_p7 = por %p8511_p3, %p8510_p10 }
 0x370   : > { %p8513_p9 = pnand %p8512_p7, %p8506_p6 }
 0x372   : > { %8516 = shalt.err (!%p8513_p9)
}
 0x373   : > { %s8517_s7 = scalar_lea.vmem %s1631_s19, 16  ;;  %s8702_s11 = smov [#allocation41]  }
 0x374   : > { %p8518_p1 = scmp.ne.s32.totalorder %s1631_s19, %s8517_s7  ;;  %s8521_s1 = sshll.u32 %s8702_s11, 4  ;;  %s8522_s1 = int_to_ptr.vmem [resolvable:$false] %s8521_s1 }
 0x375   : > { %s8523_s14 = scalar_lea.vmem %s8522_s1, 32  ;;  %p8524_p5 = scmp.lt.s32.totalorder %s1631_s19, %s8522_s1 }
 0x376   : > { %p8519_p11 = pnand %p8518_p1, %p10739_p0  ;;  %p8525_p13 = scmp.lt.s32.totalorder %s8523_s14, %s8517_s7 }
 0x378   : > { %p8520_p12 = pneg %p8519_p11  ;;  %p8526_p2 = por %p8525_p13, %p8524_p5 }
 0x37a   : > { %p8527_p4 = pnand %p8526_p2, %p8520_p12 }
 0x37c   : > { %8530 = shalt.err (!%p8527_p4)
}
 0x37d   : > { %7213 = dma.hbm_to_vmem [thread:$0]  (%p10739_p0), %s9682_s10, 16, %s1631_s19, %s9072_s28  }
 0x37e PF: > { %p10759_p6 = scmp.ne.s32.totalorder %s10734_s12, 0 }
 0x37f   : > { %s10760_s17 = sld [smem:[#allocation79_spill]] (!%p10759_p6) }
 0x380   : > { %1639 = sbr.rel (%p10759_p6) target bundleno = 6705 (0x1a31), region = 156 }
 0x385   : > { %p10761_p8 = scmp.eq.s32.totalorder (!%p10759_p6), %s10760_s17, 0 }
 0x387   : > { %8582 = dma.done.wait (%p10761_p8), [#allocation4], 256   ;;  %p10762_p10 = pmov %p10761_p8 }
 0x388   : > { %p10763_p3 = pmov %p10761_p8 }
 0x389   : > { %8584 = vsyncadd (%p10762_p10), [#allocation4], 4294967040 }
 0x38a   : > { %8586 = dma.done.wait (%p10763_p3), [#allocation7], 384   ;;  %p10764_p7 = pmov %p10763_p3 }
 0x38b   : > { %p10765_p9 = pmov %p10763_p3 }
 0x38c   : > { %8588 = vsyncadd (%p10764_p7), [#allocation7], 4294966912 }
 0x38d   : > { %8590 = dma.done.wait (%p10765_p9), [#allocation10], 256   ;;  %p10766_p0 = pmov %p10763_p3 }
 0x38f   : > { %8592 = vsyncadd (%p10766_p0), [#allocation10], 4294967040  ;;  %p10767_p1 = pmov %p10766_p0 }
 0x390   : > { %p10768_p11 = pmov %p10766_p0 }
 0x391   : > { %8594 = dma.done.wait (%p10767_p1), [#allocation13], 128  }
 0x392   : > { %8596 = vsyncadd (%p10768_p11), [#allocation13], 4294967168  ;;  %s10769_s12 = sld [smem:[#allocation77_spill]]  ;;  %s10770_s2 = sld [smem:[#allocation81_spill]] }
 0x393   : > { %s1665_s28 = sand.u32 1, %s10760_s17  }
 0x394   : > { %s1666_s3 = scalar_lea.sflag [#allocation4], %s1665_s28 }
 0x398   : > { %s9719_s15 = sand.u32 1, %s10769_s12   ;;  %p10771_p12 = scmp.ne.s32.totalorder %s10770_s2, 0 }
 0x39a   : > { %8598 = dma.done.wait (%p10771_p12), %s1666_s3, 3104  }
 0x39b   : > { %8600 = vsyncadd (%p10771_p12), %s1666_s3, 4294964192  ;;  %s9727_s22 = sshll.u32 %s9719_s15, 4  ;;  %s6542_s8 = sshll.u32 %s9719_s15, 5 }
 0x39c   : > { %s1760_s12 = scalar_lea.vmem [#allocation25], %s9719_s15  ;;  %s1769_s2 = scalar_lea.vmem [#allocation26], %s9727_s22 }
 0x39d   : > { %s1777_s28 = scalar_lea.vmem [#allocation27], %s9719_s15  ;;  %s1785_s3 = scalar_lea.vmem [#allocation28], %s9719_s15 }
 0x39e   : > { %s1793_s19 = scalar_lea.vmem [#allocation29], %s9719_s15  ;;  %s1802_s10 = scalar_lea.vmem [#allocation30], %s9727_s22 }
 0x39f   : > { %s1819_s13 = scalar_lea.vmem [#allocation32], %s9727_s22  ;;  %s9755_s9 = scalar_lea.vmem [#allocation40], %s6542_s8 }
 0x3a0   : > { %s10772_s17 = sld [smem:[#allocation78_spill]] }
 0x3a6   : > { %p6543_p5 = scmp.ne.s32.totalorder %s10772_s17, 0 }
 0x3a7   : > { %v2103_v0 = vld [vmem:[#allocation3] sm:$0xff] (!%p6543_p5)  ;;  %vm2105_vm0 = vcmask (!%p6543_p5), 261120   ;;  %v2104_v1 = vld [vmem:[#allocation3 + $0x8] sm:$0xff] (!%p6543_p5) }
 0x3a8   : > { %2102 = sbr.rel (%p6543_p5) target bundleno = 943 (0x3af), region = 296  ;;  %2106 = vst.msk [vmem:[#allocation2] sm:$0xff] (!%p6543_p5), %vm2105_vm0, %v2103_v0  ;;  %2107 = vst.msk [vmem:[#allocation2 + $0x8] sm:$0xff] (!%p6543_p5), %vm2105_vm0, %v2104_v1 }
 0x3af PF: > { %v9759_v2 = vld [vmem:[#allocation2] sm:$0xff]  ;;  %vm2112_vm1 = vcmask 261120   ;;  %v9761_v3 = vld [vmem:[#allocation2 + $0x8] sm:$0xff]  ;;  %s10773_s8 = scalar_lea.vmem [#allocation16], %s9727_s22  ;;  %v8703_v11 = vmov 0.0   ;;  %vm8704_vm2 = vmmov 0  }
 0x3b0   : > { %v2113_v4 = vsel %vm2112_vm1, %v9759_v2, 0.0  ;;  %v2122_v5 = vmul.f32 %v9759_v2, %v9759_v2  ;;  %v2116_v6 = vsel %vm2112_vm1, %v9761_v3, 0.0  ;;  %v2123_v7 = vmul.f32 %v9761_v3, %v9761_v3  ;;  %v7442_v10 = vld [vmem:[%s10773_s8] sm:$0xff]   ;;  %6802 = vmatprep.subr.bf16.mxu0 %v8703_v11  ;;  %6806 = vmatprep.mubr.msk.bf16.mxu0 %vm8704_vm2, %v8703_v11  ;;  %s10774_s17 = smov %s10773_s8  ;;  %s10775_s8 = scalar_lea.vmem [#allocation14], %s9719_s15 }
 0x3b1   : > { %2114 = vadd.xlane.f32.xlu0 %v2113_v4  ;;  %6803 = vmatpush3.bf16.msra.mxu0 %v7442_v10  ;;  %v7443_v12 = vld [vmem:[%s10774_s17 + $0x8] sm:$0xff]   ;;  %v6544_v30 = vld [vmem:[%s10775_s8] ss:$0 sm:$0xff]  ;;  %s10776_s17 = scalar_lea.vmem [#allocation15], %s9719_s15  ;;  %s10777_s14 = scalar_lea.vmem [#allocation17], %s9719_s15  ;;  %vm2247_vm3 = vcmask 64512  }
 0x3b2   : > { %v2124_v8 = vsel %vm2112_vm1, %v2122_v5, 0.0  ;;  %v2127_v9 = vsel %vm2112_vm1, %v2123_v7, 0.0  ;;  %6810 = vmatprep.subr.bf16.mxu1 %v8703_v11  ;;  %6804 = vmatprep.subr.bf16.mxu0 %v8703_v11  ;;  %v6545_v35 = vld [vmem:[%s10776_s17] ss:$0 sm:$0xff]  ;;  %s8705_s8 = smov 112   ;;  %s8706_s17 = smov 120  }
 0x3b3   : > { %2125 = vadd.xlane.f32.xlu1 %v2124_v8  ;;  %6812 = vmatprep.mubr.msk.bf16.mxu1 %vm8704_vm2, %v8703_v11  ;;  %v6546_v40 = vld [vmem:[%s10777_s14] ss:$0 sm:$0xff]  ;;  %s8707_s14 = smov 104   ;;  %s8708_s1 = smov 96   ;;  %vm2741_vm4 = vcmask 1043456   ;;  %vm3134_vm5 = vcmask 130048  }
 0x3b4   : > { %s8709_s11 = smov 64   ;;  %s8710_s4 = smov 16   ;;  %vm3136_vm6 = vcmask 195584   ;;  %vm5743_vm7 = vcmask 523264  }
 0x3b5   : > { %2117 = vadd.xlane.f32.xlu0 %v2116_v6  ;;  %6805 = vmatpush3.bf16.msra.mxu0 %v7443_v12  ;;  %s10779_s6 = scalar_lea.vmem [#allocation18], %s9727_s22  ;;  %s8712_s7 = smov 24  }
 0x3b6   : > { %6816 = vmatprep.subr.bf16.mxu0 %v8703_v11  ;;  %s10783_s0 = scalar_lea.vmem [#allocation22], %s9727_s22 }
 0x3b7   : > { %2128 = vadd.xlane.f32.xlu1 %v2127_v9  ;;  %v6662_v9 = vld [vmem:[#allocation9] sm:$0xff]   ;;  %s10784_s16 = smov %s10783_s0 }
 0x3b8   : > { %v6663_v10 = vunpack.c.l.bf16 %v6662_v9 }
 0x43e   : > { %v2115_v13 = vpop.xlane.xlu0 %2114 }
 0x43f   : > { %v2120_v14 = vmul.f32 0.03125, %v2115_v13 }
 0x440   : > { %v2126_v15 = vpop.xlane.xlu1 %2125 }
 0x441   : > { %v2132_v16 = vmul.f32 %v2120_v14, %v2120_v14  ;;  %v2130_v17 = vmul.f32 0.03125, %v2126_v15  ;;  %v2136_v27 = vsub.f32 %v9759_v2, %v2120_v14 }
 0x442   : > { %v2118_v18 = vpop.xlane.xlu0 %2117 }
 0x443   : > { %v2134_v19 = vsub.f32 %v2130_v17, %v2132_v16  ;;  %v2121_v20 = vmul.f32 0.03125, %v2118_v18 }
 0x444   : > { %v2129_v21 = vpop.xlane.xlu1 %2128 }
 0x445   : > { %v2138_v22 = vadd.f32 1e-05, %v2134_v19  ;;  %v2133_v23 = vmul.f32 %v2121_v20, %v2121_v20  ;;  %v2131_v24 = vmul.f32 0.03125, %v2129_v21  ;;  %v2137_v31 = vsub.f32 %v9761_v3, %v2121_v20 }
 0x447   : > { %7467 = vrsqrt.f32 %v2138_v22  ;;  %v2135_v25 = vsub.f32 %v2131_v24, %v2133_v23 }
 0x449   : > { %v2139_v26 = vadd.f32 1e-05, %v2135_v25 }
 0x44b   : > { %7469 = vrsqrt.f32 %v2139_v26 }
 0x451   : > { %v7468_v28 = vpop.eup %7467 }
 0x452   : > { %v2142_v29 = vmul.f32 %v7468_v28, %v2136_v27 }
 0x454   : > { %v2150_v34 = vmul.f32 %v6544_v30, %v2142_v29 }
 0x455   : > { %v7470_v32 = vpop.eup %7469 }
 0x456   : > { %v2143_v33 = vmul.f32 %v7470_v32, %v2137_v31  ;;  %v2158_v37 = vadd.f32 %v6545_v35, %v2150_v34 }
 0x458   : > { %v2151_v36 = vmul.f32 %v6544_v30, %v2143_v33  ;;  %v6664_v30 = vunpack.c.h.bf16 %v6662_v9 }
 0x45a   : > { %v2159_v38 = vadd.f32 %v6545_v35, %v2151_v36 }
 0x45c   : > { %v2160_v39 = vpack.c.bf16 %v2159_v38, %v2158_v37 }
 0x45e   : > { %6807 = vmatmul.mubr.msk.bf16.vlgmr.msra.gmra.mrb[0].mxu0 %vm2112_vm1, %v2160_v39 }
 0x45f   : > { %6818 = vmatprep.mubr.msk.bf16.mxu0 %vm8704_vm2, %v8703_v11 }
 0x531   : > { %v2221_v41 = vpop.f32.mrb[0].mxu0 }
 0x532   : > { %v6808_v42 = vpop.f32.mrb[1].mxu0  ;;  %v2222_v44 = vadd.f32 %v6546_v40, %v2221_v41 }
 0x533   : > { %v2224_v43 = vpop.f32.mrb[2].mxu0 }
 0x534   : > { %v2225_v45 = vadd.f32 %v6546_v40, %v2224_v43  ;;  %v6809_v46 = vpop.f32.mrb[3].mxu0 }
 0x536   : > { %v9796_v47 = vpack.c.bf16 %v2225_v45, %v2222_v44 }
 0x538   : > { %2234 = vrot.lane.b32.xlu1 %v9796_v47, %s8705_s8  ;;  %2232 = vrot.lane.b32.xlu0 %v9796_v47, %s8706_s17  ;;  %v9803_v48 = vrot.slane %v9796_v47, 4 }
 0x53c   : > { %2236 = vrot.lane.b32.xlu1 %v9796_v47, %s8707_s14  ;;  %2241 = vrot.lane.b32.xlu0 %v9803_v48, %s8705_s8 }
 0x540   : > { %2245 = vrot.lane.b32.xlu0 %v9796_v47, %s8708_s1  ;;  %2239 = vrot.lane.b32.xlu1 %v9803_v48, %s8706_s17 }
 0x544   : > { %2243 = vrot.lane.b32.xlu1 %v9803_v48, %s8707_s14 }
 0x5aa   : > { %v9815_v49 = vpop.permute.xlu1 %2234  ;;  %v9817_v50 = vpop.permute.xlu0 %2232 }
 0x5ab   : > { %2342 = vrot.lane.b32.xlu0 %v9815_v49, %s8708_s1  ;;  %2294 = vrot.lane.b32.xlu1 %v9817_v50, %s8708_s1 }
 0x5ae   : > { %v9823_v51 = vpop.permute.xlu1 %2236  ;;  %v9825_v52 = vpop.permute.xlu0 %2241 }
 0x5af   : > { %2438 = vrot.lane.b32.xlu0 %v9803_v48, %s8708_s1  ;;  %2390 = vrot.lane.b32.xlu1 %v9823_v51, %s8708_s1 }
 0x5b2   : > { %v2246_v53 = vpop.permute.xlu0 %2245  ;;  %v9831_v54 = vpop.permute.xlu1 %2239 }
 0x5b3   : > { %2534 = vrot.lane.b32.xlu0 %v9825_v52, %s8708_s1  ;;  %2486 = vrot.lane.b32.xlu1 %v9831_v54, %s8708_s1  ;;  %v2252_v55 = vsel %vm2247_vm3, %v2246_v53, 0 }
 0x5b4   : > { %6811 = vmatpush3.bf16.xpose.msra.mxu1 %v2252_v55 }
 0x5b5   : > { %6822 = vmatprep.subr.bf16.mxu1 %v8703_v11 }
 0x5b6   : > { %v9839_v56 = vpop.permute.xlu1 %2243 }
 0x5b7   : > { %2582 = vrot.lane.b32.xlu1 %v9839_v56, %s8708_s1 }
 0x5bb   : > { %6813 = vmatmul.mubr.msk.bf16.vlgmr.msra.gmra.mrb[0].mxu1 %vm2247_vm3, %v9796_v47 }
 0x5bc   : > { %6824 = vmatprep.mubr.msk.bf16.mxu1 %vm8704_vm2, %v8703_v11 }
 0x61d   : > { %v2343_v57 = vpop.permute.xlu0 %2342  ;;  %v2295_v58 = vpop.permute.xlu1 %2294 }
 0x61e   : > { %v2348_v59 = vsel %vm2247_vm3, %v2343_v57, 0  ;;  %v2300_v60 = vsel %vm2247_vm3, %v2295_v58, 0 }
 0x61f   : > { %6817 = vmatpush3.bf16.xpose.msra.mxu0 %v2300_v60  ;;  %6823 = vmatpush3.bf16.xpose.msra.mxu1 %v2348_v59 }
 0x620   : > { %6828 = vmatprep.subr.bf16.mxu0 %v8703_v11  ;;  %6834 = vmatprep.subr.bf16.mxu1 %v8703_v11 }
 0x621   : > { %v2439_v61 = vpop.permute.xlu0 %2438  ;;  %v2391_v62 = vpop.permute.xlu1 %2390 }
 0x622   : > { %v2444_v63 = vsel %vm2247_vm3, %v2439_v61, 0  ;;  %v2396_v0 = vsel %vm2247_vm3, %v2391_v62, 0 }
 0x625   : > { %v2535_v1 = vpop.permute.xlu0 %2534  ;;  %v2487_v4 = vpop.permute.xlu1 %2486 }
 0x626   : > { %6819 = vmatmul.mubr.msk.bf16.vlgmr.msra.gmra.mrb[4].mxu0 %vm2247_vm3, %v9817_v50  ;;  %6825 = vmatmul.mubr.msk.bf16.vlgmr.msra.gmra.mrb[4].mxu1 %vm2247_vm3, %v9815_v49  ;;  %v2540_v5 = vsel %vm2247_vm3, %v2535_v1, 0  ;;  %v2492_v6 = vsel %vm2247_vm3, %v2487_v4, 0 }
 0x627   : > { %6829 = vmatpush3.bf16.xpose.msra.mxu0 %v2396_v0  ;;  %6835 = vmatpush3.bf16.xpose.msra.mxu1 %v2444_v63 }
 0x628   : > { %6830 = vmatprep.mubr.msk.bf16.mxu0 %vm8704_vm2, %v8703_v11  ;;  %6836 = vmatprep.mubr.msk.bf16.mxu1 %vm8704_vm2, %v8703_v11 }
 0x629   : > { %6840 = vmatprep.subr.bf16.mxu0 %v8703_v11  ;;  %6846 = vmatprep.subr.bf16.mxu1 %v8703_v11  ;;  %v2583_v7 = vpop.permute.xlu1 %2582 }
 0x62a   : > { %v2588_v8 = vsel %vm2247_vm3, %v2583_v7, 0 }
 0x62e   : > { %6831 = vmatmul.mubr.msk.bf16.vlgmr.msra.gmra.mrb[8].mxu0 %vm2247_vm3, %v9823_v51  ;;  %6837 = vmatmul.mubr.msk.bf16.vlgmr.msra.gmra.mrb[8].mxu1 %vm2247_vm3, %v9803_v48 }
 0x62f   : > { %6841 = vmatpush3.bf16.xpose.msra.mxu0 %v2492_v6  ;;  %6847 = vmatpush3.bf16.xpose.msra.mxu1 %v2540_v5 }
 0x630   : > { %6842 = vmatprep.mubr.msk.bf16.mxu0 %vm8704_vm2, %v8703_v11  ;;  %6848 = vmatprep.mubr.msk.bf16.mxu1 %vm8704_vm2, %v8703_v11 }
 0x631   : > { %6852 = vmatprep.subr.bf16.mxu0 %v8703_v11  ;;  %6858 = vmatprep.subr.bf16.mxu1 %v8703_v11 }
 0x636   : > { %6843 = vmatmul.mubr.msk.bf16.vlgmr.msra.gmra.mrb[12].mxu0 %vm2247_vm3, %v9831_v54  ;;  %6849 = vmatmul.mubr.msk.bf16.vlgmr.msra.gmra.mrb[12].mxu1 %vm2247_vm3, %v9825_v52 }
 0x637   : > { %6853 = vmatpush3.bf16.xpose.msra.mxu0 %v2588_v8  ;;  %6854 = vmatprep.mubr.msk.bf16.mxu0 %vm8704_vm2, %v8703_v11 }
 0x638   : > { %6864 = vmatprep.subr.bf16.mxu0 %v8703_v11  ;;  %6860 = vmatprep.mubr.msk.bf16.mxu1 %vm8704_vm2, %v8703_v11 }
 0x63e   : > { %6855 = vmatmul.mubr.msk.bf16.vlgmr.msra.gmra.mrb[16].mxu0 %vm2247_vm3, %v9839_v56 }
 0x63f   : > { %6866 = vmatprep.mubr.msk.bf16.mxu0 %vm8704_vm2, %v8703_v11 }
 0x68e   : > { %v2288_v12 = vpop.f32.mrb[0].mxu1 }
 0x68f   : > { %v2632_v13 = vadd.f32 %v6663_v10, %v2288_v12  ;;  %v6814_v14 = vpop.f32.mrb[1].mxu1 }
 0x690   : > { %v2291_v15 = vpop.f32.mrb[2].mxu1 }
 0x691   : > { %v6815_v16 = vpop.f32.mrb[3].mxu1  ;;  %v2640_v17 = vsel %vm2247_vm3, %v2632_v13, -inf }
 0x692   : > { %2641 = vmax.xlane.f32.xlu0 %v2640_v17 }
 0x6f9   : > { %v2336_v18 = vpop.f32.mrb[4].mxu0  ;;  %v2384_v19 = vpop.f32.mrb[4].mxu1 }
 0x6fa   : > { %v9890_v20 = vadd.f32 %v6663_v10, %v2336_v18  ;;  %v9892_v21 = vadd.f32 %v6663_v10, %v2384_v19  ;;  %v6820_v22 = vpop.f32.mrb[5].mxu0  ;;  %v6826_v23 = vpop.f32.mrb[5].mxu1 }
 0x6fb   : > { %v2339_v24 = vpop.f32.mrb[6].mxu0  ;;  %v2387_v25 = vpop.f32.mrb[6].mxu1 }
 0x6fc   : > { %v6821_v26 = vpop.f32.mrb[7].mxu0  ;;  %v6827_v27 = vpop.f32.mrb[7].mxu1  ;;  %v2646_v28 = vsel %vm2247_vm3, %v9892_v21, -inf  ;;  %v2643_v29 = vsel %vm2247_vm3, %v9890_v20, -inf }
 0x6fd   : > { %2647 = vmax.xlane.f32.xlu0 %v2646_v28  ;;  %2644 = vmax.xlane.f32.xlu1 %v2643_v29 }
 0x701   : > { %v2432_v31 = vpop.f32.mrb[8].mxu0  ;;  %v2480_v32 = vpop.f32.mrb[8].mxu1 }
 0x702   : > { %v9898_v33 = vadd.f32 %v6663_v10, %v2432_v31  ;;  %v6832_v34 = vpop.f32.mrb[9].mxu0  ;;  %v6838_v35 = vpop.f32.mrb[9].mxu1  ;;  %v9900_v38 = vadd.f32 %v6664_v30, %v2480_v32 }
 0x703   : > { %v2435_v36 = vpop.f32.mrb[10].mxu0  ;;  %v2483_v37 = vpop.f32.mrb[10].mxu1 }
 0x704   : > { %v6833_v39 = vpop.f32.mrb[11].mxu0  ;;  %v6839_v40 = vpop.f32.mrb[11].mxu1  ;;  %v2649_v41 = vsel %vm2247_vm3, %v9898_v33, -inf  ;;  %v2652_v42 = vsel %vm2247_vm3, %v9900_v38, -inf }
 0x705   : > { %2650 = vmax.xlane.f32.xlu0 %v2649_v41 }
 0x709   : > { %v2576_v43 = vpop.f32.mrb[12].mxu1  ;;  %2653 = vmax.xlane.f32.xlu0 %v2652_v42  ;;  %v2528_v44 = vpop.f32.mrb[12].mxu0 }
 0x70a   : > { %v9906_v45 = vadd.f32 %v6664_v30, %v2576_v43  ;;  %v9908_v46 = vadd.f32 %v6664_v30, %v2528_v44  ;;  %v6844_v53 = vpop.f32.mrb[13].mxu0  ;;  %v6850_v55 = vpop.f32.mrb[13].mxu1 }
 0x70b   : > { %v2531_v57 = vpop.f32.mrb[14].mxu0  ;;  %v2579_v58 = vpop.f32.mrb[14].mxu1 }
 0x70c   : > { %v6845_v59 = vpop.f32.mrb[15].mxu0  ;;  %v6851_v60 = vpop.f32.mrb[15].mxu1  ;;  %v2658_v61 = vsel %vm2247_vm3, %v9906_v45, -inf  ;;  %v2655_v62 = vsel %vm2247_vm3, %v9908_v46, -inf }
 0x70d   : > { %2659 = vmax.xlane.f32.xlu0 %v2658_v61  ;;  %2656 = vmax.xlane.f32.xlu1 %v2655_v62 }
 0x711   : > { %v2624_v63 = vpop.f32.mrb[16].mxu0 }
 0x712   : > { %v6856_v0 = vpop.f32.mrb[17].mxu0  ;;  %v9922_v9 = vadd.f32 %v6664_v30, %v2624_v63 }
 0x713   : > { %v2627_v1 = vpop.f32.mrb[18].mxu0 }
 0x714   : > { %v6857_v4 = vpop.f32.mrb[19].mxu0 }
 0x71e   : > { %2785 = vrot.lane.b32.xlu1 %v9817_v50, %s8709_s11  ;;  %v2661_v50 = vsel %vm2247_vm3, %v9922_v9, -inf }
 0x71f   : > { %v2642_v5 = vpop.xlane.xlu0 %2641 }
 0x720   : > { %v2664_v6 = vsub.f32 %v2632_v13, %v2642_v5 }
 0x722   : > { %2833 = vrot.lane.b32.xlu1 %v9815_v49, %s8709_s11  ;;  %v2672_v7 = vmul.f32 1.442695, %v2664_v6 }
 0x723   : > { %2736 = vrot.lane.b32.xlu0 %v9796_v47, %s8709_s11 }
 0x724   : > { %7471 = vpow2.f32 %v2672_v7 }
 0x72e   : > { %v9920_v8 = vpop.eup %7471 }
 0x72f   : > { %v2688_v10 = vsel %vm2247_vm3, %v9920_v8, 0.0 }
 0x742   : > { %2689 = vadd.xlane.f32.xlu0 %v2688_v10 }
 0x746   : > { %2662 = vmax.xlane.f32.xlu1 %v2661_v50 }
 0x757   : > { %2881 = vrot.lane.b32.xlu1 %v9823_v51, %s8709_s11 }
 0x78a   : > { %v2648_v47 = vpop.xlane.xlu0 %2647  ;;  %v2645_v49 = vpop.xlane.xlu1 %2644 }
 0x78b   : > { %v2666_v12 = vsub.f32 %v9892_v21, %v2648_v47  ;;  %v2665_v13 = vsub.f32 %v9890_v20, %v2645_v49 }
 0x78d   : > { %v2676_v14 = vmul.f32 1.442695, %v2666_v12  ;;  %v2674_v15 = vmul.f32 1.442695, %v2665_v13 }
 0x78f   : > { %7473 = vpow2.f32 %v2676_v14 }
 0x790   : > { %7475 = vpow2.f32 %v2674_v15 }
 0x792   : > { %v2651_v16 = vpop.xlane.xlu0 %2650 }
 0x793   : > { %v2667_v28 = vsub.f32 %v9898_v33, %v2651_v16 }
 0x795   : > { %v2678_v31 = vmul.f32 1.442695, %v2667_v28 }
 0x796   : > { %v2654_v17 = vpop.xlane.xlu0 %2653 }
 0x797   : > { %v2668_v27 = vsub.f32 %v9900_v38, %v2654_v17 }
 0x799   : > { %v9932_v18 = vpop.eup %7473  ;;  %v2680_v29 = vmul.f32 1.442695, %v2668_v27 }
 0x79a   : > { %v9934_v19 = vpop.eup %7475  ;;  %v2660_v22 = vpop.xlane.xlu0 %2659  ;;  %v2694_v51 = vsel %vm2247_vm3, %v9932_v18, 0.0 }
 0x79b   : > { %v2657_v23 = vpop.xlane.xlu1 %2656  ;;  %2695 = vadd.xlane.f32.xlu0 %v2694_v51  ;;  %v2691_v21 = vsel %vm2247_vm3, %v9934_v19, 0.0  ;;  %v2670_v30 = vsub.f32 %v9906_v45, %v2660_v22  ;;  %7477 = vpow2.f32 %v2680_v29 }
 0x79c   : > { %2692 = vadd.xlane.f32.xlu1 %v2691_v21  ;;  %v2669_v32 = vsub.f32 %v9908_v46, %v2657_v23  ;;  %7479 = vpow2.f32 %v2678_v31 }
 0x79d   : > { %v2684_v34 = vmul.f32 1.442695, %v2670_v30 }
 0x79e   : > { %v2737_v20 = vpop.permute.xlu0 %2736  ;;  %v2682_v35 = vmul.f32 1.442695, %v2669_v32 }
 0x79f   : > { %v2786_v24 = vpop.permute.xlu1 %2785  ;;  %v2743_v25 = vsel %vm2741_vm4, %v2737_v20, 0  ;;  %7481 = vpow2.f32 %v2684_v34 }
 0x7a0   : > { %v2791_v26 = vsel %vm2741_vm4, %v2786_v24, 0  ;;  %6859 = vmatpush3.bf16.msra.mxu1 %v2743_v25  ;;  %7483 = vpow2.f32 %v2682_v35 }
 0x7a1   : > { %6865 = vmatpush3.bf16.msra.mxu0 %v2791_v26  ;;  %6870 = vmatprep.subr.bf16.mxu1 %v8703_v11 }
 0x7a2   : > { %6876 = vmatprep.subr.bf16.mxu0 %v8703_v11 }
 0x7ad   : > { %2977 = vrot.lane.b32.xlu1 %v9831_v54, %s8709_s11  ;;  %v9952_v54 = vpop.eup %7477 }
 0x7ae   : > { %v9954_v36 = vpop.eup %7479  ;;  %v2700_v33 = vsel %vm2247_vm3, %v9952_v54, 0.0 }
 0x7af   : > { %v9958_v38 = vpop.eup %7481  ;;  %v2697_v39 = vsel %vm2247_vm3, %v9954_v36, 0.0 }
 0x7b0   : > { %v9962_v40 = vpop.eup %7483  ;;  %v2706_v42 = vsel %vm2247_vm3, %v9958_v38, 0.0 }
 0x7b1   : > { %2929 = vrot.lane.b32.xlu0 %v9803_v48, %s8709_s11  ;;  %v2834_v48 = vpop.permute.xlu1 %2833  ;;  %v2703_v44 = vsel %vm2247_vm3, %v9962_v40, 0.0 }
 0x7b2   : > { %v2839_v57 = vsel %vm2741_vm4, %v2834_v48, 0 }
 0x7cf   : > { %v2690_v37 = vpop.xlane.xlu0 %2689 }
 0x7d0   : > { %7485 = vrcp.f32 %v2690_v37  ;;  %2701 = vadd.xlane.f32.xlu0 %v2700_v33 }
 0x7d1   : > { %2698 = vadd.xlane.f32.xlu1 %v2697_v39 }
 0x7d3   : > { %v2663_v41 = vpop.xlane.xlu1 %2662 }
 0x7d4   : > { %v2671_v43 = vsub.f32 %v9922_v9, %v2663_v41  ;;  %2707 = vadd.xlane.f32.xlu0 %v2706_v42 }
 0x7d5   : > { %2704 = vadd.xlane.f32.xlu1 %v2703_v44 }
 0x7d6   : > { %v2686_v45 = vmul.f32 1.442695, %v2671_v43 }
 0x7d7   : > { %v2882_v60 = vpop.permute.xlu1 %2881 }
 0x7d8   : > { %7487 = vpow2.f32 %v2686_v45 }
 0x7da   : > { %v7486_v46 = vpop.eup %7485 }
 0x7db   : > { %v2720_v53 = vmul.f32 %v7486_v46, %v9920_v8 }
 0x7dd   : > { %v2728_v55 = vpack.c.bf16 %v2720_v53, %v2720_v53 }
 0x7df   : > { %6861 = vmatmul.mubr.msk.bf16.vlgmr.msra.gmra.mrb[16].mxu1 %vm2247_vm3, %v2728_v55 }
 0x7e0   : > { %6871 = vmatpush3.bf16.msra.mxu1 %v2839_v57  ;;  %6872 = vmatprep.mubr.msk.bf16.mxu1 %vm8704_vm2, %v8703_v11 }
 0x7e1   : > { %6882 = vmatprep.subr.bf16.mxu1 %v8703_v11 }
 0x7e2   : > { %v9975_v58 = vpop.eup %7487 }
 0x7e3   : > { %v2709_v59 = vsel %vm2247_vm3, %v9975_v58, 0.0 }
 0x7e4   : > { %2710 = vadd.xlane.f32.xlu1 %v2709_v59 }
 0x7ea   : > { %3025 = vrot.lane.b32.xlu0 %v9825_v52, %s8709_s11  ;;  %v2887_v52 = vsel %vm2741_vm4, %v2882_v60, 0 }
 0x7f5   : > { %3073 = vrot.lane.b32.xlu1 %v9839_v56, %s8709_s11  ;;  %s10778_s11 = scalar_lea.vmem [#allocation18], %s9727_s22 }
 0x7f6   : > { %v7444_v44 = vld [vmem:[%s10778_s11] sm:$0xff]   ;;  %s8711_s11 = smov 8  }
 0x828   : > { %v2696_v61 = vpop.xlane.xlu0 %2695 }
 0x829   : > { %7489 = vrcp.f32 %v2696_v61  ;;  %v2693_v62 = vpop.xlane.xlu1 %2692 }
 0x82a   : > { %7491 = vrcp.f32 %v2693_v62 }
 0x82c   : > { %v2930_v4 = vpop.permute.xlu0 %2929 }
 0x82d   : > { %v2935_v8 = vsel %vm2741_vm4, %v2930_v4, 0  ;;  %v2978_v56 = vpop.permute.xlu1 %2977 }
 0x82e   : > { %v2983_v23 = vsel %vm2741_vm4, %v2978_v56, 0 }
 0x833   : > { %v7490_v63 = vpop.eup %7489 }
 0x834   : > { %v7492_v0 = vpop.eup %7491  ;;  %v2722_v1 = vmul.f32 %v7490_v63, %v9932_v18 }
 0x835   : > { %v2721_v5 = vmul.f32 %v7492_v0, %v9934_v19 }
 0x836   : > { %v2730_v6 = vpack.c.bf16 %v2722_v1, %v2722_v1 }
 0x837   : > { %v2729_v7 = vpack.c.bf16 %v2721_v5, %v2721_v5 }
 0x838   : > { %6873 = vmatmul.mubr.msk.bf16.vlgmr.msra.gmra.mrb[20].mxu1 %vm2247_vm3, %v2730_v6  ;;  %v7445_v6 = vld [vmem:[%s10779_s6 + $0x8] sm:$0xff]   ;;  %s10780_s6 = scalar_lea.vmem [#allocation19], %s9719_s15 }
 0x839   : > { %6867 = vmatmul.mubr.msk.bf16.vlgmr.msra.gmra.mrb[20].mxu0 %vm2247_vm3, %v2729_v7  ;;  %6883 = vmatpush3.bf16.msra.mxu1 %v2935_v8 }
 0x83a   : > { %6877 = vmatpush3.bf16.msra.mxu0 %v2887_v52  ;;  %6878 = vmatprep.mubr.msk.bf16.mxu0 %vm8704_vm2, %v8703_v11 }
 0x83b   : > { %6884 = vmatprep.mubr.msk.bf16.mxu1 %vm8704_vm2, %v8703_v11  ;;  %6888 = vmatprep.subr.bf16.mxu0 %v8703_v11 }
 0x83c   : > { %6894 = vmatprep.subr.bf16.mxu1 %v8703_v11 }
 0x85d   : > { %v2702_v9 = vpop.xlane.xlu0 %2701 }
 0x85e   : > { %7493 = vrcp.f32 %v2702_v9  ;;  %v2699_v10 = vpop.xlane.xlu1 %2698 }
 0x85f   : > { %7495 = vrcp.f32 %v2699_v10 }
 0x861   : > { %v2708_v50 = vpop.xlane.xlu0 %2707 }
 0x862   : > { %7497 = vrcp.f32 %v2708_v50  ;;  %v2705_v47 = vpop.xlane.xlu1 %2704 }
 0x863   : > { %7499 = vrcp.f32 %v2705_v47 }
 0x865   : > { %v3026_v15 = vpop.permute.xlu0 %3025 }
 0x866   : > { %v3031_v22 = vsel %vm2741_vm4, %v3026_v15, 0 }
 0x868   : > { %v7494_v49 = vpop.eup %7493 }
 0x869   : > { %v7496_v12 = vpop.eup %7495  ;;  %v2724_v13 = vmul.f32 %v7494_v49, %v9952_v54 }
 0x86a   : > { %v2723_v14 = vmul.f32 %v7496_v12, %v9954_v36 }
 0x86b   : > { %v2732_v16 = vpack.c.bf16 %v2724_v13, %v2724_v13 }
 0x86c   : > { %v7498_v17 = vpop.eup %7497  ;;  %v2731_v18 = vpack.c.bf16 %v2723_v14, %v2723_v14 }
 0x86d   : > { %v7500_v19 = vpop.eup %7499  ;;  %6885 = vmatmul.mubr.msk.bf16.vlgmr.msra.gmra.mrb[24].mxu1 %vm2247_vm3, %v2732_v16  ;;  %v2726_v51 = vmul.f32 %v7498_v17, %v9958_v38 }
 0x86e   : > { %6879 = vmatmul.mubr.msk.bf16.vlgmr.msra.gmra.mrb[24].mxu0 %vm2247_vm3, %v2731_v18  ;;  %6895 = vmatpush3.bf16.msra.mxu1 %v3031_v22  ;;  %v2725_v21 = vmul.f32 %v7500_v19, %v9962_v40 }
 0x86f   : > { %6889 = vmatpush3.bf16.msra.mxu0 %v2983_v23  ;;  %6890 = vmatprep.mubr.msk.bf16.mxu0 %vm8704_vm2, %v8703_v11  ;;  %v2734_v24 = vpack.c.bf16 %v2726_v51, %v2726_v51 }
 0x870   : > { %6896 = vmatprep.mubr.msk.bf16.mxu1 %vm8704_vm2, %v8703_v11  ;;  %6900 = vmatprep.subr.bf16.mxu0 %v8703_v11  ;;  %v2733_v25 = vpack.c.bf16 %v2725_v21, %v2725_v21 }
 0x871   : > { %v2711_v20 = vpop.xlane.xlu1 %2710  ;;  %6906 = vmatprep.subr.bf16.mxu1 %v8703_v11 }
 0x872   : > { %7501 = vrcp.f32 %v2711_v20 }
 0x875   : > { %6897 = vmatmul.mubr.msk.bf16.vlgmr.msra.gmra.mrb[28].mxu1 %vm2247_vm3, %v2734_v24  ;;  %v3074_v26 = vpop.permute.xlu1 %3073  ;;  %v6569_v24 = vld [vmem:[%s10780_s6] ss:$0 sm:$0xff]  ;;  %s10781_s6 = scalar_lea.vmem [#allocation24], %s9727_s22 }
 0x876   : > { %6891 = vmatmul.mubr.msk.bf16.vlgmr.msra.gmra.mrb[28].mxu0 %vm2247_vm3, %v2733_v25  ;;  %v3079_v27 = vsel %vm2741_vm4, %v3074_v26, 0  ;;  %6910 = vmatprep.mubr.msk.bf16.mxu1 %vm8704_vm2, %v8703_v11  ;;  %s10782_s5 = smov %s10781_s6 }
 0x877   : > { %6901 = vmatpush3.bf16.msra.mxu0 %v3079_v27  ;;  %6902 = vmatprep.mubr.msk.bf16.mxu0 %vm8704_vm2, %v8703_v11 }
 0x878   : > { %6914 = vmatprep.subr.bf16.mxu0 %v8703_v11  ;;  %6907 = vmatpush3.bf16.msra.mxu1 %v7444_v44 }
 0x879   : > { %6908 = vmatprep.subr.bf16.mxu1 %v8703_v11 }
 0x87c   : > { %v7502_v28 = vpop.eup %7501  ;;  %6909 = vmatpush3.bf16.msra.mxu1 %v7445_v6 }
 0x87d   : > { %v2727_v29 = vmul.f32 %v7502_v28, %v9975_v58  ;;  %6922 = vmatprep.subr.bf16.mxu1 %v8703_v11 }
 0x87f   : > { %v2735_v30 = vpack.c.bf16 %v2727_v29, %v2727_v29 }
 0x881   : > { %6903 = vmatmul.mubr.msk.bf16.vlgmr.msra.gmra.mrb[32].mxu0 %vm2247_vm3, %v2735_v30 }
 0x882   : > { %6918 = vmatprep.mubr.msk.bf16.mxu0 %vm8704_vm2, %v8703_v11 }
 0x8b2   : > { %v2779_v31 = vpop.f32.mrb[16].mxu1 }
 0x8b3   : > { %v6862_v32 = vpop.f32.mrb[17].mxu1 }
 0x8b4   : > { %v2782_v34 = vpop.f32.mrb[18].mxu1 }
 0x8b5   : > { %v6863_v35 = vpop.f32.mrb[19].mxu1 }
 0x90b   : > { %v2875_v54 = vpop.f32.mrb[20].mxu1 }
 0x90c   : > { %v2827_v36 = vpop.f32.mrb[20].mxu0  ;;  %v6874_v48 = vpop.f32.mrb[21].mxu1 }
 0x90d   : > { %v6868_v37 = vpop.f32.mrb[21].mxu0  ;;  %v2878_v33 = vpop.f32.mrb[22].mxu1  ;;  %v7447_v48 = vld [vmem:[%s10782_s5 + $0x8] sm:$0xff]   ;;  %s10785_s5 = scalar_lea.vmem [#allocation20], %s9719_s15 }
 0x90e   : > { %v2830_v38 = vpop.f32.mrb[22].mxu0  ;;  %v6875_v39 = vpop.f32.mrb[23].mxu1  ;;  %v7448_v37 = vld [vmem:[#allocation6] sm:$0xff]  }
 0x90f   : > { %v6869_v40 = vpop.f32.mrb[23].mxu0  ;;  %v7449_v33 = vld [vmem:[%s10783_s0] sm:$0xff]   ;;  %s10786_s0 = scalar_lea.vmem [#allocation21], %s9719_s15 }
 0x910   : > { %6915 = vmatpush3.bf16.msra.mxu0 %v7449_v33  ;;  %v7450_v38 = vld [vmem:[%s10784_s16 + $0x8] sm:$0xff]   ;;  %s10787_s16 = scalar_lea.vmem [#allocation23], %s9719_s15 }
 0x911   : > { %6916 = vmatprep.subr.bf16.mxu0 %v8703_v11 }
 0x914   : > { %6917 = vmatpush3.bf16.msra.mxu0 %v7450_v38 }
 0x915   : > { %6930 = vmatprep.subr.bf16.mxu0 %v8703_v11 }
 0x940   : > { %v2971_v41 = vpop.f32.mrb[24].mxu1 }
 0x941   : > { %v2923_v42 = vpop.f32.mrb[24].mxu0  ;;  %v6886_v43 = vpop.f32.mrb[25].mxu1 }
 0x942   : > { %v6880_v45 = vpop.f32.mrb[25].mxu0  ;;  %v2974_v46 = vpop.f32.mrb[26].mxu1 }
 0x943   : > { %v2926_v53 = vpop.f32.mrb[26].mxu0  ;;  %v6887_v55 = vpop.f32.mrb[27].mxu1 }
 0x944   : > { %v6881_v57 = vpop.f32.mrb[27].mxu0 }
 0x948   : > { %v3067_v58 = vpop.f32.mrb[28].mxu1 }
 0x949   : > { %v3019_v59 = vpop.f32.mrb[28].mxu0  ;;  %v7402_v60 = vpack.i.bf16 %v3067_v58, %v2875_v54  ;;  %v6898_v61 = vpop.f32.mrb[29].mxu1 }
 0x94a   : > { %v7397_v62 = vpack.i.bf16 %v3019_v59, %v2827_v36  ;;  %v6892_v63 = vpop.f32.mrb[29].mxu0  ;;  %v3070_v0 = vpop.f32.mrb[30].mxu1  ;;  %v7446_v36 = vld [vmem:[%s10781_s6] sm:$0xff]  }
 0x94b   : > { %v3022_v1 = vpop.f32.mrb[30].mxu0  ;;  %v6899_v4 = vpop.f32.mrb[31].mxu1  ;;  %7403 = vrot.lane.b32.xlu1 %v7402_v60, %s8710_s4  ;;  %v6570_v0 = vld [vmem:[%s10785_s5] ss:$0 sm:$0xff] }
 0x94c   : > { %7398 = vrot.lane.b32.xlu0 %v7397_v62, %s8711_s11  ;;  %v6893_v5 = vpop.f32.mrb[31].mxu0 }
 0x954   : > { %v3115_v7 = vpop.f32.mrb[32].mxu0 }
 0x955   : > { %v7407_v8 = vpack.i.bf16 %v3115_v7, %v2923_v42  ;;  %v6904_v52 = vpop.f32.mrb[33].mxu0  ;;  %v6571_v7 = vld [vmem:[%s10786_s0] ss:$0 sm:$0xff] }
 0x956   : > { %v3118_v56 = vpop.f32.mrb[34].mxu0 }
 0x957   : > { %7408 = vrot.lane.b32.xlu0 %v7407_v8, %s8712_s7  ;;  %v6905_v9 = vpop.f32.mrb[35].mxu0 }
 0x9bd   : > { %v7404_v50 = vpop.permute.xlu1 %7403 }
 0x9be   : > { %v7399_v10 = vpop.permute.xlu0 %7398  ;;  %v7406_v12 = vunpack.i.h.bf16 %v7404_v50  ;;  %v7405_v13 = vunpack.i.l.bf16 %v7404_v50 }
 0x9bf   : > { %v7401_v47 = vunpack.i.h.bf16 %v7399_v10  ;;  %v7400_v49 = vunpack.i.l.bf16 %v7399_v10  ;;  %v6576_v10 = vld [vmem:[%s1760_s12] ss:$0 sm:$0xff] }
 0x9c1   : > { %v3150_v14 = vsel %vm2247_vm3, %v2971_v41, %v7401_v47  ;;  %v3133_v15 = vsel %vm2247_vm3, %v2779_v31, %v7400_v49 }
 0x9c2   : > { %v3135_v19 = vsel %vm3134_vm5, %v3133_v15, %v7405_v13  ;;  %v3151_v22 = vsel %vm3134_vm5, %v3150_v14, %v7406_v12 }
 0x9c9   : > { %v7409_v16 = vpop.permute.xlu0 %7408 }
 0x9ca   : > { %v7411_v17 = vunpack.i.h.bf16 %v7409_v16  ;;  %v7410_v18 = vunpack.i.l.bf16 %v7409_v16 }
 0x9cc   : > { %v3152_v23 = vsel %vm3136_vm6, %v3151_v22, %v7411_v17  ;;  %v3137_v51 = vsel %vm3136_vm6, %v3135_v19, %v7410_v18  ;;  %v6572_v19 = vld [vmem:[%s10787_s16] ss:$0 sm:$0xff] }
 0x9cd   : > { %v3153_v21 = vpack.c.bf16 %v3152_v23, %v3137_v51 }
 0x9cf   : > { %6911 = vmatmul.mubr.msk.bf16.vlgmr.msra.gmra.mrb[32].mxu1 %vm2112_vm1, %v3153_v21 }
 0x9d0   : > { %6926 = vmatprep.mubr.msk.bf16.mxu1 %vm8704_vm2, %v8703_v11  ;;  %6923 = vmatpush3.bf16.msra.mxu1 %v7446_v36 }
 0x9d1   : > { %6924 = vmatprep.subr.bf16.mxu1 %v8703_v11 }
 0x9d4   : > { %6925 = vmatpush3.bf16.msra.mxu1 %v7447_v48 }
 0x9d5   : > { %6936 = vmatprep.subr.bf16.mxu1 %v8703_v11 }
 0x9d7   : > { %6927 = vmatmul.mubr.msk.bf16.vlgmr.msra.gmra.mrb[36].mxu1 %vm2112_vm1, %v7448_v37 }
 0x9d8   : > { %6938 = vmatprep.mubr.msk.bf16.mxu1 %vm8704_vm2, %v8703_v11 }
 0xaa2   : > { %v3207_v20 = vpop.f32.mrb[32].mxu1 }
 0xaa3   : > { %v3214_v25 = vadd.f32 %v3207_v20, %v9759_v2  ;;  %v6912_v26 = vpop.f32.mrb[33].mxu1 }
 0xaa4   : > { %v3210_v27 = vpop.f32.mrb[34].mxu1 }
 0xaa5   : > { %v10042_v28 = vadd.f32 %v6569_v24, %v3214_v25  ;;  %v3215_v29 = vadd.f32 %v3210_v27, %v9761_v3  ;;  %v6913_v30 = vpop.f32.mrb[35].mxu1 }
 0xaa7   : > { %v10045_v31 = vadd.f32 %v6569_v24, %v3215_v29  ;;  %v3246_v32 = vsel %vm2112_vm1, %v10042_v28, 0.0  ;;  %v3254_v2 = vmul.f32 %v10042_v28, %v10042_v28 }
 0xaa8   : > { %3247 = vadd.xlane.f32.xlu1 %v3246_v32 }
 0xaa9   : > { %v3249_v34 = vsel %vm2112_vm1, %v10045_v31, 0.0  ;;  %v3256_v35 = vsel %vm2112_vm1, %v3254_v2, 0.0  ;;  %v3255_v3 = vmul.f32 %v10045_v31, %v10045_v31 }
 0xaaa   : > { %3250 = vadd.xlane.f32.xlu0 %v3249_v34  ;;  %v3415_v50 = vpop.f32.mrb[36].mxu1 }
 0xaab   : > { %v3259_v54 = vsel %vm2112_vm1, %v3255_v3, 0.0  ;;  %v3416_v47 = vadd.f32 %v6576_v10, %v3415_v50  ;;  %v6928_v49 = vpop.f32.mrb[37].mxu1 }
 0xaac   : > { %v3418_v12 = vpop.f32.mrb[38].mxu1 }
 0xaad   : > { %v3419_v13 = vadd.f32 %v6576_v10, %v3418_v12  ;;  %v6929_v14 = vpop.f32.mrb[39].mxu1 }
 0xaae   : > { %3257 = vadd.xlane.f32.xlu0 %v3256_v35 }
 0xaaf   : > { %v3437_v15 = vpack.c.bf16 %v3419_v13, %v3416_v47 }
 0xab1   : > { %v3456_v16 = vsel %vm2247_vm3, %v3437_v15, 0  ;;  %v10102_v29 = vrot.slane %v3437_v15, 4 }
 0xab2   : > { %3260 = vadd.xlane.f32.xlu0 %v3259_v54 }
 0xab3   : > { %v3640_v54 = vsel %vm2247_vm3, %v10102_v29, 0 }
 0xab9   : > { %3439 = vrot.lane.b32.xlu1 %v3437_v15, %s8706_s17 }
 0xabd   : > { %3443 = vrot.lane.b32.xlu1 %v3437_v15, %s8707_s14 }
 0xac8   : > { %3441 = vrot.lane.b32.xlu0 %v3437_v15, %s8705_s8 }
 0xb35   : > { %v3248_v39 = vpop.xlane.xlu1 %3247 }
 0xb36   : > { %v3252_v41 = vmul.f32 0.03125, %v3248_v39 }
 0xb37   : > { %v3251_v40 = vpop.xlane.xlu0 %3250 }
 0xb38   : > { %v3264_v43 = vmul.f32 %v3252_v41, %v3252_v41  ;;  %v3253_v44 = vmul.f32 0.03125, %v3251_v40  ;;  %v3268_v61 = vsub.f32 %v10042_v28, %v3252_v41 }
 0xb39   : > { %v10088_v17 = vpop.permute.xlu1 %3439 }
 0xb3a   : > { %v3265_v55 = vmul.f32 %v3253_v44, %v3253_v44  ;;  %v3269_v1 = vsub.f32 %v10045_v31, %v3253_v44  ;;  %v3502_v18 = vsel %vm2247_vm3, %v10088_v17, 0 }
 0xb3b   : > { %v3258_v42 = vpop.xlane.xlu0 %3257  ;;  %6937 = vmatpush3.bf16.xpose.msra.mxu1 %v3502_v18 }
 0xb3c   : > { %v3262_v45 = vmul.f32 0.03125, %v3258_v42  ;;  %6948 = vmatprep.subr.bf16.mxu1 %v8703_v11 }
 0xb3d   : > { %v10118_v32 = vpop.permute.xlu1 %3443 }
 0xb3e   : > { %v3266_v46 = vsub.f32 %v3262_v45, %v3264_v43  ;;  %v3594_v2 = vsel %vm2247_vm3, %v10118_v32, 0  ;;  %v6666_v45 = vld [vmem:[#allocation11] sm:$0xff]  }
 0xb3f   : > { %v3261_v53 = vpop.xlane.xlu0 %3260  ;;  %v6668_v47 = vunpack.c.h.bf16 %v6666_v45 }
 0xb40   : > { %v3270_v57 = vadd.f32 1e-05, %v3266_v46  ;;  %v3263_v58 = vmul.f32 0.03125, %v3261_v53  ;;  %v6667_v46 = vunpack.c.l.bf16 %v6666_v45 }
 0xb42   : > { %7503 = vrsqrt.f32 %v3270_v57  ;;  %v3267_v59 = vsub.f32 %v3263_v58, %v3265_v55 }
 0xb43   : > { %v10095_v25 = vpop.permute.xlu0 %3441 }
 0xb44   : > { %v3271_v60 = vadd.f32 1e-05, %v3267_v59  ;;  %v3548_v27 = vsel %vm2247_vm3, %v10095_v25, 0 }
 0xb46   : > { %7505 = vrsqrt.f32 %v3271_v60 }
 0xb4c   : > { %v7504_v62 = vpop.eup %7503 }
 0xb4d   : > { %v3274_v63 = vmul.f32 %v7504_v62, %v3268_v61 }
 0xb4f   : > { %v3282_v6 = vmul.f32 %v6570_v0, %v3274_v63 }
 0xb50   : > { %v7506_v4 = vpop.eup %7505 }
 0xb51   : > { %v3275_v5 = vmul.f32 %v7506_v4, %v3269_v1  ;;  %v3290_v52 = vadd.f32 %v6571_v7, %v3282_v6 }
 0xb53   : > { %v3283_v8 = vmul.f32 %v6570_v0, %v3275_v5 }
 0xb55   : > { %v3291_v56 = vadd.f32 %v6571_v7, %v3283_v8 }
 0xb57   : > { %v3292_v9 = vpack.c.bf16 %v3291_v56, %v3290_v52 }
 0xb59   : > { %6919 = vmatmul.mubr.msk.bf16.vlgmr.msra.gmra.mrb[36].mxu0 %vm2112_vm1, %v3292_v9 }
 0xb5a   : > { %6932 = vmatprep.mubr.msk.bf16.mxu0 %vm8704_vm2, %v8703_v11  ;;  %6931 = vmatpush3.bf16.xpose.msra.mxu0 %v3456_v16 }
 0xb5b   : > { %6942 = vmatprep.subr.bf16.mxu0 %v8703_v11 }
 0xc2c   : > { %v3348_v22 = vpop.f32.mrb[36].mxu0 }
 0xc2d   : > { %v6920_v23 = vpop.f32.mrb[37].mxu0  ;;  %v3349_v21 = vadd.f32 %v6572_v19, %v3348_v22 }
 0xc2e   : > { %v3351_v51 = vpop.f32.mrb[38].mxu0 }
 0xc2f   : > { %v3352_v20 = vadd.f32 %v6572_v19, %v3351_v51  ;;  %v6921_v24 = vpop.f32.mrb[39].mxu0 }
 0xc31   : > { %v3422_v26 = vpack.c.bf16 %v3352_v20, %v3349_v21 }
 0xc33   : > { %3428 = vrot.lane.b32.xlu0 %v3422_v26, %s8707_s14  ;;  %3424 = vrot.lane.b32.xlu1 %v3422_v26, %s8706_s17  ;;  %v3430_v30 = vrot.slane %v3422_v26, 4 }
 0xc34   : > { %6933 = vmatmul.mubr.msk.bf16.vlgmr.msra.gmra.mrb[40].mxu0 %vm2247_vm3, %v3422_v26 }
 0xc35   : > { %6943 = vmatpush3.bf16.xpose.msra.mxu0 %v3548_v27  ;;  %6944 = vmatprep.mubr.msk.bf16.mxu0 %vm8704_vm2, %v8703_v11 }
 0xc36   : > { %6954 = vmatprep.subr.bf16.mxu0 %v8703_v11 }
 0xc37   : > { %3448 = vrot.lane.b32.xlu0 %v10102_v29, %s8705_s8  ;;  %3426 = vrot.lane.b32.xlu1 %v3422_v26, %s8705_s8 }
 0xc3b   : > { %3450 = vrot.lane.b32.xlu0 %v10102_v29, %s8707_s14  ;;  %3446 = vrot.lane.b32.xlu1 %v10102_v29, %s8706_s17 }
 0xc3f   : > { %3435 = vrot.lane.b32.xlu0 %v3430_v30, %s8707_s14  ;;  %3431 = vrot.lane.b32.xlu1 %v3430_v30, %s8706_s17 }
 0xc43   : > { %3433 = vrot.lane.b32.xlu1 %v3430_v30, %s8705_s8 }
 0xc47   : > { %3926 = vrot.lane.b32.xlu1 %v3437_v15, %s8708_s1 }
 0xca5   : > { %v3425_v34 = vpop.permute.xlu1 %3424  ;;  %v3429_v35 = vpop.permute.xlu0 %3428 }
 0xca6   : > { %6939 = vmatmul.mubr.msk.bf16.vlgmr.msra.gmra.mrb[40].mxu1 %vm2247_vm3, %v3425_v34 }
 0xca7   : > { %6949 = vmatpush3.bf16.xpose.msra.mxu1 %v3594_v2  ;;  %6950 = vmatprep.mubr.msk.bf16.mxu1 %vm8704_vm2, %v8703_v11 }
 0xca8   : > { %6960 = vmatprep.subr.bf16.mxu1 %v8703_v11 }
 0xca9   : > { %v3427_v3 = vpop.permute.xlu1 %3426  ;;  %v10132_v36 = vpop.permute.xlu0 %3448 }
 0xcaa   : > { %6945 = vmatmul.mubr.msk.bf16.vlgmr.msra.gmra.mrb[44].mxu0 %vm2247_vm3, %v3427_v3  ;;  %v3732_v38 = vsel %vm2247_vm3, %v10132_v36, 0 }
 0xcab   : > { %6955 = vmatpush3.bf16.xpose.msra.mxu0 %v3640_v54  ;;  %6956 = vmatprep.mubr.msk.bf16.mxu0 %vm8704_vm2, %v8703_v11 }
 0xcac   : > { %6966 = vmatprep.subr.bf16.mxu0 %v8703_v11 }
 0xcad   : > { %v10134_v48 = vpop.permute.xlu1 %3446  ;;  %v10145_v39 = vpop.permute.xlu0 %3450 }
 0xcae   : > { %v3686_v37 = vsel %vm2247_vm3, %v10134_v48, 0  ;;  %6951 = vmatmul.mubr.msk.bf16.vlgmr.msra.gmra.mrb[44].mxu1 %vm2247_vm3, %v3429_v35  ;;  %v3778_v41 = vsel %vm2247_vm3, %v10145_v39, 0 }
 0xcaf   : > { %6961 = vmatpush3.bf16.xpose.msra.mxu1 %v3686_v37  ;;  %6962 = vmatprep.mubr.msk.bf16.mxu1 %vm8704_vm2, %v8703_v11 }
 0xcb0   : > { %6972 = vmatprep.subr.bf16.mxu1 %v8703_v11 }
 0xcb1   : > { %v3432_v33 = vpop.permute.xlu1 %3431  ;;  %v3436_v44 = vpop.permute.xlu0 %3435 }
 0xcb2   : > { %6957 = vmatmul.mubr.msk.bf16.vlgmr.msra.gmra.mrb[48].mxu0 %vm2247_vm3, %v3430_v30 }
 0xcb3   : > { %6967 = vmatpush3.bf16.xpose.msra.mxu0 %v3732_v38  ;;  %6968 = vmatprep.mubr.msk.bf16.mxu0 %vm8704_vm2, %v8703_v11 }
 0xcb4   : > { %6978 = vmatprep.subr.bf16.mxu0 %v8703_v11 }
 0xcb5   : > { %v3434_v40 = vpop.permute.xlu1 %3433 }
 0xcb6   : > { %6963 = vmatmul.mubr.msk.bf16.vlgmr.msra.gmra.mrb[48].mxu1 %vm2247_vm3, %v3432_v33 }
 0xcb7   : > { %6973 = vmatpush3.bf16.xpose.msra.mxu1 %v3778_v41  ;;  %6974 = vmatprep.mubr.msk.bf16.mxu1 %vm8704_vm2, %v8703_v11 }
 0xcb8   : > { %6984 = vmatprep.subr.bf16.mxu1 %v8703_v11 }
 0xcb9   : > { %v3927_v42 = vpop.permute.xlu1 %3926 }
 0xcba   : > { %v3932_v43 = vsel %vm2741_vm4, %v3927_v42, 0  ;;  %6969 = vmatmul.mubr.msk.bf16.vlgmr.msra.gmra.mrb[52].mxu0 %vm2247_vm3, %v3434_v40 }
 0xcbb   : > { %6979 = vmatpush3.bf16.msra.mxu0 %v3932_v43  ;;  %6980 = vmatprep.mubr.msk.bf16.mxu0 %vm8704_vm2, %v8703_v11 }
 0xcbc   : > { %6990 = vmatprep.subr.bf16.mxu0 %v8703_v11 }
 0xcbe   : > { %6975 = vmatmul.mubr.msk.bf16.vlgmr.msra.gmra.mrb[52].mxu1 %vm2247_vm3, %v3436_v44 }
 0xcbf   : > { %6986 = vmatprep.mubr.msk.bf16.mxu1 %vm8704_vm2, %v8703_v11 }
 0xd07   : > { %v3492_v53 = vpop.f32.mrb[40].mxu0 }
 0xd08   : > { %v3822_v55 = vadd.f32 %v6667_v46, %v3492_v53  ;;  %v6934_v57 = vpop.f32.mrb[41].mxu0 }
 0xd09   : > { %v3495_v58 = vpop.f32.mrb[42].mxu0 }
 0xd0a   : > { %v6935_v59 = vpop.f32.mrb[43].mxu0  ;;  %v3830_v60 = vsel %vm2247_vm3, %v3822_v55, -inf }
 0xd0b   : > { %3831 = vmax.xlane.f32.xlu1 %v3830_v60 }
 0xd79   : > { %v3538_v61 = vpop.f32.mrb[40].mxu1 }
 0xd7a   : > { %v3823_v62 = vadd.f32 %v6667_v46, %v3538_v61  ;;  %v6940_v63 = vpop.f32.mrb[41].mxu1 }
 0xd7b   : > { %v3541_v0 = vpop.f32.mrb[42].mxu1 }
 0xd7c   : > { %v6941_v1 = vpop.f32.mrb[43].mxu1  ;;  %v3833_v4 = vsel %vm2247_vm3, %v3823_v62, -inf }
 0xd7d   : > { %3834 = vmax.xlane.f32.xlu0 %v3833_v4  ;;  %v3584_v5 = vpop.f32.mrb[44].mxu0 }
 0xd7e   : > { %v3824_v6 = vadd.f32 %v6667_v46, %v3584_v5  ;;  %v6946_v7 = vpop.f32.mrb[45].mxu0 }
 0xd7f   : > { %v3587_v8 = vpop.f32.mrb[46].mxu0 }
 0xd80   : > { %v6947_v52 = vpop.f32.mrb[47].mxu0  ;;  %v3836_v56 = vsel %vm2247_vm3, %v3824_v6, -inf }
 0xd81   : > { %v3630_v9 = vpop.f32.mrb[44].mxu1  ;;  %3837 = vmax.xlane.f32.xlu0 %v3836_v56 }
 0xd82   : > { %v3825_v10 = vadd.f32 %v6667_v46, %v3630_v9  ;;  %v6952_v50 = vpop.f32.mrb[45].mxu1 }
 0xd83   : > { %v3633_v49 = vpop.f32.mrb[46].mxu1 }
 0xd84   : > { %v6953_v12 = vpop.f32.mrb[47].mxu1  ;;  %v3839_v13 = vsel %vm2247_vm3, %v3825_v10, -inf }
 0xd85   : > { %3840 = vmax.xlane.f32.xlu0 %v3839_v13  ;;  %v3676_v14 = vpop.f32.mrb[48].mxu0 }
 0xd86   : > { %v3826_v15 = vadd.f32 %v6668_v47, %v3676_v14  ;;  %v6958_v16 = vpop.f32.mrb[49].mxu0 }
 0xd87   : > { %v3679_v18 = vpop.f32.mrb[50].mxu0 }
 0xd88   : > { %v6959_v19 = vpop.f32.mrb[51].mxu0  ;;  %v3842_v22 = vsel %vm2247_vm3, %v3826_v15, -inf }
 0xd89   : > { %v3722_v23 = vpop.f32.mrb[48].mxu1  ;;  %3843 = vmax.xlane.f32.xlu1 %v3842_v22 }
 0xd8a   : > { %v10169_v51 = vadd.f32 %v6668_v47, %v3722_v23  ;;  %v6964_v21 = vpop.f32.mrb[49].mxu1 }
 0xd8b   : > { %v3725_v20 = vpop.f32.mrb[50].mxu1 }
 0xd8c   : > { %v6965_v24 = vpop.f32.mrb[51].mxu1  ;;  %v3845_v26 = vsel %vm2247_vm3, %v10169_v51, -inf }
 0xd8d   : > { %3846 = vmax.xlane.f32.xlu0 %v3845_v26  ;;  %v3768_v27 = vpop.f32.mrb[52].mxu0 }
 0xd8e   : > { %v3828_v30 = vadd.f32 %v6668_v47, %v3768_v27  ;;  %v6970_v34 = vpop.f32.mrb[53].mxu0 }
 0xd8f   : > { %v3771_v2 = vpop.f32.mrb[54].mxu0 }
 0xd90   : > { %v6971_v35 = vpop.f32.mrb[55].mxu0  ;;  %v3848_v3 = vsel %vm2247_vm3, %v3828_v30, -inf }
 0xd91   : > { %v3814_v54 = vpop.f32.mrb[52].mxu1  ;;  %3849 = vmax.xlane.f32.xlu1 %v3848_v3 }
 0xd92   : > { %v10174_v37 = vadd.f32 %v6668_v47, %v3814_v54  ;;  %v6976_v33 = vpop.f32.mrb[53].mxu1 }
 0xd93   : > { %v3817_v38 = vpop.f32.mrb[54].mxu1 }
 0xd94   : > { %v6977_v40 = vpop.f32.mrb[55].mxu1  ;;  %v3851_v41 = vsel %vm2247_vm3, %v10174_v37, -inf }
 0xd95   : > { %3852 = vmax.xlane.f32.xlu0 %v3851_v41 }
 0xd98   : > { %v3832_v42 = vpop.xlane.xlu1 %3831 }
 0xd99   : > { %v3854_v43 = vsub.f32 %v3822_v55, %v3832_v42 }
 0xd9b   : > { %v3862_v44 = vmul.f32 1.442695, %v3854_v43 }
 0xd9d   : > { %7507 = vpow2.f32 %v3862_v44 }
 0xda2   : > { %4022 = vrot.lane.b32.xlu1 %v10095_v25, %s8708_s1 }
 0xda6   : > { %4070 = vrot.lane.b32.xlu1 %v10118_v32, %s8708_s1 }
 0xda7   : > { %v10184_v45 = vpop.eup %7507 }
 0xda8   : > { %v3878_v46 = vsel %vm2247_vm3, %v10184_v45, 0.0 }
 0xdab   : > { %3974 = vrot.lane.b32.xlu0 %v10088_v17, %s8708_s1 }
 0xdca   : > { %3879 = vadd.xlane.f32.xlu1 %v3878_v46 }
 0xddb   : > { %4118 = vrot.lane.b32.xlu1 %v10102_v29, %s8708_s1 }
 0xe0a   : > { %v3835_v25 = vpop.xlane.xlu0 %3834 }
 0xe0b   : > { %v3855_v53 = vsub.f32 %v3823_v62, %v3835_v25 }
 0xe0d   : > { %v3864_v57 = vmul.f32 1.442695, %v3855_v53 }
 0xe0e   : > { %v3838_v32 = vpop.xlane.xlu0 %3837 }
 0xe0f   : > { %7509 = vpow2.f32 %v3864_v57  ;;  %v3856_v58 = vsub.f32 %v3824_v6, %v3838_v32 }
 0xe11   : > { %v3866_v17 = vmul.f32 1.442695, %v3856_v58 }
 0xe12   : > { %v3841_v59 = vpop.xlane.xlu0 %3840 }
 0xe13   : > { %7511 = vpow2.f32 %v3866_v17  ;;  %v3857_v55 = vsub.f32 %v3825_v10, %v3841_v59 }
 0xe15   : > { %v3868_v60 = vmul.f32 1.442695, %v3857_v55 }
 0xe16   : > { %v3844_v61 = vpop.xlane.xlu1 %3843 }
 0xe17   : > { %7513 = vpow2.f32 %v3868_v60  ;;  %v3858_v63 = vsub.f32 %v3826_v15, %v3844_v61 }
 0xe19   : > { %v7510_v0 = vpop.eup %7509  ;;  %v3870_v1 = vmul.f32 1.442695, %v3858_v63 }
 0xe1a   : > { %v3881_v4 = vsel %vm2247_vm3, %v7510_v0, 0.0  ;;  %v3847_v62 = vpop.xlane.xlu0 %3846 }
 0xe1b   : > { %7515 = vpow2.f32 %v3870_v1  ;;  %3882 = vadd.xlane.f32.xlu0 %v3881_v4  ;;  %v3859_v14 = vsub.f32 %v10169_v51, %v3847_v62 }
 0xe1d   : > { %v10191_v29 = vpop.eup %7511  ;;  %v3872_v15 = vmul.f32 1.442695, %v3859_v14 }
 0xe1e   : > { %v3850_v5 = vpop.xlane.xlu1 %3849  ;;  %v3884_v6 = vsel %vm2247_vm3, %v10191_v29, 0.0 }
 0xe1f   : > { %v3860_v7 = vsub.f32 %v3828_v30, %v3850_v5  ;;  %3885 = vadd.xlane.f32.xlu1 %v3884_v6 }
 0xe21   : > { %v10195_v8 = vpop.eup %7513  ;;  %v3874_v52 = vmul.f32 1.442695, %v3860_v7 }
 0xe22   : > { %v3853_v56 = vpop.xlane.xlu0 %3852  ;;  %v3887_v9 = vsel %vm2247_vm3, %v10195_v8, 0.0  ;;  %v4023_v19 = vpop.permute.xlu1 %4022 }
 0xe23   : > { %7517 = vpow2.f32 %v3874_v52  ;;  %3888 = vadd.xlane.f32.xlu0 %v3887_v9  ;;  %v3861_v16 = vsub.f32 %v10174_v37, %v3853_v56  ;;  %v4028_v27 = vsel %vm2741_vm4, %v4023_v19, 0 }
 0xe24   : > { %7519 = vpow2.f32 %v3872_v15 }
 0xe25   : > { %v10199_v10 = vpop.eup %7515  ;;  %v3876_v18 = vmul.f32 1.442695, %v3861_v16 }
 0xe26   : > { %v3975_v50 = vpop.permute.xlu0 %3974  ;;  %v3890_v47 = vsel %vm2247_vm3, %v10199_v10, 0.0  ;;  %v4071_v22 = vpop.permute.xlu1 %4070 }
 0xe27   : > { %v3980_v49 = vsel %vm2741_vm4, %v3975_v50, 0  ;;  %3891 = vadd.xlane.f32.xlu1 %v3890_v47  ;;  %7521 = vpow2.f32 %v3876_v18  ;;  %v4076_v40 = vsel %vm2741_vm4, %v4071_v22, 0 }
 0xe28   : > { %6985 = vmatpush3.bf16.msra.mxu1 %v3980_v49 }
 0xe29   : > { %6996 = vmatprep.subr.bf16.mxu1 %v8703_v11 }
 0xe2d   : > { %v10205_v12 = vpop.eup %7517 }
 0xe2e   : > { %v3896_v13 = vsel %vm2247_vm3, %v10205_v12, 0.0  ;;  %v10215_v23 = vpop.eup %7519 }
 0xe2f   : > { %3897 = vadd.xlane.f32.xlu1 %v3896_v13  ;;  %v3893_v20 = vsel %vm2247_vm3, %v10215_v23, 0.0 }
 0xe39   : > { %4166 = vrot.lane.b32.xlu0 %v10134_v48, %s8708_s1  ;;  %v10219_v48 = vpop.eup %7521 }
 0xe40   : > { %4214 = vrot.lane.b32.xlu1 %v10132_v36, %s8708_s1  ;;  %v3899_v36 = vsel %vm2247_vm3, %v10219_v48, 0.0 }
 0xe57   : > { %v3880_v21 = vpop.xlane.xlu1 %3879 }
 0xe58   : > { %7523 = vrcp.f32 %v3880_v21  ;;  %3894 = vadd.xlane.f32.xlu0 %v3893_v20 }
 0xe5b   : > { %v4119_v30 = vpop.permute.xlu1 %4118 }
 0xe5c   : > { %3900 = vadd.xlane.f32.xlu0 %v3899_v36  ;;  %v4124_v43 = vsel %vm2741_vm4, %v4119_v30, 0 }
 0xe62   : > { %v7524_v51 = vpop.eup %7523 }
 0xe63   : > { %v3910_v24 = vmul.f32 %v7524_v51, %v10184_v45 }
 0xe65   : > { %v3918_v26 = vpack.c.bf16 %v3910_v24, %v3910_v24 }
 0xe67   : > { %6981 = vmatmul.mubr.msk.bf16.vlgmr.msra.gmra.mrb[56].mxu0 %vm2247_vm3, %v3918_v26 }
 0xe68   : > { %6991 = vmatpush3.bf16.msra.mxu0 %v4028_v27  ;;  %6992 = vmatprep.mubr.msk.bf16.mxu0 %vm8704_vm2, %v8703_v11 }
 0xe69   : > { %7002 = vmatprep.subr.bf16.mxu0 %v8703_v11 }
 0xe72   : > { %4262 = vrot.lane.b32.xlu0 %v10145_v39, %s8708_s1 }
 0xea8   : > { %v3883_v34 = vpop.xlane.xlu0 %3882 }
 0xea9   : > { %7525 = vrcp.f32 %v3883_v34  ;;  %v7451_v34 = vld [vmem:[%s1769_s2] sm:$0xff]  }
 0xeac   : > { %v3886_v2 = vpop.xlane.xlu1 %3885 }
 0xead   : > { %7527 = vrcp.f32 %v3886_v2 }
 0xeb0   : > { %v3889_v35 = vpop.xlane.xlu0 %3888 }
 0xeb1   : > { %7529 = vrcp.f32 %v3889_v35  ;;  %v7452_v35 = vld [vmem:[%s1769_s2 + $0x8] sm:$0xff]   ;;  %s10796_s2 = scalar_lea.vmem [#allocation37], %s9719_s15 }
 0xeb3   : > { %v7526_v3 = vpop.eup %7525 }
 0xeb4   : > { %v3911_v54 = vmul.f32 %v7526_v3, %v7510_v0  ;;  %v3892_v37 = vpop.xlane.xlu1 %3891  ;;  %v4167_v46 = vpop.permute.xlu0 %4166 }
 0xeb5   : > { %7531 = vrcp.f32 %v3892_v37  ;;  %v4172_v57 = vsel %vm2741_vm4, %v4167_v46, 0 }
 0xeb6   : > { %v3919_v33 = vpack.c.bf16 %v3911_v54, %v3911_v54 }
 0xeb7   : > { %v7528_v38 = vpop.eup %7527 }
 0xeb8   : > { %v3912_v41 = vmul.f32 %v7528_v38, %v10191_v29  ;;  %6987 = vmatmul.mubr.msk.bf16.vlgmr.msra.gmra.mrb[56].mxu1 %vm2247_vm3, %v3919_v33 }
 0xeb9   : > { %6997 = vmatpush3.bf16.msra.mxu1 %v4076_v40  ;;  %6998 = vmatprep.mubr.msk.bf16.mxu1 %vm8704_vm2, %v8703_v11 }
 0xeba   : > { %v3920_v39 = vpack.c.bf16 %v3912_v41, %v3912_v41  ;;  %7008 = vmatprep.subr.bf16.mxu1 %v8703_v11 }
 0xebb   : > { %v7530_v42 = vpop.eup %7529 }
 0xebc   : > { %v3913_v44 = vmul.f32 %v7530_v42, %v10195_v8  ;;  %6993 = vmatmul.mubr.msk.bf16.vlgmr.msra.gmra.mrb[60].mxu0 %vm2247_vm3, %v3920_v39  ;;  %v3898_v45 = vpop.xlane.xlu1 %3897 }
 0xebd   : > { %7003 = vmatpush3.bf16.msra.mxu0 %v4124_v43  ;;  %7533 = vrcp.f32 %v3898_v45  ;;  %7004 = vmatprep.mubr.msk.bf16.mxu0 %vm8704_vm2, %v8703_v11 }
 0xebe   : > { %v3921_v25 = vpack.c.bf16 %v3913_v44, %v3913_v44  ;;  %7014 = vmatprep.subr.bf16.mxu0 %v8703_v11 }
 0xebf   : > { %v7532_v53 = vpop.eup %7531 }
 0xec0   : > { %v3914_v32 = vmul.f32 %v7532_v53, %v10199_v10  ;;  %6999 = vmatmul.mubr.msk.bf16.vlgmr.msra.gmra.mrb[60].mxu1 %vm2247_vm3, %v3921_v25  ;;  %v4215_v58 = vpop.permute.xlu1 %4214 }
 0xec1   : > { %7009 = vmatpush3.bf16.msra.mxu1 %v4172_v57  ;;  %7010 = vmatprep.mubr.msk.bf16.mxu1 %vm8704_vm2, %v8703_v11  ;;  %v4220_v59 = vsel %vm2741_vm4, %v4215_v58, 0 }
 0xec2   : > { %v3922_v17 = vpack.c.bf16 %v3914_v32, %v3914_v32  ;;  %7020 = vmatprep.subr.bf16.mxu1 %v8703_v11 }
 0xec4   : > { %7005 = vmatmul.mubr.msk.bf16.vlgmr.msra.gmra.mrb[64].mxu0 %vm2247_vm3, %v3922_v17 }
 0xec5   : > { %7015 = vmatpush3.bf16.msra.mxu0 %v4220_v59  ;;  %7016 = vmatprep.mubr.msk.bf16.mxu0 %vm8704_vm2, %v8703_v11 }
 0xec6   : > { %7026 = vmatprep.subr.bf16.mxu0 %v8703_v11 }
 0xec7   : > { %v7534_v55 = vpop.eup %7533 }
 0xec8   : > { %v3916_v60 = vmul.f32 %v7534_v55, %v10205_v12 }
 0xeca   : > { %v3924_v61 = vpack.c.bf16 %v3916_v60, %v3916_v60 }
 0xecc   : > { %7017 = vmatmul.mubr.msk.bf16.vlgmr.msra.gmra.mrb[68].mxu0 %vm2247_vm3, %v3924_v61 }
 0xecd   : > { %7030 = vmatprep.mubr.msk.bf16.mxu0 %vm8704_vm2, %v8703_v11  ;;  %7027 = vmatpush3.bf16.msra.mxu0 %v7451_v34 }
 0xece   : > { %7028 = vmatprep.subr.bf16.mxu0 %v8703_v11 }
 0xed1   : > { %7029 = vmatpush3.bf16.msra.mxu0 %v7452_v35 }
 0xee5   : > { %v3895_v63 = vpop.xlane.xlu0 %3894 }
 0xee6   : > { %7535 = vrcp.f32 %v3895_v63 }
 0xee9   : > { %v3901_v0 = vpop.xlane.xlu0 %3900 }
 0xeea   : > { %7537 = vrcp.f32 %v3901_v0 }
 0xeed   : > { %v4263_v29 = vpop.permute.xlu0 %4262 }
 0xeee   : > { %v4268_v6 = vsel %vm2741_vm4, %v4263_v29, 0 }
 0xef0   : > { %v7536_v1 = vpop.eup %7535 }
 0xef1   : > { %v3915_v4 = vmul.f32 %v7536_v1, %v10215_v23  ;;  %v6600_v1 = vld [vmem:[%s1777_s28] ss:$0 sm:$0xff]  ;;  %s10797_s28 = scalar_lea.vmem [#allocation39], %s9719_s15 }
 0xef3   : > { %v3923_v62 = vpack.c.bf16 %v3915_v4, %v3915_v4 }
 0xef4   : > { %v7538_v5 = vpop.eup %7537 }
 0xef5   : > { %7011 = vmatmul.mubr.msk.bf16.vlgmr.msra.gmra.mrb[64].mxu1 %vm2247_vm3, %v3923_v62  ;;  %v3917_v7 = vmul.f32 %v7538_v5, %v10219_v48 }
 0xef6   : > { %7021 = vmatpush3.bf16.msra.mxu1 %v4268_v6  ;;  %7022 = vmatprep.mubr.msk.bf16.mxu1 %vm8704_vm2, %v8703_v11 }
 0xef7   : > { %7034 = vmatprep.subr.bf16.mxu1 %v8703_v11  ;;  %v3925_v8 = vpack.c.bf16 %v3917_v7, %v3917_v7 }
 0xefd   : > { %7023 = vmatmul.mubr.msk.bf16.vlgmr.msra.gmra.mrb[68].mxu1 %vm2247_vm3, %v3925_v8 }
 0xefe   : > { %7038 = vmatprep.mubr.msk.bf16.mxu1 %vm8704_vm2, %v8703_v11 }
 0xf3a   : > { %v3968_v52 = vpop.f32.mrb[56].mxu0 }
 0xf3b   : > { %v6982_v56 = vpop.f32.mrb[57].mxu0 }
 0xf3c   : > { %v3971_v9 = vpop.f32.mrb[58].mxu0 }
 0xf3d   : > { %v6983_v10 = vpop.f32.mrb[59].mxu0 }
 0xf8b   : > { %v4016_v50 = vpop.f32.mrb[56].mxu1 }
 0xf8c   : > { %v6988_v47 = vpop.f32.mrb[57].mxu1 }
 0xf8d   : > { %v4019_v49 = vpop.f32.mrb[58].mxu1  ;;  %v7453_v47 = vld [vmem:[%s1819_s13] sm:$0xff]  }
 0xf8e   : > { %v6989_v12 = vpop.f32.mrb[59].mxu1  ;;  %7042 = vmatprep.subr.bf16.mxu0 %v7453_v47  ;;  %v7454_v49 = vld [vmem:[%s1819_s13 + $0x8] sm:$0xff]   ;;  %s10788_s13 = scalar_lea.vmem [#allocation33], %s9719_s15 }
 0xf8f   : > { %v4064_v13 = vpop.f32.mrb[60].mxu0  ;;  %v7455_v12 = vld [vmem:[#allocation8] sm:$0xff]  }
 0xf90   : > { %v6994_v14 = vpop.f32.mrb[61].mxu0 }
 0xf91   : > { %v4067_v15 = vpop.f32.mrb[62].mxu0  ;;  %v7457_v14 = vld [vmem:[%s1802_s10] sm:$0xff]  }
 0xf92   : > { %v6995_v16 = vpop.f32.mrb[63].mxu0  ;;  %7035 = vmatpush3.bf16.msra.mxu1 %v7457_v14  ;;  %v7458_v15 = vld [vmem:[%s1802_s10 + $0x8] sm:$0xff]   ;;  %s10789_s10 = scalar_lea.vmem [#allocation31], %s9719_s15 }
 0xf93   : > { %v4112_v18 = vpop.f32.mrb[60].mxu1  ;;  %7036 = vmatprep.subr.bf16.mxu1 %v8703_v11 }
 0xf94   : > { %v7000_v19 = vpop.f32.mrb[61].mxu1 }
 0xf95   : > { %v4115_v22 = vpop.f32.mrb[62].mxu1 }
 0xf96   : > { %v7001_v23 = vpop.f32.mrb[63].mxu1  ;;  %7037 = vmatpush3.bf16.msra.mxu1 %v7458_v15 }
 0xf97   : > { %v4160_v21 = vpop.f32.mrb[64].mxu0  ;;  %7050 = vmatprep.subr.bf16.mxu1 %v8703_v11 }
 0xf98   : > { %v7006_v20 = vpop.f32.mrb[65].mxu0 }
 0xf99   : > { %v4163_v48 = vpop.f32.mrb[66].mxu0 }
 0xf9a   : > { %v7007_v36 = vpop.f32.mrb[67].mxu0 }
 0xf9f   : > { %v4256_v51 = vpop.f32.mrb[68].mxu0 }
 0xfa0   : > { %v7417_v24 = vpack.i.bf16 %v4256_v51, %v4064_v13  ;;  %v7018_v26 = vpop.f32.mrb[69].mxu0  ;;  %v7456_v13 = vld [vmem:[#allocation8 + $0x8] sm:$0xff]  }
 0xfa1   : > { %v4259_v27 = vpop.f32.mrb[70].mxu0 }
 0xfa2   : > { %7418 = vrot.lane.b32.xlu0 %v7417_v24, %s8710_s4  ;;  %v7019_v30 = vpop.f32.mrb[71].mxu0 }
 0xfc8   : > { %v4208_v2 = vpop.f32.mrb[64].mxu1 }
 0xfc9   : > { %v7412_v3 = vpack.i.bf16 %v4208_v2, %v4016_v50  ;;  %v7012_v54 = vpop.f32.mrb[65].mxu1 }
 0xfca   : > { %v4211_v37 = vpop.f32.mrb[66].mxu1 }
 0xfcb   : > { %7413 = vrot.lane.b32.xlu1 %v7412_v3, %s8711_s11  ;;  %v7013_v33 = vpop.f32.mrb[67].mxu1  ;;  %v6601_v3 = vld [vmem:[%s1785_s3] ss:$0 sm:$0xff]  ;;  %s10798_s3 = scalar_lea.vmem [#allocation41], %s9719_s15 }
 0xfd0   : > { %v4304_v38 = vpop.f32.mrb[68].mxu1 }
 0xfd1   : > { %v7422_v40 = vpack.i.bf16 %v4304_v38, %v4112_v18  ;;  %v7024_v41 = vpop.f32.mrb[69].mxu1 }
 0xfd2   : > { %v4307_v39 = vpop.f32.mrb[70].mxu1 }
 0xfd3   : > { %7423 = vrot.lane.b32.xlu1 %v7422_v40, %s8712_s7  ;;  %v7025_v42 = vpop.f32.mrb[71].mxu1  ;;  %v6602_v40 = vld [vmem:[%s1793_s19] ss:$0 sm:$0xff]  ;;  %s10790_s19 = scalar_lea.vmem [#allocation34], %s9727_s22 }
0x1014   : > { %v7419_v46 = vpop.permute.xlu0 %7418 }
0x1015   : > { %v7421_v57 = vunpack.i.h.bf16 %v7419_v46  ;;  %v7420_v32 = vunpack.i.l.bf16 %v7419_v46 }
0x103d   : > { %v7414_v43 = vpop.permute.xlu1 %7413 }
0x103e   : > { %v7416_v44 = vunpack.i.h.bf16 %v7414_v43  ;;  %v7415_v45 = vunpack.i.l.bf16 %v7414_v43 }
0x1040   : > { %v4322_v25 = vsel %vm2247_vm3, %v3968_v52, %v7415_v45  ;;  %v4337_v53 = vsel %vm2247_vm3, %v4160_v21, %v7416_v44  ;;  %v6607_v44 = vld [vmem:[%s10788_s13] ss:$0 sm:$0xff] }
0x1041   : > { %v4323_v55 = vsel %vm3134_vm5, %v4322_v25, %v7420_v32  ;;  %v4338_v60 = vsel %vm3134_vm5, %v4337_v53, %v7421_v57 }
0x1045   : > { %v7424_v58 = vpop.permute.xlu1 %7423 }
0x1046   : > { %v7426_v17 = vunpack.i.h.bf16 %v7424_v58  ;;  %v7425_v59 = vunpack.i.l.bf16 %v7424_v58 }
0x1048   : > { %v4324_v61 = vsel %vm3136_vm6, %v4323_v55, %v7425_v59  ;;  %v4339_v63 = vsel %vm3136_vm6, %v4338_v60, %v7426_v17 }
0x1049   : > { %v4340_v0 = vpack.c.bf16 %v4339_v63, %v4324_v61 }
0x104b   : > { %7031 = vmatmul.mubr.msk.bf16.vlgmr.msra.gmra.mrb[72].mxu0 %vm2112_vm1, %v4340_v0  ;;  %v6603_v0 = vld [vmem:[%s10789_s10] ss:$0 sm:$0xff] }
0x104c   : > { %7043 = vmatpush3.bf16.msra.mxu0 %v7453_v47  ;;  %7046 = vmatprep.mubr.msk.bf16.mxu0 %vm2112_vm1, %v7455_v12 }
0x104d   : > { %7044 = vmatprep.subr.bf16.mxu0 %v7454_v49 }
0x1050   : > { %7045 = vmatpush3.bf16.msra.mxu0 %v7454_v49 }
0x1051   : > { %7056 = vmatprep.subr.bf16.mxu0 %v8703_v11 }
0x1053   : > { %7047 = vmatmul.mubr.msk.bf16.vlgmr.msra.gmra.mrb[76].mxu0 %vm2112_vm1, %v7456_v13 }
0x1054   : > { %7058 = vmatprep.mubr.msk.bf16.mxu0 %vm8704_vm2, %v8703_v11 }
0x111e   : > { %v4390_v4 = vpop.f32.mrb[72].mxu0 }
0x111f   : > { %v4397_v29 = vadd.f32 %v4390_v4, %v10042_v28  ;;  %v7032_v62 = vpop.f32.mrb[73].mxu0 }
0x1120   : > { %v4393_v5 = vpop.f32.mrb[74].mxu0 }
0x1121   : > { %v10286_v6 = vadd.f32 %v6600_v1, %v4397_v29  ;;  %v4398_v7 = vadd.f32 %v4393_v5, %v10045_v31  ;;  %v7033_v8 = vpop.f32.mrb[75].mxu0 }
0x1123   : > { %v10289_v52 = vadd.f32 %v6600_v1, %v4398_v7  ;;  %v4430_v56 = vsel %vm2112_vm1, %v10286_v6, 0.0  ;;  %v4438_v9 = vmul.f32 %v10286_v6, %v10286_v6 }
0x1124   : > { %4431 = vadd.xlane.f32.xlu0 %v4430_v56 }
0x1125   : > { %v4433_v28 = vsel %vm2112_vm1, %v10289_v52, 0.0  ;;  %v4440_v10 = vsel %vm2112_vm1, %v4438_v9, 0.0  ;;  %v4439_v31 = vmul.f32 %v10289_v52, %v10289_v52 }
0x1126   : > { %4434 = vadd.xlane.f32.xlu1 %v4433_v28  ;;  %v7048_v45 = vpop.f32.mrb[76].mxu0 }
0x1127   : > { %v4443_v50 = vsel %vm2112_vm1, %v4439_v31, 0.0  ;;  %v4616_v46 = vadd.f32 %v7048_v45, %v6607_v44  ;;  %v4607_v25 = vpop.f32.mrb[77].mxu0 }
0x1128   : > { %4441 = vadd.xlane.f32.xlu0 %v4440_v10  ;;  %v4608_v53 = vadd.f32 %v6607_v44, %v4607_v25  ;;  %v7049_v57 = vpop.f32.mrb[78].mxu0 }
0x1129   : > { %v4619_v32 = vadd.f32 %v7049_v57, %v6607_v44  ;;  %v4610_v58 = vpop.f32.mrb[79].mxu0 }
0x112a   : > { %v4611_v17 = vadd.f32 %v6607_v44, %v4610_v58 }
0x112b   : > { %v10327_v59 = vpack.c.bf16 %v4619_v32, %v4616_v46 }
0x112c   : > { %4444 = vadd.xlane.f32.xlu0 %v4443_v50  ;;  %v10329_v55 = vpack.c.bf16 %v4611_v17, %v4608_v53 }
0x112d   : > { %v4841_v50 = vsel %vm2247_vm3, %v10327_v59, 0 }
0x112e   : > { %v4657_v60 = vsel %vm2247_vm3, %v10329_v55, 0 }
0x1137   : > { %4642 = vrot.lane.b32.xlu1 %v10329_v55, %s8705_s8 }
0x1142   : > { %4640 = vrot.lane.b32.xlu0 %v10329_v55, %s8706_s17 }
0x11b1   : > { %v4432_v16 = vpop.xlane.xlu0 %4431 }
0x11b2   : > { %v4436_v18 = vmul.f32 0.03125, %v4432_v16 }
0x11b3   : > { %v4435_v19 = vpop.xlane.xlu1 %4434 }
0x11b4   : > { %v4448_v23 = vmul.f32 %v4436_v18, %v4436_v18  ;;  %v4437_v21 = vmul.f32 0.03125, %v4435_v19  ;;  %v4452_v34 = vsub.f32 %v10286_v6, %v4436_v18 }
0x11b5   : > { %v4442_v22 = vpop.xlane.xlu0 %4441 }
0x11b6   : > { %v4446_v20 = vmul.f32 0.03125, %v4442_v22  ;;  %v4449_v51 = vmul.f32 %v4437_v21, %v4437_v21  ;;  %v4453_v54 = vsub.f32 %v10289_v52, %v4437_v21 }
0x11b7   : > { %v10345_v8 = vpop.permute.xlu1 %4642 }
0x11b8   : > { %v4450_v48 = vsub.f32 %v4446_v20, %v4448_v23  ;;  %v4749_v9 = vsel %vm2247_vm3, %v10345_v8, 0  ;;  %v6670_v20 = vld [vmem:[#allocation12] sm:$0xff]  }
0x11b9   : > { %v4445_v36 = vpop.xlane.xlu0 %4444  ;;  %v6672_v46 = vunpack.c.h.bf16 %v6670_v20 }
0x11ba   : > { %v4454_v24 = vadd.f32 1e-05, %v4450_v48  ;;  %v4447_v26 = vmul.f32 0.03125, %v4445_v36  ;;  %v6671_v48 = vunpack.c.l.bf16 %v6670_v20 }
0x11bc   : > { %7539 = vrsqrt.f32 %v4454_v24  ;;  %v4451_v27 = vsub.f32 %v4447_v26, %v4449_v51 }
0x11bd   : > { %v10338_v61 = vpop.permute.xlu0 %4640 }
0x11be   : > { %v4455_v30 = vadd.f32 1e-05, %v4451_v27  ;;  %v4703_v63 = vsel %vm2247_vm3, %v10338_v61, 0 }
0x11bf   : > { %7057 = vmatpush3.bf16.xpose.msra.mxu0 %v4703_v63 }
0x11c0   : > { %7541 = vrsqrt.f32 %v4455_v30  ;;  %7068 = vmatprep.subr.bf16.mxu0 %v8703_v11 }
0x11c6   : > { %v7540_v2 = vpop.eup %7539 }
0x11c7   : > { %v4458_v35 = vmul.f32 %v7540_v2, %v4452_v34 }
0x11c9   : > { %v4466_v38 = vmul.f32 %v6601_v3, %v4458_v35 }
0x11ca   : > { %v7542_v37 = vpop.eup %7541 }
0x11cb   : > { %v4459_v33 = vmul.f32 %v7542_v37, %v4453_v54  ;;  %v4474_v39 = vadd.f32 %v6602_v40, %v4466_v38 }
0x11cd   : > { %v4467_v41 = vmul.f32 %v6601_v3, %v4459_v33 }
0x11cf   : > { %v4475_v42 = vadd.f32 %v6602_v40, %v4467_v41 }
0x11d1   : > { %v4476_v43 = vpack.c.bf16 %v4475_v42, %v4474_v39 }
0x11d3   : > { %7039 = vmatmul.mubr.msk.bf16.vlgmr.msra.gmra.mrb[72].mxu1 %vm2112_vm1, %v4476_v43 }
0x11d4   : > { %7052 = vmatprep.mubr.msk.bf16.mxu1 %vm8704_vm2, %v8703_v11  ;;  %7051 = vmatpush3.bf16.xpose.msra.mxu1 %v4657_v60 }
0x11d5   : > { %7062 = vmatprep.subr.bf16.mxu1 %v8703_v11 }
0x12a6   : > { %v4532_v1 = vpop.f32.mrb[72].mxu1 }
0x12a7   : > { %v7040_v4 = vpop.f32.mrb[73].mxu1  ;;  %v4533_v62 = vadd.f32 %v6603_v0, %v4532_v1 }
0x12a8   : > { %v4535_v29 = vpop.f32.mrb[74].mxu1 }
0x12a9   : > { %v4536_v5 = vadd.f32 %v6603_v0, %v4535_v29  ;;  %v7041_v7 = vpop.f32.mrb[75].mxu1 }
0x12ab   : > { %v4622_v56 = vpack.c.bf16 %v4536_v5, %v4533_v62 }
0x12ad   : > { %4624 = vrot.lane.b32.xlu1 %v4622_v56, %s8706_s17  ;;  %4626 = vrot.lane.b32.xlu0 %v4622_v56, %s8705_s8  ;;  %v4630_v28 = vrot.slane %v4622_v56, 4 }
0x12ae   : > { %7053 = vmatmul.mubr.msk.bf16.vlgmr.msra.gmra.mrb[76].mxu1 %vm2247_vm3, %v4622_v56 }
0x12af   : > { %7063 = vmatpush3.bf16.xpose.msra.mxu1 %v4749_v9  ;;  %7064 = vmatprep.mubr.msk.bf16.mxu1 %vm8704_vm2, %v8703_v11 }
0x12b0   : > { %7074 = vmatprep.subr.bf16.mxu1 %v8703_v11 }
0x12b1   : > { %4644 = vrot.lane.b32.xlu1 %v10329_v55, %s8707_s14  ;;  %4647 = vrot.lane.b32.xlu0 %v10327_v59, %s8706_s17 }
0x12b5   : > { %4628 = vrot.lane.b32.xlu1 %v4622_v56, %s8707_s14  ;;  %4631 = vrot.lane.b32.xlu0 %v4630_v28, %s8706_s17 }
0x12b9   : > { %4649 = vrot.lane.b32.xlu1 %v10327_v59, %s8705_s8  ;;  %4633 = vrot.lane.b32.xlu0 %v4630_v28, %s8705_s8 }
0x12bd   : > { %4651 = vrot.lane.b32.xlu1 %v10327_v59, %s8707_s14 }
0x12c1   : > { %4635 = vrot.lane.b32.xlu1 %v4630_v28, %s8707_s14 }
0x131f   : > { %v4625_v10 = vpop.permute.xlu1 %4624  ;;  %v4627_v31 = vpop.permute.xlu0 %4626 }
0x1320   : > { %7059 = vmatmul.mubr.msk.bf16.vlgmr.msra.gmra.mrb[80].mxu0 %vm2247_vm3, %v4625_v10  ;;  %7065 = vmatmul.mubr.msk.bf16.vlgmr.msra.gmra.mrb[80].mxu1 %vm2247_vm3, %v4627_v31 }
0x1321   : > { %7075 = vmatpush3.bf16.xpose.msra.mxu1 %v4841_v50  ;;  %7076 = vmatprep.mubr.msk.bf16.mxu1 %vm8704_vm2, %v8703_v11 }
0x1322   : > { %7070 = vmatprep.mubr.msk.bf16.mxu0 %vm8704_vm2, %v8703_v11  ;;  %7086 = vmatprep.subr.bf16.mxu1 %v8703_v11 }
0x1323   : > { %v10376_v47 = vpop.permute.xlu1 %4644  ;;  %v10381_v12 = vpop.permute.xlu0 %4647 }
0x1324   : > { %v4795_v49 = vsel %vm2247_vm3, %v10376_v47, 0  ;;  %v4887_v15 = vsel %vm2247_vm3, %v10381_v12, 0 }
0x1325   : > { %7069 = vmatpush3.bf16.xpose.msra.mxu0 %v4795_v49 }
0x1326   : > { %7080 = vmatprep.subr.bf16.mxu0 %v8703_v11 }
0x1327   : > { %v4629_v13 = vpop.permute.xlu1 %4628  ;;  %v4632_v18 = vpop.permute.xlu0 %4631 }
0x1328   : > { %7077 = vmatmul.mubr.msk.bf16.vlgmr.msra.gmra.mrb[84].mxu1 %vm2247_vm3, %v4630_v28 }
0x1329   : > { %7088 = vmatprep.mubr.msk.bf16.mxu1 %vm8704_vm2, %v8703_v11 }
0x132b   : > { %v10386_v14 = vpop.permute.xlu1 %4649  ;;  %v4634_v22 = vpop.permute.xlu0 %4633 }
0x132c   : > { %v4933_v16 = vsel %vm2247_vm3, %v10386_v14, 0  ;;  %7071 = vmatmul.mubr.msk.bf16.vlgmr.msra.gmra.mrb[84].mxu0 %vm2247_vm3, %v4629_v13 }
0x132d   : > { %7081 = vmatpush3.bf16.xpose.msra.mxu0 %v4887_v15  ;;  %7087 = vmatpush3.bf16.xpose.msra.mxu1 %v4933_v16 }
0x132e   : > { %7082 = vmatprep.mubr.msk.bf16.mxu0 %vm8704_vm2, %v8703_v11  ;;  %7092 = vmatprep.subr.bf16.mxu0 %v8703_v11 }
0x132f   : > { %7098 = vmatprep.subr.bf16.mxu1 %v8703_v11  ;;  %v10397_v19 = vpop.permute.xlu1 %4651 }
0x1330   : > { %v4979_v23 = vsel %vm2247_vm3, %v10397_v19, 0 }
0x1333   : > { %v4636_v21 = vpop.permute.xlu1 %4635 }
0x1334   : > { %7083 = vmatmul.mubr.msk.bf16.vlgmr.msra.gmra.mrb[88].mxu0 %vm2247_vm3, %v4632_v18  ;;  %7089 = vmatmul.mubr.msk.bf16.vlgmr.msra.gmra.mrb[88].mxu1 %vm2247_vm3, %v4634_v22 }
0x1335   : > { %7093 = vmatpush3.bf16.xpose.msra.mxu0 %v4979_v23  ;;  %7094 = vmatprep.mubr.msk.bf16.mxu0 %vm8704_vm2, %v8703_v11 }
0x1336   : > { %7104 = vmatprep.subr.bf16.mxu0 %v8703_v11  ;;  %7100 = vmatprep.mubr.msk.bf16.mxu1 %vm8704_vm2, %v8703_v11 }
0x133c   : > { %7095 = vmatmul.mubr.msk.bf16.vlgmr.msra.gmra.mrb[92].mxu0 %vm2247_vm3, %v4636_v21 }
0x133d   : > { %7106 = vmatprep.mubr.msk.bf16.mxu0 %vm8704_vm2, %v8703_v11 }
0x1381   : > { %v4693_v36 = vpop.f32.mrb[76].mxu1 }
0x1382   : > { %v5023_v51 = vadd.f32 %v6671_v48, %v4693_v36  ;;  %v7054_v24 = vpop.f32.mrb[77].mxu1 }
0x1383   : > { %v4696_v26 = vpop.f32.mrb[78].mxu1 }
0x1384   : > { %v7055_v27 = vpop.f32.mrb[79].mxu1  ;;  %v5031_v30 = vsel %vm3134_vm5, %v5023_v51, -inf }
0x1385   : > { %5032 = vmax.xlane.f32.xlu0 %v5031_v30 }
0x13f3   : > { %v4739_v34 = vpop.f32.mrb[80].mxu0  ;;  %v4785_v2 = vpop.f32.mrb[80].mxu1 }
0x13f4   : > { %v10412_v35 = vadd.f32 %v6671_v48, %v4739_v34  ;;  %v10414_v3 = vadd.f32 %v6671_v48, %v4785_v2  ;;  %v7060_v54 = vpop.f32.mrb[81].mxu0  ;;  %v7066_v37 = vpop.f32.mrb[81].mxu1 }
0x13f5   : > { %v4742_v33 = vpop.f32.mrb[82].mxu0  ;;  %v4788_v38 = vpop.f32.mrb[82].mxu1 }
0x13f6   : > { %v7061_v40 = vpop.f32.mrb[83].mxu0  ;;  %v7067_v41 = vpop.f32.mrb[83].mxu1  ;;  %v5034_v39 = vsel %vm3134_vm5, %v10412_v35, -inf  ;;  %v5037_v42 = vsel %vm3134_vm5, %v10414_v3, -inf }
0x13f7   : > { %5035 = vmax.xlane.f32.xlu1 %v5034_v39  ;;  %5038 = vmax.xlane.f32.xlu0 %v5037_v42 }
0x13fb   : > { %v4877_v43 = vpop.f32.mrb[84].mxu1 }
0x13fc   : > { %v7078_v44 = vpop.f32.mrb[85].mxu1  ;;  %v10422_v17 = vadd.f32 %v6672_v46, %v4877_v43 }
0x13fd   : > { %v4880_v45 = vpop.f32.mrb[86].mxu1 }
0x13fe   : > { %v7079_v25 = vpop.f32.mrb[87].mxu1  ;;  %v5043_v0 = vsel %vm3134_vm5, %v10422_v17, -inf }
0x13ff   : > { %v4831_v53 = vpop.f32.mrb[84].mxu0 }
0x1400   : > { %v10420_v57 = vadd.f32 %v6671_v48, %v4831_v53  ;;  %v7072_v32 = vpop.f32.mrb[85].mxu0 }
0x1401   : > { %v4834_v58 = vpop.f32.mrb[86].mxu0 }
0x1402   : > { %v7073_v60 = vpop.f32.mrb[87].mxu0  ;;  %v5040_v63 = vsel %vm3134_vm5, %v10420_v57, -inf }
0x1403   : > { %5041 = vmax.xlane.f32.xlu0 %v5040_v63 }
0x1407   : > { %v4923_v1 = vpop.f32.mrb[88].mxu0  ;;  %5044 = vmax.xlane.f32.xlu0 %v5043_v0  ;;  %v4969_v4 = vpop.f32.mrb[88].mxu1 }
0x1408   : > { %v10428_v29 = vadd.f32 %v6672_v46, %v4923_v1  ;;  %v10430_v62 = vadd.f32 %v6672_v46, %v4969_v4  ;;  %v7084_v5 = vpop.f32.mrb[89].mxu0  ;;  %v7090_v7 = vpop.f32.mrb[89].mxu1 }
0x1409   : > { %v4926_v56 = vpop.f32.mrb[90].mxu0  ;;  %v4972_v9 = vpop.f32.mrb[90].mxu1 }
0x140a   : > { %v7085_v28 = vpop.f32.mrb[91].mxu0  ;;  %v7091_v10 = vpop.f32.mrb[91].mxu1  ;;  %v5046_v31 = vsel %vm3134_vm5, %v10428_v29, -inf  ;;  %v5049_v50 = vsel %vm3134_vm5, %v10430_v62, -inf }
0x140b   : > { %5047 = vmax.xlane.f32.xlu1 %v5046_v31  ;;  %5050 = vmax.xlane.f32.xlu0 %v5049_v50 }
0x140f   : > { %v5015_v49 = vpop.f32.mrb[92].mxu0 }
0x1410   : > { %v7096_v13 = vpop.f32.mrb[93].mxu0  ;;  %v5030_v20 = vadd.f32 %v6672_v46, %v5015_v49 }
0x1411   : > { %v5018_v15 = vpop.f32.mrb[94].mxu0 }
0x1412   : > { %v7097_v16 = vpop.f32.mrb[95].mxu0  ;;  %v5033_v18 = vpop.xlane.xlu0 %5032  ;;  %v5052_v36 = vsel %vm3134_vm5, %v5030_v20, -inf }
0x1413   : > { %v5055_v22 = vsub.f32 %v5023_v51, %v5033_v18 }
0x1415   : > { %v5063_v23 = vmul.f32 1.442695, %v5055_v22 }
0x1417   : > { %7543 = vpow2.f32 %v5063_v23 }
0x141c   : > { %5173 = vrot.lane.b32.xlu1 %v10338_v61, %s8708_s1 }
0x1420   : > { %5219 = vrot.lane.b32.xlu1 %v10345_v8, %s8708_s1 }
0x1421   : > { %5127 = vrot.lane.b32.xlu0 %v10329_v55, %s8708_s1  ;;  %v10442_v21 = vpop.eup %7543 }
0x1422   : > { %v5079_v48 = vsel %vm3134_vm5, %v10442_v21, 0.0 }
0x1440   : > { %5080 = vadd.xlane.f32.xlu0 %v5079_v48 }
0x1444   : > { %5053 = vmax.xlane.f32.xlu1 %v5052_v36 }
0x1455   : > { %5265 = vrot.lane.b32.xlu1 %v10376_v47, %s8708_s1 }
0x1484   : > { %v5036_v61 = vpop.xlane.xlu1 %5035  ;;  %v5039_v8 = vpop.xlane.xlu0 %5038 }
0x1485   : > { %v5056_v55 = vsub.f32 %v10412_v35, %v5036_v61  ;;  %v5057_v51 = vsub.f32 %v10414_v3, %v5039_v8 }
0x1487   : > { %v5065_v24 = vmul.f32 1.442695, %v5056_v55  ;;  %v5067_v26 = vmul.f32 1.442695, %v5057_v51 }
0x1489   : > { %7545 = vpow2.f32 %v5065_v24 }
0x148a   : > { %7547 = vpow2.f32 %v5067_v26 }
0x1490   : > { %v5042_v27 = vpop.xlane.xlu0 %5041 }
0x1491   : > { %v5058_v38 = vsub.f32 %v10420_v57, %v5042_v27 }
0x1493   : > { %v10451_v30 = vpop.eup %7545  ;;  %v5069_v41 = vmul.f32 1.442695, %v5058_v38 }
0x1494   : > { %v10453_v34 = vpop.eup %7547  ;;  %v5045_v2 = vpop.xlane.xlu0 %5044  ;;  %v5082_v54 = vsel %vm3134_vm5, %v10451_v30, 0.0 }
0x1495   : > { %5083 = vadd.xlane.f32.xlu1 %v5082_v54  ;;  %v5085_v47 = vsel %vm3134_vm5, %v10453_v34, 0.0  ;;  %v5059_v40 = vsub.f32 %v10422_v17, %v5045_v2  ;;  %7549 = vpow2.f32 %v5069_v41 }
0x1496   : > { %5086 = vadd.xlane.f32.xlu0 %v5085_v47 }
0x1497   : > { %v5071_v42 = vmul.f32 1.442695, %v5059_v40 }
0x1498   : > { %v5048_v35 = vpop.xlane.xlu1 %5047  ;;  %v5051_v3 = vpop.xlane.xlu0 %5050 }
0x1499   : > { %v5060_v39 = vsub.f32 %v10428_v29, %v5048_v35  ;;  %v5061_v43 = vsub.f32 %v10430_v62, %v5051_v3  ;;  %7551 = vpow2.f32 %v5071_v42 }
0x149b   : > { %v5073_v44 = vmul.f32 1.442695, %v5060_v39  ;;  %v5075_v45 = vmul.f32 1.442695, %v5061_v43 }
0x149c   : > { %v5174_v37 = vpop.permute.xlu1 %5173  ;;  %v5128_v33 = vpop.permute.xlu0 %5127 }
0x149d   : > { %7099 = vmatpush3.bf16.msra.mxu1 %v5128_v33  ;;  %7105 = vmatpush3.bf16.msra.mxu0 %v5174_v37  ;;  %7553 = vpow2.f32 %v5073_v44 }
0x149e   : > { %7110 = vmatprep.subr.bf16.mxu1 %v8703_v11  ;;  %7116 = vmatprep.subr.bf16.mxu0 %v8703_v11  ;;  %7555 = vpow2.f32 %v5075_v45 }
0x14a0   : > { %v5220_v32 = vpop.permute.xlu1 %5219 }
0x14a6   : > { %5357 = vrot.lane.b32.xlu1 %v10381_v12, %s8708_s1  ;;  %v7550_v12 = vpop.eup %7549 }
0x14a7   : > { %v7552_v46 = vpop.eup %7551 }
0x14a8   : > { %v10470_v25 = vpop.eup %7553  ;;  %v5091_v53 = vsel %vm3134_vm5, %v7552_v46, 0.0 }
0x14a9   : > { %v10473_v57 = vpop.eup %7555  ;;  %v5094_v17 = vsel %vm3134_vm5, %v10470_v25, 0.0 }
0x14aa   : > { %v5097_v60 = vsel %vm3134_vm5, %v10473_v57, 0.0 }
0x14ac   : > { %5311 = vrot.lane.b32.xlu0 %v10327_v59, %s8708_s1  ;;  %v5088_v59 = vsel %vm3134_vm5, %v7550_v12, 0.0 }
0x14ca   : > { %5089 = vadd.xlane.f32.xlu1 %v5088_v59 }
0x14cb   : > { %5092 = vadd.xlane.f32.xlu0 %v5091_v53 }
0x14cd   : > { %v5081_v58 = vpop.xlane.xlu0 %5080 }
0x14ce   : > { %7557 = vrcp.f32 %v5081_v58  ;;  %5095 = vadd.xlane.f32.xlu1 %v5094_v17 }
0x14cf   : > { %5098 = vadd.xlane.f32.xlu0 %v5097_v60 }
0x14d1   : > { %v5054_v63 = vpop.xlane.xlu1 %5053 }
0x14d2   : > { %v5062_v0 = vsub.f32 %v5030_v20, %v5054_v63 }
0x14d4   : > { %v5077_v1 = vmul.f32 1.442695, %v5062_v0 }
0x14d5   : > { %v5266_v56 = vpop.permute.xlu1 %5265 }
0x14d6   : > { %7559 = vpow2.f32 %v5077_v1 }
0x14d8   : > { %v7558_v4 = vpop.eup %7557 }
0x14d9   : > { %v5111_v29 = vmul.f32 %v7558_v4, %v10442_v21 }
0x14db   : > { %v5119_v62 = vpack.c.bf16 %v5111_v29, %v5111_v29 }
0x14dd   : > { %7101 = vmatmul.mubr.msk.bf16.vlgmr.msra.gmra.mrb[92].mxu1 %vm3134_vm5, %v5119_v62 }
0x14de   : > { %7111 = vmatpush3.bf16.msra.mxu1 %v5220_v32  ;;  %7112 = vmatprep.mubr.msk.bf16.mxu1 %vm8704_vm2, %v8703_v11 }
0x14df   : > { %7122 = vmatprep.subr.bf16.mxu1 %v8703_v11 }
0x14e0   : > { %v10484_v5 = vpop.eup %7559 }
0x14e1   : > { %v5100_v7 = vsel %vm3134_vm5, %v10484_v5, 0.0 }
0x14e2   : > { %5101 = vadd.xlane.f32.xlu1 %v5100_v7 }
0x14e5   : > { %5403 = vrot.lane.b32.xlu0 %v10386_v14, %s8708_s1 }
0x14f3   : > { %5449 = vrot.lane.b32.xlu1 %v10397_v19, %s8708_s1  ;;  %s10791_s1 = smov %s10790_s19 }
0x1522   : > { %v5084_v9 = vpop.xlane.xlu1 %5083 }
0x1523   : > { %7561 = vrcp.f32 %v5084_v9  ;;  %v5087_v28 = vpop.xlane.xlu0 %5086 }
0x1524   : > { %7563 = vrcp.f32 %v5087_v28 }
0x1526   : > { %v5358_v14 = vpop.permute.xlu1 %5357 }
0x1527   : > { %v5312_v16 = vpop.permute.xlu0 %5311 }
0x152d   : > { %v7562_v10 = vpop.eup %7561 }
0x152e   : > { %v7564_v31 = vpop.eup %7563  ;;  %v5112_v50 = vmul.f32 %v7562_v10, %v10451_v30  ;;  %v7460_v10 = vld [vmem:[%s10791_s1 + $0x8] sm:$0xff]  }
0x152f   : > { %v5113_v49 = vmul.f32 %v7564_v31, %v10453_v34 }
0x1530   : > { %v5120_v13 = vpack.c.bf16 %v5112_v50, %v5112_v50 }
0x1531   : > { %v5121_v15 = vpack.c.bf16 %v5113_v49, %v5113_v49 }
0x1532   : > { %7107 = vmatmul.mubr.msk.bf16.vlgmr.msra.gmra.mrb[96].mxu0 %vm3134_vm5, %v5120_v13 }
0x1533   : > { %7113 = vmatmul.mubr.msk.bf16.vlgmr.msra.gmra.mrb[96].mxu1 %vm3134_vm5, %v5121_v15  ;;  %7117 = vmatpush3.bf16.msra.mxu0 %v5266_v56 }
0x1534   : > { %7123 = vmatpush3.bf16.msra.mxu1 %v5312_v16  ;;  %7118 = vmatprep.mubr.msk.bf16.mxu0 %vm8704_vm2, %v8703_v11 }
0x1535   : > { %7124 = vmatprep.mubr.msk.bf16.mxu1 %vm8704_vm2, %v8703_v11  ;;  %7128 = vmatprep.subr.bf16.mxu0 %v8703_v11 }
0x1536   : > { %7134 = vmatprep.subr.bf16.mxu1 %v8703_v11 }
0x1557   : > { %v5090_v19 = vpop.xlane.xlu1 %5089 }
0x1558   : > { %7565 = vrcp.f32 %v5090_v19  ;;  %v5093_v18 = vpop.xlane.xlu0 %5092 }
0x1559   : > { %7567 = vrcp.f32 %v5093_v18 }
0x155b   : > { %v5096_v22 = vpop.xlane.xlu1 %5095 }
0x155c   : > { %7569 = vrcp.f32 %v5096_v22  ;;  %v5099_v23 = vpop.xlane.xlu0 %5098 }
0x155d   : > { %7571 = vrcp.f32 %v5099_v23 }
0x1560   : > { %v5404_v24 = vpop.permute.xlu0 %5403 }
0x1562   : > { %v7566_v21 = vpop.eup %7565 }
0x1563   : > { %v7568_v20 = vpop.eup %7567  ;;  %v5114_v48 = vmul.f32 %v7566_v21, %v7550_v12 }
0x1564   : > { %v5115_v36 = vmul.f32 %v7568_v20, %v7552_v46 }
0x1565   : > { %v5122_v61 = vpack.c.bf16 %v5114_v48, %v5114_v48 }
0x1566   : > { %v7570_v8 = vpop.eup %7569  ;;  %v5123_v55 = vpack.c.bf16 %v5115_v36, %v5115_v36 }
0x1567   : > { %v7572_v51 = vpop.eup %7571  ;;  %7119 = vmatmul.mubr.msk.bf16.vlgmr.msra.gmra.mrb[100].mxu0 %vm3134_vm5, %v5122_v61  ;;  %v5116_v26 = vmul.f32 %v7570_v8, %v10470_v25 }
0x1568   : > { %7125 = vmatmul.mubr.msk.bf16.vlgmr.msra.gmra.mrb[100].mxu1 %vm3134_vm5, %v5123_v55  ;;  %7129 = vmatpush3.bf16.msra.mxu0 %v5358_v14  ;;  %v5117_v27 = vmul.f32 %v7572_v51, %v10473_v57  ;;  %v7459_v57 = vld [vmem:[%s10790_s19] sm:$0xff]  }
0x1569   : > { %7135 = vmatpush3.bf16.msra.mxu1 %v5404_v24  ;;  %7130 = vmatprep.mubr.msk.bf16.mxu0 %vm8704_vm2, %v8703_v11  ;;  %v5124_v30 = vpack.c.bf16 %v5116_v26, %v5116_v26 }
0x156a   : > { %7136 = vmatprep.mubr.msk.bf16.mxu1 %vm8704_vm2, %v8703_v11  ;;  %7140 = vmatprep.subr.bf16.mxu0 %v8703_v11  ;;  %v5125_v34 = vpack.c.bf16 %v5117_v27, %v5117_v27 }
0x156b   : > { %7146 = vmatprep.subr.bf16.mxu1 %v8703_v11 }
0x156f   : > { %7131 = vmatmul.mubr.msk.bf16.vlgmr.msra.gmra.mrb[104].mxu0 %vm3134_vm5, %v5124_v30  ;;  %v5102_v2 = vpop.xlane.xlu1 %5101 }
0x1570   : > { %7573 = vrcp.f32 %v5102_v2  ;;  %7137 = vmatmul.mubr.msk.bf16.vlgmr.msra.gmra.mrb[104].mxu1 %vm3134_vm5, %v5125_v34  ;;  %7142 = vmatprep.mubr.msk.bf16.mxu0 %vm8704_vm2, %v8703_v11 }
0x1571   : > { %7150 = vmatprep.mubr.msk.bf16.mxu1 %vm8704_vm2, %v8703_v11  ;;  %7147 = vmatpush3.bf16.msra.mxu1 %v7459_v57 }
0x1572   : > { %7148 = vmatprep.subr.bf16.mxu1 %v8703_v11 }
0x1573   : > { %v5450_v54 = vpop.permute.xlu1 %5449 }
0x1574   : > { %7141 = vmatpush3.bf16.msra.mxu0 %v5450_v54 }
0x1575   : > { %7154 = vmatprep.subr.bf16.mxu0 %v8703_v11  ;;  %7149 = vmatpush3.bf16.msra.mxu1 %v7460_v10  ;;  %v6635_v10 = vld [vmem:[%s10796_s2] ss:$0 sm:$0xff] }
0x1576   : > { %7162 = vmatprep.subr.bf16.mxu1 %v8703_v11 }
0x157a   : > { %v7574_v47 = vpop.eup %7573 }
0x157b   : > { %v5118_v35 = vmul.f32 %v7574_v47, %v10484_v5 }
0x157d   : > { %v5126_v3 = vpack.c.bf16 %v5118_v35, %v5118_v35 }
0x157f   : > { %7143 = vmatmul.mubr.msk.bf16.vlgmr.msra.gmra.mrb[108].mxu0 %vm3134_vm5, %v5126_v3 }
0x1580   : > { %7158 = vmatprep.mubr.msk.bf16.mxu0 %vm8704_vm2, %v8703_v11 }
0x15b0   : > { %v5167_v37 = vpop.f32.mrb[92].mxu1 }
0x15b1   : > { %v7102_v33 = vpop.f32.mrb[93].mxu1 }
0x15b2   : > { %v5170_v38 = vpop.f32.mrb[94].mxu1 }
0x15b3   : > { %v7103_v40 = vpop.f32.mrb[95].mxu1 }
0x1605   : > { %v5213_v41 = vpop.f32.mrb[96].mxu0 }
0x1606   : > { %v5259_v39 = vpop.f32.mrb[96].mxu1  ;;  %v7108_v42 = vpop.f32.mrb[97].mxu0 }
0x1607   : > { %v7114_v43 = vpop.f32.mrb[97].mxu1  ;;  %v5216_v44 = vpop.f32.mrb[98].mxu0 }
0x1608   : > { %v5262_v45 = vpop.f32.mrb[98].mxu1  ;;  %v7109_v12 = vpop.f32.mrb[99].mxu0  ;;  %v7463_v43 = vld [vmem:[%s9755_s9] sm:$0xff]   ;;  %v7464_v44 = vld [vmem:[%s9755_s9 + $0x8] sm:$0xff]  }
0x1609   : > { %v7115_v46 = vpop.f32.mrb[99].mxu1 }
0x163a   : > { %v5305_v59 = vpop.f32.mrb[100].mxu0 }
0x163b   : > { %v5351_v25 = vpop.f32.mrb[100].mxu1  ;;  %v7120_v53 = vpop.f32.mrb[101].mxu0 }
0x163c   : > { %v7126_v32 = vpop.f32.mrb[101].mxu1  ;;  %v5308_v58 = vpop.f32.mrb[102].mxu0 }
0x163d   : > { %v5354_v17 = vpop.f32.mrb[102].mxu1  ;;  %v7121_v60 = vpop.f32.mrb[103].mxu0 }
0x163e   : > { %v7127_v63 = vpop.f32.mrb[103].mxu1 }
0x1642   : > { %v5397_v0 = vpop.f32.mrb[104].mxu0 }
0x1643   : > { %v7427_v1 = vpack.i.bf16 %v5397_v0, %v5213_v41  ;;  %v5443_v4 = vpop.f32.mrb[104].mxu1  ;;  %v7132_v29 = vpop.f32.mrb[105].mxu0 }
0x1644   : > { %v7432_v62 = vpack.i.bf16 %v5443_v4, %v5259_v39  ;;  %v7138_v5 = vpop.f32.mrb[105].mxu1  ;;  %v5400_v7 = vpop.f32.mrb[106].mxu0 }
0x1645   : > { %v5446_v56 = vpop.f32.mrb[106].mxu1  ;;  %v7133_v9 = vpop.f32.mrb[107].mxu0  ;;  %7428 = vrot.lane.b32.xlu0 %v7427_v1, %s8711_s11 }
0x1646   : > { %7433 = vrot.lane.b32.xlu1 %v7432_v62, %s8710_s4  ;;  %v7139_v28 = vpop.f32.mrb[107].mxu1  ;;  %s10792_s4 = scalar_lea.vmem [#allocation35], %s9719_s15 }
0x1647   : > { %v6633_v27 = vld [vmem:[%s10792_s4] ss:$0 sm:$0xff] }
0x1652   : > { %v5489_v31 = vpop.f32.mrb[108].mxu0 }
0x1653   : > { %v7437_v50 = vpack.i.bf16 %v5489_v31, %v5305_v59  ;;  %v7144_v49 = vpop.f32.mrb[109].mxu0 }
0x1654   : > { %v5492_v13 = vpop.f32.mrb[110].mxu0 }
0x1655   : > { %v7145_v15 = vpop.f32.mrb[111].mxu0  ;;  %7438 = vrot.lane.b32.xlu0 %v7437_v50, %s8712_s7  ;;  %s10793_s7 = scalar_lea.vmem [#allocation38], %s9727_s22  ;;  %s10795_s22 = scalar_lea.vmem [#allocation36], %s9719_s15 }
0x1656   : > { %v7461_v39 = vld [vmem:[%s10793_s7] sm:$0xff]   ;;  %s10794_s12 = smov %s10793_s7 }
0x1657   : > { %7155 = vmatpush3.bf16.msra.mxu0 %v7461_v39  ;;  %v7462_v42 = vld [vmem:[%s10794_s12 + $0x8] sm:$0xff]   ;;  %v6634_v5 = vld [vmem:[%s10795_s22] ss:$0 sm:$0xff] }
0x1658   : > { %7156 = vmatprep.subr.bf16.mxu0 %v8703_v11  ;;  %v7465_v15 = vld [vmem:[%s9755_s9 + $0x10] sm:$0xff]  }
0x165b   : > { %7157 = vmatpush3.bf16.msra.mxu0 %v7462_v42 }
0x16b7   : > { %v7429_v16 = vpop.permute.xlu0 %7428 }
0x16b8   : > { %v7431_v14 = vunpack.i.h.bf16 %v7429_v16  ;;  %v7430_v19 = vunpack.i.l.bf16 %v7429_v16  ;;  %v7434_v18 = vpop.permute.xlu1 %7433  ;;  %v7466_v16 = vld [vmem:[%s9755_s9 + $0x18] sm:$0xff]   ;;  %s10799_s9 = sld [smem:[#allocation78_spill]] }
0x16b9   : > { %v7436_v22 = vunpack.i.h.bf16 %v7434_v18  ;;  %v7435_v23 = vunpack.i.l.bf16 %v7434_v18 }
0x16ba   : > { %v5507_v21 = vsel %vm2247_vm3, %v5167_v37, %v7430_v19  ;;  %v5522_v20 = vsel %vm2247_vm3, %v5351_v25, %v7431_v14  ;;  %v6636_v14 = vld [vmem:[%s10797_s28] ss:$0 sm:$0xff] }
0x16bb   : > { %v5523_v8 = vsel %vm3134_vm5, %v5522_v20, %v7436_v22  ;;  %v5508_v55 = vsel %vm3134_vm5, %v5507_v21, %v7435_v23 }
0x16be   : > { %p6646_p13 = scmp.ne.s32.totalorder %s10799_s9, 1 }
0x16c7   : > { %v7439_v48 = vpop.permute.xlu0 %7438 }
0x16c8   : > { %v7441_v36 = vunpack.i.h.bf16 %v7439_v48  ;;  %v7440_v61 = vunpack.i.l.bf16 %v7439_v48 }
0x16ca   : > { %v5509_v51 = vsel %vm3136_vm6, %v5508_v55, %v7440_v61  ;;  %v5524_v24 = vsel %vm3136_vm6, %v5523_v8, %v7441_v36  ;;  %v6645_v55 = vld [vmem:[%s10798_s3] ss:$0 sm:$0xff] }
0x16cb   : > { %v5525_v26 = vpack.c.bf16 %v5524_v24, %v5509_v51 }
0x16cd   : > { %7151 = vmatmul.mubr.msk.bf16.vlgmr.msra.gmra.mrb[108].mxu1 %vm2112_vm1, %v5525_v26 }
0x16ce   : > { %7170 = vmatprep.mubr.msk.bf16.mxu1 %vm8704_vm2, %v8703_v11  ;;  %7163 = vmatpush3.bf16.msra.mxu1 %v7463_v43 }
0x16cf   : > { %7164 = vmatprep.subr.bf16.mxu1 %v8703_v11 }
0x16d2   : > { %7165 = vmatpush3.bf16.msra.mxu1 %v7464_v44 }
0x16d3   : > { %7166 = vmatprep.subr.bf16.mxu1 %v8703_v11 }
0x16d6   : > { %7167 = vmatpush3.bf16.msra.mxu1 %v7465_v15 }
0x16d7   : > { %7168 = vmatprep.subr.bf16.mxu1 %v8703_v11 }
0x16da   : > { %7169 = vmatpush3.bf16.msra.mxu1 %v7466_v16 }
0x17a0   : > { %v5575_v30 = vpop.f32.mrb[108].mxu1 }
0x17a1   : > { %v5582_v34 = vadd.f32 %v5575_v30, %v10286_v6  ;;  %v7152_v2 = vpop.f32.mrb[109].mxu1 }
0x17a2   : > { %v5578_v54 = vpop.f32.mrb[110].mxu1 }
0x17a3   : > { %v10544_v47 = vadd.f32 %v6633_v27, %v5582_v34  ;;  %v5583_v35 = vadd.f32 %v5578_v54, %v10289_v52  ;;  %v7153_v3 = vpop.f32.mrb[111].mxu1 }
0x17a5   : > { %v10547_v37 = vadd.f32 %v6633_v27, %v5583_v35  ;;  %v5594_v33 = vsel %vm2112_vm1, %v10544_v47, 0.0  ;;  %v5602_v38 = vmul.f32 %v10544_v47, %v10544_v47 }
0x17a6   : > { %5595 = vadd.xlane.f32.xlu1 %v5594_v33 }
0x17a7   : > { %v5597_v6 = vsel %vm2112_vm1, %v10547_v37, 0.0  ;;  %v5604_v40 = vsel %vm2112_vm1, %v5602_v38, 0.0  ;;  %v5603_v52 = vmul.f32 %v10547_v37, %v10547_v37 }
0x17a8   : > { %5598 = vadd.xlane.f32.xlu0 %v5597_v6 }
0x17a9   : > { %v5607_v41 = vsel %vm2112_vm1, %v5603_v52, 0.0 }
0x17ac   : > { %5605 = vadd.xlane.f32.xlu0 %v5604_v40 }
0x17b0   : > { %5608 = vadd.xlane.f32.xlu0 %v5607_v41 }
0x1833   : > { %v5596_v45 = vpop.xlane.xlu1 %5595 }
0x1834   : > { %v5600_v46 = vmul.f32 0.03125, %v5596_v45 }
0x1835   : > { %v5599_v12 = vpop.xlane.xlu0 %5598 }
0x1836   : > { %v5612_v25 = vmul.f32 %v5600_v46, %v5600_v46  ;;  %v5601_v53 = vmul.f32 0.03125, %v5599_v12  ;;  %v5616_v4 = vsub.f32 %v10544_v47, %v5600_v46 }
0x1838   : > { %v5613_v17 = vmul.f32 %v5601_v53, %v5601_v53  ;;  %v5617_v7 = vsub.f32 %v10547_v37, %v5601_v53 }
0x1839   : > { %v5606_v59 = vpop.xlane.xlu0 %5605 }
0x183a   : > { %v5610_v57 = vmul.f32 0.03125, %v5606_v59 }
0x183c   : > { %v5614_v32 = vsub.f32 %v5610_v57, %v5612_v25 }
0x183d   : > { %v5609_v58 = vpop.xlane.xlu0 %5608 }
0x183e   : > { %v5618_v60 = vadd.f32 1e-05, %v5614_v32  ;;  %v5611_v63 = vmul.f32 0.03125, %v5609_v58 }
0x1840   : > { %7575 = vrsqrt.f32 %v5618_v60  ;;  %v5615_v0 = vsub.f32 %v5611_v63, %v5613_v17 }
0x1842   : > { %v5619_v1 = vadd.f32 1e-05, %v5615_v0 }
0x1844   : > { %7577 = vrsqrt.f32 %v5619_v1 }
0x184a   : > { %v7576_v29 = vpop.eup %7575 }
0x184b   : > { %v5622_v62 = vmul.f32 %v7576_v29, %v5616_v4 }
0x184d   : > { %v5630_v28 = vmul.f32 %v6634_v5, %v5622_v62 }
0x184e   : > { %v7578_v56 = vpop.eup %7577 }
0x184f   : > { %v5623_v9 = vmul.f32 %v7578_v56, %v5617_v7  ;;  %v5638_v50 = vadd.f32 %v6635_v10, %v5630_v28 }
0x1851   : > { %v5631_v31 = vmul.f32 %v6634_v5, %v5623_v9 }
0x1853   : > { %v5639_v49 = vadd.f32 %v6635_v10, %v5631_v31 }
0x1855   : > { %v5640_v13 = vpack.c.bf16 %v5639_v49, %v5638_v50 }
0x1857   : > { %7159 = vmatmul.mubr.msk.bf16.vlgmr.msra.gmra.mrb[112].mxu0 %vm2112_vm1, %v5640_v13 }
0x192a   : > { %v5701_v19 = vpop.f32.mrb[112].mxu0 }
0x192b   : > { %v5702_v18 = vadd.f32 %v6636_v14, %v5701_v19  ;;  %v7160_v22 = vpop.f32.mrb[113].mxu0 }
0x192c   : > { %v5704_v23 = vpop.f32.mrb[114].mxu0 }
0x192d   : > { %v5705_v21 = vadd.f32 %v6636_v14, %v5704_v23  ;;  %v7161_v20 = vpop.f32.mrb[115].mxu0  ;;  %v5708_v48 = vmax.f32 %v5702_v18, 0.0 }
0x192f   : > { %v5709_v36 = vmax.f32 %v5705_v21, 0.0 }
0x1931   : > { %v5710_v61 = vpack.c.bf16 %v5709_v36, %v5708_v48 }
0x1933   : > { %7171 = vmatmul.mubr.msk.bf16.vlgmr.msra.gmra.mrb[112].mxu1 %vm5743_vm7, %v5710_v61 }
0x1a06   : > { %v5781_v8 = vpop.f32.mrb[112].mxu1 }
0x1a07   : > { %v5788_v11 = vadd.f32 %v5781_v8, %v10544_v47  ;;  %v7172_v51 = vpop.f32.mrb[113].mxu1  ;;  %5804 = sbr.rel (%p6646_p13) target bundleno = 6670 (0x1a0e), region = 300 }
0x1a08   : > { %v5784_v24 = vpop.f32.mrb[114].mxu1 }
0x1a09   : > { %v5797_v26 = vadd.f32 %v6645_v55, %v5788_v11  ;;  %v5789_v27 = vadd.f32 %v5784_v24, %v10547_v37  ;;  %v7173_v30 = vpop.f32.mrb[115].mxu1 }
0x1a0b   : > { %5799 = vst.msk [vmem:[#allocation2] sm:$0xff] %vm2112_vm1, %v5797_v26  ;;  %v5798_v34 = vadd.f32 %v6645_v55, %v5789_v27  ;;  %5805 = vst.msk [vmem:[#allocation42] sm:$0xff] (!%p6646_p13), %vm2112_vm1, %v5797_v26 }
0x1a0d   : > { %5800 = vst.msk [vmem:[#allocation2 + $0x8] sm:$0xff] %vm2112_vm1, %v5798_v34  ;;  %5806 = vst.msk [vmem:[#allocation42 + $0x8] sm:$0xff] (!%p6646_p13), %vm2112_vm1, %v5798_v34 }
0x1a0e PF: > { %s10800_s15 = sld [smem:[#allocation79_spill]]  ;;  %s8713_s8 = smov [#allocation42]  }
0x1a0f   : > { %s5816_s17 = sshll.u32 %s8713_s8, 4  ;;  %s5817_s17 = int_to_ptr.vmem [resolvable:$true] %s5816_s17 }
0x1a10   : > { %s8531_s14 = scalar_lea.vmem %s5817_s17, 256  ;;  %p8538_p10 = scmp.lt.s32.totalorder %s5817_s17, %s5817_s17 }
0x1a11   : > { %p8532_p4 = scmp.ne.s32.totalorder %s5817_s17, %s8531_s14  ;;  %p8539_p3 = scmp.lt.s32.totalorder %s8531_s14, %s8531_s14 }
0x1a13   : > { %p8540_p7 = por %p8539_p3, %p8538_p10 }
0x1a14   : > { %p7289_p2 = scmp.eq.s32.totalorder %s10800_s15, 1 }
0x1a16   : > { %p8533_p6 = pnand %p8532_p4, %p7289_p2 }
0x1a18   : > { %p8534_p8 = pneg %p8533_p6 }
0x1a1a   : > { %p8541_p9 = pnand %p8540_p7, %p8534_p8 }
0x1a1c   : > { %8544 = shalt.err (!%p8541_p9)
}
0x1a1d   : > { %s10801_s6 = sld [smem:[#allocation76_spill]] }
0x1a23   : > { %s8545_s5 = scalar_lea.hbm %s10801_s6, 256 }
0x1a24   : > { %p8546_p0 = scmp.ne.s32.totalorder %s10801_s6, %s8545_s5  ;;  %p8551_p12 = scmp.lt.u32.totalorder %s8545_s5, %s10801_s6 }
0x1a26   : > { %p8547_p1 = pnand %p8546_p0, %p7289_p2 }
0x1a28   : > { %p8548_p11 = pneg %p8547_p1 }
0x1a2a   : > { %p8553_p5 = pnand %p8551_p12, %p8548_p11 }
0x1a2c   : > { %8556 = shalt.err (!%p8553_p5)
}
0x1a2d   : > { %s8714_s0 = smov 128  }
0x1a2e   : > { %7255 = dma.vmem_to_hbm [thread:$0]  (%p7289_p2), %s5817_s17, 256, %s10801_s6, [#allocation5], %s8714_s0, %s8714_s0, %s8711_s11  }
0x1a2f   : > { %8602 = dma.done.wait (%p7289_p2), [#allocation5], 256  }
0x1a30   : > { %8604 = vsyncadd (%p7289_p2), [#allocation5], 4294967040 }
0x1a31 PF: > { %s84_s26 = sadd.s32 1, %s8627_s26   ;;  %s10802_s15 = sld [smem:[#allocation77_spill]] }
0x1a32   : > { %p81_p13 = scmp.ge.s32.totalorder %s84_s26, 4   ;;  %s10803_s13 = sld [smem:[#allocation82_spill]] }
0x1a33   : > { %s10804_s10 = sld [smem:[#allocation80_spill]]  ;;  %s10805_s16 = smov %s8615_s18 }
0x1a34   : > { %s10807_s22 = smov %s8623_s23  ;;  %83 = sbr.rel (!%p81_p13) target bundleno = 84 (0x54), region = 562 }
0x1a38   : > { %s10806_s18 = smov %s10803_s13 }
0x1a39   : > { %s10808_s23 = smov %s10804_s10 }
0x1a3b   :  { %5832 = vsyncpa [#allocation4], 1 }
0x1a3c   :  { %5834 = vsyncpa [#allocation4 + $0x1], 1 }
0x1a3d   :  { %5835 = vsyncpa [#allocation7], 1 }
0x1a3e   :  { %5836 = vsyncpa [#allocation10], 1 }
0x1a3f   :  { %5837 = vsyncpa [#allocation13], 1 }
0x1a40   :  { %5838 = vsyncpa [#allocation5], 1 }
0x1a41   :  { %5840 = vsyncpa [#allocation5 + $0x1], 1 }

</bundles_post_ra>
